<compile_context>
chip_gen: v7x
topology: tpu7x:2x2x1
jax: 0.10.0
libtpu: 0.0.40
codegen_flags: <defaults>
</compile_context>

<pallas_src>
import functools

import jax
import jax.numpy as jnp
import numpy as np
from jax.experimental import pallas as pl
from jax.experimental.pallas import tpu as pltpu

# ---------------------------------------------------------------------------
# Model hyper-parameters (the `args` dict of IndyNet)
# ---------------------------------------------------------------------------
INPUT_EMB = 16    # input_embedding_size
ENC_SIZE = 32     # encoder_size
DYN_EMB = 16      # dyn_embedding_size
DEC_SIZE = 32     # decoder_size
OUT_LENGTH = 8    # out_length
SEQ_LEN = 8
BATCH = 8         # TODO(synk): for real workloads batch many scenes (B>=64)
                  # into one call — the kernel is latency-bound at B=8.

GW = 128          # per-gate padded lane-block width (vreg aligned)
NG = 4            # gates (fused order: i | f | o | g)
NC = 3            # encoder chains (fused order: left | hist | right)


def _leaky(x):
    # LeakyReLU(0.1)
    return jnp.maximum(x, 0.1 * x)


def _sigmoid_ref(x):
    return 1.0 / (1.0 + jnp.exp(-x))


def _sigmoid_k(x):
    # single EUP tanh instead of exp + exact divide (per review)
    return 0.5 * jnp.tanh(0.5 * x) + 0.5


def _bdot(a, b):
    # single-pass bf16 MXU matmul with f32 accumulation (reference uses it too,
    # so kernel and reference see identical operand truncation)
    return jnp.dot(a.astype(jnp.bfloat16), b.astype(jnp.bfloat16),
                   preferred_element_type=jnp.float32)


# ---------------------------------------------------------------------------
# Pallas kernel: full IndyNet forward (single grid point, everything in VMEM)
# ---------------------------------------------------------------------------
def indy_net_kernel(
    T, B, T_out,
    x_ref,                  # (T*B, 6)    f32   [left xy | hist xy | right xy]
    ip_w_ref, ip_b_ref,     # (6, 48), (1, 48)      f32   block-diag ip_emb
    enc_wih_ref,            # (48, 512)   bf16  block-diag, gate-major i|f|o|g
    enc_whh_ref,            # (128, 512)  bf16  block-diag recurrent weights
    enc_b_ref,              # (1, 512)    f32
    dyn_w_ref, dyn_b_ref,   # (128, 128) bf16, (1, 128) f32   block-diag dyn_emb
    dec_wih_ref, dec_b_ref, # (128, 512) bf16, (1, 512) f32
    dec_whh_ref,            # (128, 512)  bf16
    op_w_ref, op_b_ref,     # (128, 128) bf16, (1, 128) f32   zero-padded
    out_ref,                # (T_out*B, 128) f32  (lane-dense; cols 5:128 pad)
    xproj_ref,              # scratch VMEM (T*B, 512) f32
    hdec_ref,               # scratch VMEM (T_out*B, 128) f32
):
    bf16 = jnp.bfloat16

    # ---- input embedding (f32, block-diagonal broadcast mults) -------------
    x = x_ref[...]                       # (T*B, 6)
    ip_w = ip_w_ref[...]                 # (6, 48)
    emb = ip_b_ref[...]                  # broadcasts to (T*B, 48)
    for k in range(6):
        emb = emb + x[:, k:k + 1] * ip_w[k:k + 1, :]
    emb = _leaky(emb)                    # (T*B, 48) = leaky(ip_emb) x 3 chains

    # ---- hoisted, gate-fused input projection for all 3 encoders at once ---
    xproj_ref[...] = (
        jnp.dot(emb.astype(bf16), enc_wih_ref[...],
                preferred_element_type=jnp.float32)
        + enc_b_ref[...])                # (T*B, 512) f32, stored to scratch

    # ---- merged encoder recurrence: one matmul + 2 activations per step ----
    h = jnp.zeros((B, GW), jnp.float32)  # [left(32)|hist(32)|right(32)|pad]
    c = jnp.zeros((B, GW), jnp.float32)
    for t in range(T):
        g = xproj_ref[t * B:(t + 1) * B, :] + jnp.dot(
            h.astype(bf16), enc_whh_ref[...],
            preferred_element_type=jnp.float32)            # (B, 512)
        sg = _sigmoid_k(g[:, 0:3 * GW])                    # i | f | o (3 vregs)
        tg = jnp.tanh(g[:, 3 * GW:4 * GW])                 # g (1 vreg)
        c = sg[:, GW:2 * GW] * c + sg[:, 0:GW] * tg        # f*c + i*g
        h = sg[:, 2 * GW:3 * GW] * jnp.tanh(c)             # o*tanh(c)

    # ---- dyn_emb (block-diag, all three encodings in one matmul) + leaky ---
    enc = _leaky(jnp.dot(h.astype(bf16), dyn_w_ref[...],
                         preferred_element_type=jnp.float32)
                 + dyn_b_ref[...])       # (B, 128): [left_e|hist_e|right_e|0]

    # ---- decoder: constant input -> single gate-fused x-projection ---------
    xg = (jnp.dot(enc.astype(bf16), dec_wih_ref[...],
                  preferred_element_type=jnp.float32)
          + dec_b_ref[...])              # (B, 512)

    hd = jnp.zeros((B, GW), jnp.float32)
    cd = jnp.zeros((B, GW), jnp.float32)
    for t in range(T_out):
        g = xg + jnp.dot(hd.astype(bf16), dec_whh_ref[...],
                         preferred_element_type=jnp.float32)
        sg = _sigmoid_k(g[:, 0:3 * GW])
        tg = jnp.tanh(g[:, 3 * GW:4 * GW])
        cd = sg[:, GW:2 * GW] * cd + sg[:, 0:GW] * tg
        hd = sg[:, 2 * GW:3 * GW] * jnp.tanh(cd)
        hdec_ref[t * B:(t + 1) * B, :] = hd                # stream to scratch

    # ---- output linear + outputActivation, one batched lane-dense write ----
    y = (jnp.dot(hdec_ref[...].astype(bf16), op_w_ref[...],
                 preferred_element_type=jnp.float32)
         + op_b_ref[...])                                  # (T_out*B, 128)
    col = jax.lax.broadcasted_iota(jnp.int32, y.shape, 1)
    # cols 0,1 identity; 2,3 exp; rest tanh (padded cols are 0 -> tanh(0)=0)
    e = jnp.exp(jnp.where((col >= 2) & (col < 4), y, 0.0))
    y = jnp.where(col < 2, y, jnp.where(col < 4, e, jnp.tanh(y)))
    out_ref[...] = y


# ---------------------------------------------------------------------------
# Wrapper: repacks torch-style per-gate params into fused block-diag layouts
# ---------------------------------------------------------------------------
def _pack_params(p):
    f32, bf16 = jnp.float32, jnp.bfloat16
    E, H, P, D = INPUT_EMB, ENC_SIZE, DYN_EMB, DEC_SIZE
    gate_pos = (0, 1, 3, 2)   # fused gate block -> param gate index (i,f,o,g)
    chain_enc = (1, 0, 2)     # fused chain (left,hist,right) -> enc param idx

    ip_w = jnp.zeros((2 * NC, NC * E), f32)
    ip_b = jnp.zeros((1, NC * E), f32)
    for c in range(NC):
        ip_w = ip_w.at[2 * c:2 * c + 2, c * E:(c + 1) * E].set(p["ip_w"])
        ip_b = ip_b.at[:, c * E:(c + 1) * E].set(p["ip_b"])

    enc_wih = jnp.zeros((NC * E, NG * GW), f32)
    enc_whh = jnp.zeros((GW, NG * GW), f32)
    enc_b = jnp.zeros((1, NG * GW), f32)
    for c, pe in enumerate(chain_enc):
        for gi, pg in enumerate(gate_pos):
            cs = gi * GW + c * H
            enc_wih = enc_wih.at[c * E:(c + 1) * E, cs:cs + H].set(p["enc_wih"][pe, pg])
            enc_whh = enc_whh.at[c * H:(c + 1) * H, cs:cs + H].set(p["enc_whh"][pe, pg])
            enc_b = enc_b.at[:, cs:cs + H].set(p["enc_b"][pe, pg])

    dyn_w = jnp.zeros((GW, GW), f32)
    dyn_b = jnp.zeros((1, GW), f32)
    for c in range(NC):
        dyn_w = dyn_w.at[c * H:(c + 1) * H, c * P:(c + 1) * P].set(p["dyn_w"])
        dyn_b = dyn_b.at[:, c * P:(c + 1) * P].set(p["dyn_b"])

    dec_wih = jnp.zeros((GW, NG * GW), f32)
    dec_whh = jnp.zeros((GW, NG * GW), f32)
    dec_b = jnp.zeros((1, NG * GW), f32)
    for gi, pg in enumerate(gate_pos):
        cs = gi * GW
        dec_whh = dec_whh.at[0:D, cs:cs + D].set(p["dec_whh"][pg])
        dec_b = dec_b.at[:, cs:cs + D].set(p["dec_b"][pg])
        for c in range(NC):   # dec_wih param k-order is already (left,hist,right)
            dec_wih = dec_wih.at[c * P:(c + 1) * P, cs:cs + D].set(p["dec_wih"][pg, c])

    op_w = jnp.zeros((GW, GW), f32).at[0:D, 0:5].set(p["op_w"])
    op_b = jnp.zeros((1, GW), f32).at[:, 0:5].set(p["op_b"])

    return (ip_w, ip_b,
            enc_wih.astype(bf16), enc_whh.astype(bf16), enc_b,
            dyn_w.astype(bf16), dyn_b,
            dec_wih.astype(bf16), dec_b, dec_whh.astype(bf16),
            op_w.astype(bf16), op_b)


@functools.partial(jax.jit, static_argnames=("out_length",))
def indy_net_forward(hist, left, right, params, *, out_length=OUT_LENGTH):
    T, B, _ = hist.shape
    packed = _pack_params(params)
    # columns [left xy | hist xy | right xy], rows time-major then batch
    x_cat = jnp.concatenate(
        [left.reshape(T * B, 2), hist.reshape(T * B, 2), right.reshape(T * B, 2)],
        axis=1)

    args = (x_cat,) + packed
    vmem = pl.BlockSpec(memory_space=pltpu.MemorySpace.VMEM)
    out = pl.pallas_call(
        functools.partial(indy_net_kernel, T, B, out_length),
        out_shape=jax.ShapeDtypeStruct((out_length * B, GW), jnp.float32),
        in_specs=[vmem] * len(args),
        out_specs=vmem,
        scratch_shapes=[pltpu.VMEM((T * B, NG * GW), jnp.float32),
                        pltpu.VMEM((out_length * B, GW), jnp.float32)],
    )(*args)
    return out[:, :5].reshape(out_length, B, 5)


# ---------------------------------------------------------------------------
# Pure-JAX reference (original per-gate parameter layout) for correctness
# ---------------------------------------------------------------------------
def reference_forward(hist, left, right, p, out_length=OUT_LENGTH):
    def embed(x):  # (T, B, 2)
        return _leaky(x[..., 0:1] * p["ip_w"][0] + x[..., 1:2] * p["ip_w"][1]
                      + p["ip_b"][0])

    def lstm(seq, wih, whh, b):
        T_, B_, _ = seq.shape
        H_ = whh.shape[-1]

        def step(carry, x):
            h, c = carry
            gs = [_bdot(x, wih[g]) + _bdot(h, whh[g]) + b[g] for g in range(4)]
            i = _sigmoid_ref(gs[0]); f = _sigmoid_ref(gs[1])
            g_ = jnp.tanh(gs[2]); o = _sigmoid_ref(gs[3])
            c = f * c + i * g_
            h = o * jnp.tanh(c)
            return (h, c), None

        (h, _), _ = jax.lax.scan(
            step, (jnp.zeros((B_, H_)), jnp.zeros((B_, H_))), seq)
        return h

    hist_h = lstm(embed(hist), p["enc_wih"][0], p["enc_whh"][0], p["enc_b"][0])
    left_h = lstm(embed(left), p["enc_wih"][1], p["enc_whh"][1], p["enc_b"][1])
    right_h = lstm(embed(right), p["enc_wih"][2], p["enc_whh"][2], p["enc_b"][2])

    def dyn(h):
        return _leaky(_bdot(h, p["dyn_w"]) + p["dyn_b"])

    left_e, hist_e, right_e = dyn(left_h), dyn(hist_h), dyn(right_h)
    B = hist_e.shape[0]
    D = p["dec_whh"].shape[-1]

    xg = [_bdot(left_e, p["dec_wih"][g, 0]) + _bdot(hist_e, p["dec_wih"][g, 1])
          + _bdot(right_e, p["dec_wih"][g, 2]) + p["dec_b"][g] for g in range(4)]

    h = jnp.zeros((B, D)); c = jnp.zeros((B, D))
    outs = []
    for _ in range(out_length):
        gs = [xg[g] + _bdot(h, p["dec_whh"][g]) for g in range(4)]
        i = _sigmoid_ref(gs[0]); f = _sigmoid_ref(gs[1])
        g_ = jnp.tanh(gs[2]); o = _sigmoid_ref(gs[3])
        c = f * c + i * g_
        h = o * jnp.tanh(c)
        y = _bdot(h, p["op_w"]) + p["op_b"]
        y = jnp.concatenate(
            [y[:, 0:2], jnp.exp(y[:, 2:4]), jnp.tanh(y[:, 4:5])], axis=-1)
        outs.append(y)
    return jnp.stack(outs, axis=0)


# ---------------------------------------------------------------------------
# Deterministic parameter / input construction
# ---------------------------------------------------------------------------
def make_params(key):
    ks = jax.random.split(key, 16)
    s = 0.2
    P = DYN_EMB
    return {
        "ip_w": s * jax.random.normal(ks[0], (2, INPUT_EMB), jnp.float32),
        "ip_b": s * jax.random.normal(ks[1], (1, INPUT_EMB), jnp.float32),
        "enc_wih": s * jax.random.normal(ks[2], (3, 4, INPUT_EMB, ENC_SIZE), jnp.float32),
        "enc_whh": s * jax.random.normal(ks[3], (3, 4, ENC_SIZE, ENC_SIZE), jnp.float32),
        "enc_b": s * jax.random.normal(ks[4], (3, 4, 1, ENC_SIZE), jnp.float32),
        "dyn_w": s * jax.random.normal(ks[5], (ENC_SIZE, P), jnp.float32),
        "dyn_b": s * jax.random.normal(ks[6], (1, P), jnp.float32),
        "dec_wih": s * jax.random.normal(ks[7], (4, 3, P, DEC_SIZE), jnp.float32),
        "dec_whh": s * jax.random.normal(ks[8], (4, DEC_SIZE, DEC_SIZE), jnp.float32),
        "dec_b": s * jax.random.normal(ks[9], (4, 1, DEC_SIZE), jnp.float32),
        "op_w": s * jax.random.normal(ks[10], (DEC_SIZE, 5), jnp.float32),
        "op_b": s * jax.random.normal(ks[11], (1, 5), jnp.float32),
    }


if __name__ == "__main__":
    key = jax.random.PRNGKey(0)
    kp, kh, kl, kr = jax.random.split(key, 4)
    params = make_params(kp)

    hist = jax.random.normal(kh, (SEQ_LEN, BATCH, 2), jnp.float32)
    left = jax.random.normal(kl, (SEQ_LEN, BATCH, 2), jnp.float32)
    right = jax.random.normal(kr, (SEQ_LEN, BATCH, 2), jnp.float32)

    out = indy_net_forward(hist, left, right, params)
    out = jax.block_until_ready(out)

    ref = jax.block_until_ready(reference_forward(hist, left, right, params))
    np.testing.assert_allclose(np.asarray(out), np.asarray(ref), rtol=2e-3, atol=2e-3)

    assert out.shape == (OUT_LENGTH, BATCH, 5)
    print("KERNEL_OK")
</pallas_src>

<mosaic_0001>
module attributes {stable_mosaic.version = 11 : i64} {
  func.func @indy_net_kernel(%arg0: memref<64x6xf32, #tpu.memory_space<vmem>>, %arg1: memref<6x48xf32, #tpu.memory_space<vmem>>, %arg2: memref<1x48xf32, #tpu.memory_space<vmem>>, %arg3: memref<48x512xbf16, #tpu.memory_space<vmem>>, %arg4: memref<128x512xbf16, #tpu.memory_space<vmem>>, %arg5: memref<1x512xf32, #tpu.memory_space<vmem>>, %arg6: memref<128x128xbf16, #tpu.memory_space<vmem>>, %arg7: memref<1x128xf32, #tpu.memory_space<vmem>>, %arg8: memref<128x512xbf16, #tpu.memory_space<vmem>>, %arg9: memref<1x512xf32, #tpu.memory_space<vmem>>, %arg10: memref<128x512xbf16, #tpu.memory_space<vmem>>, %arg11: memref<128x128xbf16, #tpu.memory_space<vmem>>, %arg12: memref<1x128xf32, #tpu.memory_space<vmem>>, %arg13: memref<64x128xf32, #tpu.memory_space<vmem>>, %arg14: memref<64x512xf32, #tpu.memory_space<vmem>>, %arg15: memref<64x128xf32, #tpu.memory_space<vmem>>) attributes {dimension_semantics = [], scalar_prefetch = 0 : i64, scratch_operands = 2 : i64, tpu.core_type = #tpu.core_type<tc>} {
    %c0 = arith.constant 0 : index
    %c0_0 = arith.constant 0 : index
    %0 = vector.load %arg0[%c0, %c0_0] : memref<64x6xf32, #tpu.memory_space<vmem>>, vector<64x6xf32>
    %c0_1 = arith.constant 0 : index
    %c0_2 = arith.constant 0 : index
    %1 = vector.load %arg1[%c0_1, %c0_2] : memref<6x48xf32, #tpu.memory_space<vmem>>, vector<6x48xf32>
    %c0_3 = arith.constant 0 : index
    %c0_4 = arith.constant 0 : index
    %2 = vector.load %arg2[%c0_3, %c0_4] : memref<1x48xf32, #tpu.memory_space<vmem>>, vector<1x48xf32>
    %3 = vector.extract_strided_slice %0 {offsets = [0, 0], sizes = [64, 1], strides = [1, 1]} : vector<64x6xf32> to vector<64x1xf32>
    %4 = vector.extract_strided_slice %1 {offsets = [0, 0], sizes = [1, 48], strides = [1, 1]} : vector<6x48xf32> to vector<1x48xf32>
    %5 = vector.broadcast %3 : vector<64x1xf32> to vector<64x48xf32>
    %6 = vector.broadcast %4 : vector<1x48xf32> to vector<64x48xf32>
    %7 = arith.mulf %5, %6 : vector<64x48xf32>
    %8 = vector.broadcast %2 : vector<1x48xf32> to vector<64x48xf32>
    %9 = arith.addf %8, %7 : vector<64x48xf32>
    %10 = vector.extract_strided_slice %0 {offsets = [0, 1], sizes = [64, 1], strides = [1, 1]} : vector<64x6xf32> to vector<64x1xf32>
    %11 = vector.extract_strided_slice %1 {offsets = [1, 0], sizes = [1, 48], strides = [1, 1]} : vector<6x48xf32> to vector<1x48xf32>
    %12 = vector.broadcast %10 : vector<64x1xf32> to vector<64x48xf32>
    %13 = vector.broadcast %11 : vector<1x48xf32> to vector<64x48xf32>
    %14 = arith.mulf %12, %13 : vector<64x48xf32>
    %15 = arith.addf %9, %14 : vector<64x48xf32>
    %16 = vector.extract_strided_slice %0 {offsets = [0, 2], sizes = [64, 1], strides = [1, 1]} : vector<64x6xf32> to vector<64x1xf32>
    %17 = vector.extract_strided_slice %1 {offsets = [2, 0], sizes = [1, 48], strides = [1, 1]} : vector<6x48xf32> to vector<1x48xf32>
    %18 = vector.broadcast %16 : vector<64x1xf32> to vector<64x48xf32>
    %19 = vector.broadcast %17 : vector<1x48xf32> to vector<64x48xf32>
    %20 = arith.mulf %18, %19 : vector<64x48xf32>
    %21 = arith.addf %15, %20 : vector<64x48xf32>
    %22 = vector.extract_strided_slice %0 {offsets = [0, 3], sizes = [64, 1], strides = [1, 1]} : vector<64x6xf32> to vector<64x1xf32>
    %23 = vector.extract_strided_slice %1 {offsets = [3, 0], sizes = [1, 48], strides = [1, 1]} : vector<6x48xf32> to vector<1x48xf32>
    %24 = vector.broadcast %22 : vector<64x1xf32> to vector<64x48xf32>
    %25 = vector.broadcast %23 : vector<1x48xf32> to vector<64x48xf32>
    %26 = arith.mulf %24, %25 : vector<64x48xf32>
    %27 = arith.addf %21, %26 : vector<64x48xf32>
    %28 = vector.extract_strided_slice %0 {offsets = [0, 4], sizes = [64, 1], strides = [1, 1]} : vector<64x6xf32> to vector<64x1xf32>
    %29 = vector.extract_strided_slice %1 {offsets = [4, 0], sizes = [1, 48], strides = [1, 1]} : vector<6x48xf32> to vector<1x48xf32>
    %30 = vector.broadcast %28 : vector<64x1xf32> to vector<64x48xf32>
    %31 = vector.broadcast %29 : vector<1x48xf32> to vector<64x48xf32>
    %32 = arith.mulf %30, %31 : vector<64x48xf32>
    %33 = arith.addf %27, %32 : vector<64x48xf32>
    %34 = vector.extract_strided_slice %0 {offsets = [0, 5], sizes = [64, 1], strides = [1, 1]} : vector<64x6xf32> to vector<64x1xf32>
    %35 = vector.extract_strided_slice %1 {offsets = [5, 0], sizes = [1, 48], strides = [1, 1]} : vector<6x48xf32> to vector<1x48xf32>
    %36 = vector.broadcast %34 : vector<64x1xf32> to vector<64x48xf32>
    %37 = vector.broadcast %35 : vector<1x48xf32> to vector<64x48xf32>
    %38 = arith.mulf %36, %37 : vector<64x48xf32>
    %39 = arith.addf %33, %38 : vector<64x48xf32>
    %cst = arith.constant 1.000000e-01 : f32
    %40 = vector.broadcast %cst : f32 to vector<64x48xf32>
    %41 = arith.mulf %40, %39 : vector<64x48xf32>
    %42 = arith.maximumf %39, %41 : vector<64x48xf32>
    %43 = arith.truncf %42 : vector<64x48xf32> to vector<64x48xbf16>
    %c0_5 = arith.constant 0 : index
    %c0_6 = arith.constant 0 : index
    %44 = vector.load %arg3[%c0_5, %c0_6] : memref<48x512xbf16, #tpu.memory_space<vmem>>, vector<48x512xbf16>
    %cst_7 = arith.constant dense<0.000000e+00> : vector<64x512xf32>
    %45 = tpu.matmul %43, %44, %cst_7 {dimension_numbers = #tpu.dot_dimension_numbers<[1], [0], [0], [1], [0, 0, 1, 1], [], []>} : vector<64x48xbf16>, vector<48x512xbf16>, vector<64x512xf32> -> vector<64x512xf32>
    %c0_8 = arith.constant 0 : index
    %c0_9 = arith.constant 0 : index
    %46 = vector.load %arg5[%c0_8, %c0_9] : memref<1x512xf32, #tpu.memory_space<vmem>>, vector<1x512xf32>
    %47 = vector.broadcast %46 : vector<1x512xf32> to vector<64x512xf32>
    %48 = arith.addf %45, %47 : vector<64x512xf32>
    %c0_10 = arith.constant 0 : index
    %c0_11 = arith.constant 0 : index
    %49 = vector.load %arg14[%c0_10, %c0_11] : memref<64x512xf32, #tpu.memory_space<vmem>>, vector<64x512xf32>
    tpu.vector_store %arg14[%c0_10, %c0_11], %48 {strides = array<i32>} : memref<64x512xf32, #tpu.memory_space<vmem>>, vector<64x512xf32>,
    %cst_12 = arith.constant 0.000000e+00 : f32
    %50 = vector.broadcast %cst_12 : f32 to vector<8x128xf32>
    %cst_13 = arith.constant 0.000000e+00 : f32
    %51 = vector.broadcast %cst_13 : f32 to vector<8x128xf32>
    %c0_14 = arith.constant 0 : index
    %c0_15 = arith.constant 0 : index
    %52 = vector.load %arg14[%c0_14, %c0_15] : memref<64x512xf32, #tpu.memory_space<vmem>>, vector<8x512xf32>
    %53 = arith.truncf %50 : vector<8x128xf32> to vector<8x128xbf16>
    %c0_16 = arith.constant 0 : index
    %c0_17 = arith.constant 0 : index
    %54 = vector.load %arg4[%c0_16, %c0_17] : memref<128x512xbf16, #tpu.memory_space<vmem>>, vector<128x512xbf16>
    %cst_18 = arith.constant dense<0.000000e+00> : vector<8x512xf32>
    %55 = tpu.matmul %53, %54, %cst_18 {dimension_numbers = #tpu.dot_dimension_numbers<[1], [0], [0], [1], [0, 0, 1, 1], [], []>} : vector<8x128xbf16>, vector<128x512xbf16>, vector<8x512xf32> -> vector<8x512xf32>
    %56 = arith.addf %52, %55 : vector<8x512xf32>
    %57 = vector.extract_strided_slice %56 {offsets = [0, 0], sizes = [8, 384], strides = [1, 1]} : vector<8x512xf32> to vector<8x384xf32>
    %cst_19 = arith.constant 5.000000e-01 : f32
    %58 = vector.broadcast %cst_19 : f32 to vector<8x384xf32>
    %59 = arith.mulf %58, %57 : vector<8x384xf32>
    %60 = math.tanh %59 : vector<8x384xf32>
    %cst_20 = arith.constant 5.000000e-01 : f32
    %61 = vector.broadcast %cst_20 : f32 to vector<8x384xf32>
    %62 = arith.mulf %61, %60 : vector<8x384xf32>
    %cst_21 = arith.constant 5.000000e-01 : f32
    %63 = vector.broadcast %cst_21 : f32 to vector<8x384xf32>
    %64 = arith.addf %62, %63 : vector<8x384xf32>
    %65 = vector.extract_strided_slice %56 {offsets = [0, 384], sizes = [8, 128], strides = [1, 1]} : vector<8x512xf32> to vector<8x128xf32>
    %66 = math.tanh %65 : vector<8x128xf32>
    %67 = vector.extract_strided_slice %64 {offsets = [0, 128], sizes = [8, 128], strides = [1, 1]} : vector<8x384xf32> to vector<8x128xf32>
    %68 = arith.mulf %67, %51 : vector<8x128xf32>
    %69 = vector.extract_strided_slice %64 {offsets = [0, 0], sizes = [8, 128], strides = [1, 1]} : vector<8x384xf32> to vector<8x128xf32>
    %70 = arith.mulf %69, %66 : vector<8x128xf32>
    %71 = arith.addf %68, %70 : vector<8x128xf32>
    %72 = vector.extract_strided_slice %64 {offsets = [0, 256], sizes = [8, 128], strides = [1, 1]} : vector<8x384xf32> to vector<8x128xf32>
    %73 = math.tanh %71 : vector<8x128xf32>
    %74 = arith.mulf %72, %73 : vector<8x128xf32>
    %c8 = arith.constant 8 : index
    %c0_22 = arith.constant 0 : index
    %75 = vector.load %arg14[%c8, %c0_22] : memref<64x512xf32, #tpu.memory_space<vmem>>, vector<8x512xf32>
    %76 = arith.truncf %74 : vector<8x128xf32> to vector<8x128xbf16>
    %c0_23 = arith.constant 0 : index
    %c0_24 = arith.constant 0 : index
    %77 = vector.load %arg4[%c0_23, %c0_24] : memref<128x512xbf16, #tpu.memory_space<vmem>>, vector<128x512xbf16>
    %cst_25 = arith.constant dense<0.000000e+00> : vector<8x512xf32>
    %78 = tpu.matmul %76, %77, %cst_25 {dimension_numbers = #tpu.dot_dimension_numbers<[1], [0], [0], [1], [0, 0, 1, 1], [], []>} : vector<8x128xbf16>, vector<128x512xbf16>, vector<8x512xf32> -> vector<8x512xf32>
    %79 = arith.addf %75, %78 : vector<8x512xf32>
    %80 = vector.extract_strided_slice %79 {offsets = [0, 0], sizes = [8, 384], strides = [1, 1]} : vector<8x512xf32> to vector<8x384xf32>
    %cst_26 = arith.constant 5.000000e-01 : f32
    %81 = vector.broadcast %cst_26 : f32 to vector<8x384xf32>
    %82 = arith.mulf %81, %80 : vector<8x384xf32>
    %83 = math.tanh %82 : vector<8x384xf32>
    %cst_27 = arith.constant 5.000000e-01 : f32
    %84 = vector.broadcast %cst_27 : f32 to vector<8x384xf32>
    %85 = arith.mulf %84, %83 : vector<8x384xf32>
    %cst_28 = arith.constant 5.000000e-01 : f32
    %86 = vector.broadcast %cst_28 : f32 to vector<8x384xf32>
    %87 = arith.addf %85, %86 : vector<8x384xf32>
    %88 = vector.extract_strided_slice %79 {offsets = [0, 384], sizes = [8, 128], strides = [1, 1]} : vector<8x512xf32> to vector<8x128xf32>
    %89 = math.tanh %88 : vector<8x128xf32>
    %90 = vector.extract_strided_slice %87 {offsets = [0, 128], sizes = [8, 128], strides = [1, 1]} : vector<8x384xf32> to vector<8x128xf32>
    %91 = arith.mulf %90, %71 : vector<8x128xf32>
    %92 = vector.extract_strided_slice %87 {offsets = [0, 0], sizes = [8, 128], strides = [1, 1]} : vector<8x384xf32> to vector<8x128xf32>
    %93 = arith.mulf %92, %89 : vector<8x128xf32>
    %94 = arith.addf %91, %93 : vector<8x128xf32>
    %95 = vector.extract_strided_slice %87 {offsets = [0, 256], sizes = [8, 128], strides = [1, 1]} : vector<8x384xf32> to vector<8x128xf32>
    %96 = math.tanh %94 : vector<8x128xf32>
    %97 = arith.mulf %95, %96 : vector<8x128xf32>
    %c16 = arith.constant 16 : index
    %c0_29 = arith.constant 0 : index
    %98 = vector.load %arg14[%c16, %c0_29] : memref<64x512xf32, #tpu.memory_space<vmem>>, vector<8x512xf32>
    %99 = arith.truncf %97 : vector<8x128xf32> to vector<8x128xbf16>
    %c0_30 = arith.constant 0 : index
    %c0_31 = arith.constant 0 : index
    %100 = vector.load %arg4[%c0_30, %c0_31] : memref<128x512xbf16, #tpu.memory_space<vmem>>, vector<128x512xbf16>
    %cst_32 = arith.constant dense<0.000000e+00> : vector<8x512xf32>
    %101 = tpu.matmul %99, %100, %cst_32 {dimension_numbers = #tpu.dot_dimension_numbers<[1], [0], [0], [1], [0, 0, 1, 1], [], []>} : vector<8x128xbf16>, vector<128x512xbf16>, vector<8x512xf32> -> vector<8x512xf32>
    %102 = arith.addf %98, %101 : vector<8x512xf32>
    %103 = vector.extract_strided_slice %102 {offsets = [0, 0], sizes = [8, 384], strides = [1, 1]} : vector<8x512xf32> to vector<8x384xf32>
    %cst_33 = arith.constant 5.000000e-01 : f32
    %104 = vector.broadcast %cst_33 : f32 to vector<8x384xf32>
    %105 = arith.mulf %104, %103 : vector<8x384xf32>
    %106 = math.tanh %105 : vector<8x384xf32>
    %cst_34 = arith.constant 5.000000e-01 : f32
    %107 = vector.broadcast %cst_34 : f32 to vector<8x384xf32>
    %108 = arith.mulf %107, %106 : vector<8x384xf32>
    %cst_35 = arith.constant 5.000000e-01 : f32
    %109 = vector.broadcast %cst_35 : f32 to vector<8x384xf32>
    %110 = arith.addf %108, %109 : vector<8x384xf32>
    %111 = vector.extract_strided_slice %102 {offsets = [0, 384], sizes = [8, 128], strides = [1, 1]} : vector<8x512xf32> to vector<8x128xf32>
    %112 = math.tanh %111 : vector<8x128xf32>
    %113 = vector.extract_strided_slice %110 {offsets = [0, 128], sizes = [8, 128], strides = [1, 1]} : vector<8x384xf32> to vector<8x128xf32>
    %114 = arith.mulf %113, %94 : vector<8x128xf32>
    %115 = vector.extract_strided_slice %110 {offsets = [0, 0], sizes = [8, 128], strides = [1, 1]} : vector<8x384xf32> to vector<8x128xf32>
    %116 = arith.mulf %115, %112 : vector<8x128xf32>
    %117 = arith.addf %114, %116 : vector<8x128xf32>
    %118 = vector.extract_strided_slice %110 {offsets = [0, 256], sizes = [8, 128], strides = [1, 1]} : vector<8x384xf32> to vector<8x128xf32>
    %119 = math.tanh %117 : vector<8x128xf32>
    %120 = arith.mulf %118, %119 : vector<8x128xf32>
    %c24 = arith.constant 24 : index
    %c0_36 = arith.constant 0 : index
    %121 = vector.load %arg14[%c24, %c0_36] : memref<64x512xf32, #tpu.memory_space<vmem>>, vector<8x512xf32>
    %122 = arith.truncf %120 : vector<8x128xf32> to vector<8x128xbf16>
    %c0_37 = arith.constant 0 : index
    %c0_38 = arith.constant 0 : index
    %123 = vector.load %arg4[%c0_37, %c0_38] : memref<128x512xbf16, #tpu.memory_space<vmem>>, vector<128x512xbf16>
    %cst_39 = arith.constant dense<0.000000e+00> : vector<8x512xf32>
    %124 = tpu.matmul %122, %123, %cst_39 {dimension_numbers = #tpu.dot_dimension_numbers<[1], [0], [0], [1], [0, 0, 1, 1], [], []>} : vector<8x128xbf16>, vector<128x512xbf16>, vector<8x512xf32> -> vector<8x512xf32>
    %125 = arith.addf %121, %124 : vector<8x512xf32>
    %126 = vector.extract_strided_slice %125 {offsets = [0, 0], sizes = [8, 384], strides = [1, 1]} : vector<8x512xf32> to vector<8x384xf32>
    %cst_40 = arith.constant 5.000000e-01 : f32
    %127 = vector.broadcast %cst_40 : f32 to vector<8x384xf32>
    %128 = arith.mulf %127, %126 : vector<8x384xf32>
    %129 = math.tanh %128 : vector<8x384xf32>
    %cst_41 = arith.constant 5.000000e-01 : f32
    %130 = vector.broadcast %cst_41 : f32 to vector<8x384xf32>
    %131 = arith.mulf %130, %129 : vector<8x384xf32>
    %cst_42 = arith.constant 5.000000e-01 : f32
    %132 = vector.broadcast %cst_42 : f32 to vector<8x384xf32>
    %133 = arith.addf %131, %132 : vector<8x384xf32>
    %134 = vector.extract_strided_slice %125 {offsets = [0, 384], sizes = [8, 128], strides = [1, 1]} : vector<8x512xf32> to vector<8x128xf32>
    %135 = math.tanh %134 : vector<8x128xf32>
    %136 = vector.extract_strided_slice %133 {offsets = [0, 128], sizes = [8, 128], strides = [1, 1]} : vector<8x384xf32> to vector<8x128xf32>
    %137 = arith.mulf %136, %117 : vector<8x128xf32>
    %138 = vector.extract_strided_slice %133 {offsets = [0, 0], sizes = [8, 128], strides = [1, 1]} : vector<8x384xf32> to vector<8x128xf32>
    %139 = arith.mulf %138, %135 : vector<8x128xf32>
    %140 = arith.addf %137, %139 : vector<8x128xf32>
    %141 = vector.extract_strided_slice %133 {offsets = [0, 256], sizes = [8, 128], strides = [1, 1]} : vector<8x384xf32> to vector<8x128xf32>
    %142 = math.tanh %140 : vector<8x128xf32>
    %143 = arith.mulf %141, %142 : vector<8x128xf32>
    %c32 = arith.constant 32 : index
    %c0_43 = arith.constant 0 : index
    %144 = vector.load %arg14[%c32, %c0_43] : memref<64x512xf32, #tpu.memory_space<vmem>>, vector<8x512xf32>
    %145 = arith.truncf %143 : vector<8x128xf32> to vector<8x128xbf16>
    %c0_44 = arith.constant 0 : index
    %c0_45 = arith.constant 0 : index
    %146 = vector.load %arg4[%c0_44, %c0_45] : memref<128x512xbf16, #tpu.memory_space<vmem>>, vector<128x512xbf16>
    %cst_46 = arith.constant dense<0.000000e+00> : vector<8x512xf32>
    %147 = tpu.matmul %145, %146, %cst_46 {dimension_numbers = #tpu.dot_dimension_numbers<[1], [0], [0], [1], [0, 0, 1, 1], [], []>} : vector<8x128xbf16>, vector<128x512xbf16>, vector<8x512xf32> -> vector<8x512xf32>
    %148 = arith.addf %144, %147 : vector<8x512xf32>
    %149 = vector.extract_strided_slice %148 {offsets = [0, 0], sizes = [8, 384], strides = [1, 1]} : vector<8x512xf32> to vector<8x384xf32>
    %cst_47 = arith.constant 5.000000e-01 : f32
    %150 = vector.broadcast %cst_47 : f32 to vector<8x384xf32>
    %151 = arith.mulf %150, %149 : vector<8x384xf32>
    %152 = math.tanh %151 : vector<8x384xf32>
    %cst_48 = arith.constant 5.000000e-01 : f32
    %153 = vector.broadcast %cst_48 : f32 to vector<8x384xf32>
    %154 = arith.mulf %153, %152 : vector<8x384xf32>
    %cst_49 = arith.constant 5.000000e-01 : f32
    %155 = vector.broadcast %cst_49 : f32 to vector<8x384xf32>
    %156 = arith.addf %154, %155 : vector<8x384xf32>
    %157 = vector.extract_strided_slice %148 {offsets = [0, 384], sizes = [8, 128], strides = [1, 1]} : vector<8x512xf32> to vector<8x128xf32>
    %158 = math.tanh %157 : vector<8x128xf32>
    %159 = vector.extract_strided_slice %156 {offsets = [0, 128], sizes = [8, 128], strides = [1, 1]} : vector<8x384xf32> to vector<8x128xf32>
    %160 = arith.mulf %159, %140 : vector<8x128xf32>
    %161 = vector.extract_strided_slice %156 {offsets = [0, 0], sizes = [8, 128], strides = [1, 1]} : vector<8x384xf32> to vector<8x128xf32>
    %162 = arith.mulf %161, %158 : vector<8x128xf32>
    %163 = arith.addf %160, %162 : vector<8x128xf32>
    %164 = vector.extract_strided_slice %156 {offsets = [0, 256], sizes = [8, 128], strides = [1, 1]} : vector<8x384xf32> to vector<8x128xf32>
    %165 = math.tanh %163 : vector<8x128xf32>
    %166 = arith.mulf %164, %165 : vector<8x128xf32>
    %c40 = arith.constant 40 : index
    %c0_50 = arith.constant 0 : index
    %167 = vector.load %arg14[%c40, %c0_50] : memref<64x512xf32, #tpu.memory_space<vmem>>, vector<8x512xf32>
    %168 = arith.truncf %166 : vector<8x128xf32> to vector<8x128xbf16>
    %c0_51 = arith.constant 0 : index
    %c0_52 = arith.constant 0 : index
    %169 = vector.load %arg4[%c0_51, %c0_52] : memref<128x512xbf16, #tpu.memory_space<vmem>>, vector<128x512xbf16>
    %cst_53 = arith.constant dense<0.000000e+00> : vector<8x512xf32>
    %170 = tpu.matmul %168, %169, %cst_53 {dimension_numbers = #tpu.dot_dimension_numbers<[1], [0], [0], [1], [0, 0, 1, 1], [], []>} : vector<8x128xbf16>, vector<128x512xbf16>, vector<8x512xf32> -> vector<8x512xf32>
    %171 = arith.addf %167, %170 : vector<8x512xf32>
    %172 = vector.extract_strided_slice %171 {offsets = [0, 0], sizes = [8, 384], strides = [1, 1]} : vector<8x512xf32> to vector<8x384xf32>
    %cst_54 = arith.constant 5.000000e-01 : f32
    %173 = vector.broadcast %cst_54 : f32 to vector<8x384xf32>
    %174 = arith.mulf %173, %172 : vector<8x384xf32>
    %175 = math.tanh %174 : vector<8x384xf32>
    %cst_55 = arith.constant 5.000000e-01 : f32
    %176 = vector.broadcast %cst_55 : f32 to vector<8x384xf32>
    %177 = arith.mulf %176, %175 : vector<8x384xf32>
    %cst_56 = arith.constant 5.000000e-01 : f32
    %178 = vector.broadcast %cst_56 : f32 to vector<8x384xf32>
    %179 = arith.addf %177, %178 : vector<8x384xf32>
    %180 = vector.extract_strided_slice %171 {offsets = [0, 384], sizes = [8, 128], strides = [1, 1]} : vector<8x512xf32> to vector<8x128xf32>
    %181 = math.tanh %180 : vector<8x128xf32>
    %182 = vector.extract_strided_slice %179 {offsets = [0, 128], sizes = [8, 128], strides = [1, 1]} : vector<8x384xf32> to vector<8x128xf32>
    %183 = arith.mulf %182, %163 : vector<8x128xf32>
    %184 = vector.extract_strided_slice %179 {offsets = [0, 0], sizes = [8, 128], strides = [1, 1]} : vector<8x384xf32> to vector<8x128xf32>
    %185 = arith.mulf %184, %181 : vector<8x128xf32>
    %186 = arith.addf %183, %185 : vector<8x128xf32>
    %187 = vector.extract_strided_slice %179 {offsets = [0, 256], sizes = [8, 128], strides = [1, 1]} : vector<8x384xf32> to vector<8x128xf32>
    %188 = math.tanh %186 : vector<8x128xf32>
    %189 = arith.mulf %187, %188 : vector<8x128xf32>
    %c48 = arith.constant 48 : index
    %c0_57 = arith.constant 0 : index
    %190 = vector.load %arg14[%c48, %c0_57] : memref<64x512xf32, #tpu.memory_space<vmem>>, vector<8x512xf32>
    %191 = arith.truncf %189 : vector<8x128xf32> to vector<8x128xbf16>
    %c0_58 = arith.constant 0 : index
    %c0_59 = arith.constant 0 : index
    %192 = vector.load %arg4[%c0_58, %c0_59] : memref<128x512xbf16, #tpu.memory_space<vmem>>, vector<128x512xbf16>
    %cst_60 = arith.constant dense<0.000000e+00> : vector<8x512xf32>
    %193 = tpu.matmul %191, %192, %cst_60 {dimension_numbers = #tpu.dot_dimension_numbers<[1], [0], [0], [1], [0, 0, 1, 1], [], []>} : vector<8x128xbf16>, vector<128x512xbf16>, vector<8x512xf32> -> vector<8x512xf32>
    %194 = arith.addf %190, %193 : vector<8x512xf32>
    %195 = vector.extract_strided_slice %194 {offsets = [0, 0], sizes = [8, 384], strides = [1, 1]} : vector<8x512xf32> to vector<8x384xf32>
    %cst_61 = arith.constant 5.000000e-01 : f32
    %196 = vector.broadcast %cst_61 : f32 to vector<8x384xf32>
    %197 = arith.mulf %196, %195 : vector<8x384xf32>
    %198 = math.tanh %197 : vector<8x384xf32>
    %cst_62 = arith.constant 5.000000e-01 : f32
    %199 = vector.broadcast %cst_62 : f32 to vector<8x384xf32>
    %200 = arith.mulf %199, %198 : vector<8x384xf32>
    %cst_63 = arith.constant 5.000000e-01 : f32
    %201 = vector.broadcast %cst_63 : f32 to vector<8x384xf32>
    %202 = arith.addf %200, %201 : vector<8x384xf32>
    %203 = vector.extract_strided_slice %194 {offsets = [0, 384], sizes = [8, 128], strides = [1, 1]} : vector<8x512xf32> to vector<8x128xf32>
    %204 = math.tanh %203 : vector<8x128xf32>
    %205 = vector.extract_strided_slice %202 {offsets = [0, 128], sizes = [8, 128], strides = [1, 1]} : vector<8x384xf32> to vector<8x128xf32>
    %206 = arith.mulf %205, %186 : vector<8x128xf32>
    %207 = vector.extract_strided_slice %202 {offsets = [0, 0], sizes = [8, 128], strides = [1, 1]} : vector<8x384xf32> to vector<8x128xf32>
    %208 = arith.mulf %207, %204 : vector<8x128xf32>
    %209 = arith.addf %206, %208 : vector<8x128xf32>
    %210 = vector.extract_strided_slice %202 {offsets = [0, 256], sizes = [8, 128], strides = [1, 1]} : vector<8x384xf32> to vector<8x128xf32>
    %211 = math.tanh %209 : vector<8x128xf32>
    %212 = arith.mulf %210, %211 : vector<8x128xf32>
    %c56 = arith.constant 56 : index
    %c0_64 = arith.constant 0 : index
    %213 = vector.load %arg14[%c56, %c0_64] : memref<64x512xf32, #tpu.memory_space<vmem>>, vector<8x512xf32>
    %214 = arith.truncf %212 : vector<8x128xf32> to vector<8x128xbf16>
    %c0_65 = arith.constant 0 : index
    %c0_66 = arith.constant 0 : index
    %215 = vector.load %arg4[%c0_65, %c0_66] : memref<128x512xbf16, #tpu.memory_space<vmem>>, vector<128x512xbf16>
    %cst_67 = arith.constant dense<0.000000e+00> : vector<8x512xf32>
    %216 = tpu.matmul %214, %215, %cst_67 {dimension_numbers = #tpu.dot_dimension_numbers<[1], [0], [0], [1], [0, 0, 1, 1], [], []>} : vector<8x128xbf16>, vector<128x512xbf16>, vector<8x512xf32> -> vector<8x512xf32>
    %217 = arith.addf %213, %216 : vector<8x512xf32>
    %218 = vector.extract_strided_slice %217 {offsets = [0, 0], sizes = [8, 384], strides = [1, 1]} : vector<8x512xf32> to vector<8x384xf32>
    %cst_68 = arith.constant 5.000000e-01 : f32
    %219 = vector.broadcast %cst_68 : f32 to vector<8x384xf32>
    %220 = arith.mulf %219, %218 : vector<8x384xf32>
    %221 = math.tanh %220 : vector<8x384xf32>
    %cst_69 = arith.constant 5.000000e-01 : f32
    %222 = vector.broadcast %cst_69 : f32 to vector<8x384xf32>
    %223 = arith.mulf %222, %221 : vector<8x384xf32>
    %cst_70 = arith.constant 5.000000e-01 : f32
    %224 = vector.broadcast %cst_70 : f32 to vector<8x384xf32>
    %225 = arith.addf %223, %224 : vector<8x384xf32>
    %226 = vector.extract_strided_slice %217 {offsets = [0, 384], sizes = [8, 128], strides = [1, 1]} : vector<8x512xf32> to vector<8x128xf32>
    %227 = math.tanh %226 : vector<8x128xf32>
    %228 = vector.extract_strided_slice %225 {offsets = [0, 128], sizes = [8, 128], strides = [1, 1]} : vector<8x384xf32> to vector<8x128xf32>
    %229 = arith.mulf %228, %209 : vector<8x128xf32>
    %230 = vector.extract_strided_slice %225 {offsets = [0, 0], sizes = [8, 128], strides = [1, 1]} : vector<8x384xf32> to vector<8x128xf32>
    %231 = arith.mulf %230, %227 : vector<8x128xf32>
    %232 = arith.addf %229, %231 : vector<8x128xf32>
    %233 = vector.extract_strided_slice %225 {offsets = [0, 256], sizes = [8, 128], strides = [1, 1]} : vector<8x384xf32> to vector<8x128xf32>
    %234 = math.tanh %232 : vector<8x128xf32>
    %235 = arith.mulf %233, %234 : vector<8x128xf32>
    %236 = arith.truncf %235 : vector<8x128xf32> to vector<8x128xbf16>
    %c0_71 = arith.constant 0 : index
    %c0_72 = arith.constant 0 : index
    %237 = vector.load %arg6[%c0_71, %c0_72] : memref<128x128xbf16, #tpu.memory_space<vmem>>, vector<128x128xbf16>
    %cst_73 = arith.constant dense<0.000000e+00> : vector<8x128xf32>
    %238 = tpu.matmul %236, %237, %cst_73 {dimension_numbers = #tpu.dot_dimension_numbers<[1], [0], [0], [1], [0, 0, 1, 1], [], []>} : vector<8x128xbf16>, vector<128x128xbf16>, vector<8x128xf32> -> vector<8x128xf32>
    %c0_74 = arith.constant 0 : index
    %c0_75 = arith.constant 0 : index
    %239 = vector.load %arg7[%c0_74, %c0_75] : memref<1x128xf32, #tpu.memory_space<vmem>>, vector<1x128xf32>
    %240 = vector.broadcast %239 : vector<1x128xf32> to vector<8x128xf32>
    %241 = arith.addf %238, %240 : vector<8x128xf32>
    %cst_76 = arith.constant 1.000000e-01 : f32
    %242 = vector.broadcast %cst_76 : f32 to vector<8x128xf32>
    %243 = arith.mulf %242, %241 : vector<8x128xf32>
    %244 = arith.maximumf %241, %243 : vector<8x128xf32>
    %245 = arith.truncf %244 : vector<8x128xf32> to vector<8x128xbf16>
    %c0_77 = arith.constant 0 : index
    %c0_78 = arith.constant 0 : index
    %246 = vector.load %arg8[%c0_77, %c0_78] : memref<128x512xbf16, #tpu.memory_space<vmem>>, vector<128x512xbf16>
    %cst_79 = arith.constant dense<0.000000e+00> : vector<8x512xf32>
    %247 = tpu.matmul %245, %246, %cst_79 {dimension_numbers = #tpu.dot_dimension_numbers<[1], [0], [0], [1], [0, 0, 1, 1], [], []>} : vector<8x128xbf16>, vector<128x512xbf16>, vector<8x512xf32> -> vector<8x512xf32>
    %c0_80 = arith.constant 0 : index
    %c0_81 = arith.constant 0 : index
    %248 = vector.load %arg9[%c0_80, %c0_81] : memref<1x512xf32, #tpu.memory_space<vmem>>, vector<1x512xf32>
    %249 = vector.broadcast %248 : vector<1x512xf32> to vector<8x512xf32>
    %250 = arith.addf %247, %249 : vector<8x512xf32>
    %cst_82 = arith.constant 0.000000e+00 : f32
    %251 = vector.broadcast %cst_82 : f32 to vector<8x128xf32>
    %cst_83 = arith.constant 0.000000e+00 : f32
    %252 = vector.broadcast %cst_83 : f32 to vector<8x128xf32>
    %253 = arith.truncf %251 : vector<8x128xf32> to vector<8x128xbf16>
    %c0_84 = arith.constant 0 : index
    %c0_85 = arith.constant 0 : index
    %254 = vector.load %arg10[%c0_84, %c0_85] : memref<128x512xbf16, #tpu.memory_space<vmem>>, vector<128x512xbf16>
    %cst_86 = arith.constant dense<0.000000e+00> : vector<8x512xf32>
    %255 = tpu.matmul %253, %254, %cst_86 {dimension_numbers = #tpu.dot_dimension_numbers<[1], [0], [0], [1], [0, 0, 1, 1], [], []>} : vector<8x128xbf16>, vector<128x512xbf16>, vector<8x512xf32> -> vector<8x512xf32>
    %256 = arith.addf %250, %255 : vector<8x512xf32>
    %257 = vector.extract_strided_slice %256 {offsets = [0, 0], sizes = [8, 384], strides = [1, 1]} : vector<8x512xf32> to vector<8x384xf32>
    %cst_87 = arith.constant 5.000000e-01 : f32
    %258 = vector.broadcast %cst_87 : f32 to vector<8x384xf32>
    %259 = arith.mulf %258, %257 : vector<8x384xf32>
    %260 = math.tanh %259 : vector<8x384xf32>
    %cst_88 = arith.constant 5.000000e-01 : f32
    %261 = vector.broadcast %cst_88 : f32 to vector<8x384xf32>
    %262 = arith.mulf %261, %260 : vector<8x384xf32>
    %cst_89 = arith.constant 5.000000e-01 : f32
    %263 = vector.broadcast %cst_89 : f32 to vector<8x384xf32>
    %264 = arith.addf %262, %263 : vector<8x384xf32>
    %265 = vector.extract_strided_slice %256 {offsets = [0, 384], sizes = [8, 128], strides = [1, 1]} : vector<8x512xf32> to vector<8x128xf32>
    %266 = math.tanh %265 : vector<8x128xf32>
    %267 = vector.extract_strided_slice %264 {offsets = [0, 128], sizes = [8, 128], strides = [1, 1]} : vector<8x384xf32> to vector<8x128xf32>
    %268 = arith.mulf %267, %252 : vector<8x128xf32>
    %269 = vector.extract_strided_slice %264 {offsets = [0, 0], sizes = [8, 128], strides = [1, 1]} : vector<8x384xf32> to vector<8x128xf32>
    %270 = arith.mulf %269, %266 : vector<8x128xf32>
    %271 = arith.addf %268, %270 : vector<8x128xf32>
    %272 = vector.extract_strided_slice %264 {offsets = [0, 256], sizes = [8, 128], strides = [1, 1]} : vector<8x384xf32> to vector<8x128xf32>
    %273 = math.tanh %271 : vector<8x128xf32>
    %274 = arith.mulf %272, %273 : vector<8x128xf32>
    %c0_90 = arith.constant 0 : index
    %c0_91 = arith.constant 0 : index
    %275 = vector.load %arg15[%c0_90, %c0_91] : memref<64x128xf32, #tpu.memory_space<vmem>>, vector<8x128xf32>
    tpu.vector_store %arg15[%c0_90, %c0_91], %274 {strides = array<i32>} : memref<64x128xf32, #tpu.memory_space<vmem>>, vector<8x128xf32>,
    %276 = arith.truncf %274 : vector<8x128xf32> to vector<8x128xbf16>
    %c0_92 = arith.constant 0 : index
    %c0_93 = arith.constant 0 : index
    %277 = vector.load %arg10[%c0_92, %c0_93] : memref<128x512xbf16, #tpu.memory_space<vmem>>, vector<128x512xbf16>
    %cst_94 = arith.constant dense<0.000000e+00> : vector<8x512xf32>
    %278 = tpu.matmul %276, %277, %cst_94 {dimension_numbers = #tpu.dot_dimension_numbers<[1], [0], [0], [1], [0, 0, 1, 1], [], []>} : vector<8x128xbf16>, vector<128x512xbf16>, vector<8x512xf32> -> vector<8x512xf32>
    %279 = arith.addf %250, %278 : vector<8x512xf32>
    %280 = vector.extract_strided_slice %279 {offsets = [0, 0], sizes = [8, 384], strides = [1, 1]} : vector<8x512xf32> to vector<8x384xf32>
    %cst_95 = arith.constant 5.000000e-01 : f32
    %281 = vector.broadcast %cst_95 : f32 to vector<8x384xf32>
    %282 = arith.mulf %281, %280 : vector<8x384xf32>
    %283 = math.tanh %282 : vector<8x384xf32>
    %cst_96 = arith.constant 5.000000e-01 : f32
    %284 = vector.broadcast %cst_96 : f32 to vector<8x384xf32>
    %285 = arith.mulf %284, %283 : vector<8x384xf32>
    %cst_97 = arith.constant 5.000000e-01 : f32
    %286 = vector.broadcast %cst_97 : f32 to vector<8x384xf32>
    %287 = arith.addf %285, %286 : vector<8x384xf32>
    %288 = vector.extract_strided_slice %279 {offsets = [0, 384], sizes = [8, 128], strides = [1, 1]} : vector<8x512xf32> to vector<8x128xf32>
    %289 = math.tanh %288 : vector<8x128xf32>
    %290 = vector.extract_strided_slice %287 {offsets = [0, 128], sizes = [8, 128], strides = [1, 1]} : vector<8x384xf32> to vector<8x128xf32>
    %291 = arith.mulf %290, %271 : vector<8x128xf32>
    %292 = vector.extract_strided_slice %287 {offsets = [0, 0], sizes = [8, 128], strides = [1, 1]} : vector<8x384xf32> to vector<8x128xf32>
    %293 = arith.mulf %292, %289 : vector<8x128xf32>
    %294 = arith.addf %291, %293 : vector<8x128xf32>
    %295 = vector.extract_strided_slice %287 {offsets = [0, 256], sizes = [8, 128], strides = [1, 1]} : vector<8x384xf32> to vector<8x128xf32>
    %296 = math.tanh %294 : vector<8x128xf32>
    %297 = arith.mulf %295, %296 : vector<8x128xf32>
    %c8_98 = arith.constant 8 : index
    %c0_99 = arith.constant 0 : index
    %298 = vector.load %arg15[%c8_98, %c0_99] : memref<64x128xf32, #tpu.memory_space<vmem>>, vector<8x128xf32>
    tpu.vector_store %arg15[%c8_98, %c0_99], %297 {strides = array<i32>} : memref<64x128xf32, #tpu.memory_space<vmem>>, vector<8x128xf32>,
    %299 = arith.truncf %297 : vector<8x128xf32> to vector<8x128xbf16>
    %c0_100 = arith.constant 0 : index
    %c0_101 = arith.constant 0 : index
    %300 = vector.load %arg10[%c0_100, %c0_101] : memref<128x512xbf16, #tpu.memory_space<vmem>>, vector<128x512xbf16>
    %cst_102 = arith.constant dense<0.000000e+00> : vector<8x512xf32>
    %301 = tpu.matmul %299, %300, %cst_102 {dimension_numbers = #tpu.dot_dimension_numbers<[1], [0], [0], [1], [0, 0, 1, 1], [], []>} : vector<8x128xbf16>, vector<128x512xbf16>, vector<8x512xf32> -> vector<8x512xf32>
    %302 = arith.addf %250, %301 : vector<8x512xf32>
    %303 = vector.extract_strided_slice %302 {offsets = [0, 0], sizes = [8, 384], strides = [1, 1]} : vector<8x512xf32> to vector<8x384xf32>
    %cst_103 = arith.constant 5.000000e-01 : f32
    %304 = vector.broadcast %cst_103 : f32 to vector<8x384xf32>
    %305 = arith.mulf %304, %303 : vector<8x384xf32>
    %306 = math.tanh %305 : vector<8x384xf32>
    %cst_104 = arith.constant 5.000000e-01 : f32
    %307 = vector.broadcast %cst_104 : f32 to vector<8x384xf32>
    %308 = arith.mulf %307, %306 : vector<8x384xf32>
    %cst_105 = arith.constant 5.000000e-01 : f32
    %309 = vector.broadcast %cst_105 : f32 to vector<8x384xf32>
    %310 = arith.addf %308, %309 : vector<8x384xf32>
    %311 = vector.extract_strided_slice %302 {offsets = [0, 384], sizes = [8, 128], strides = [1, 1]} : vector<8x512xf32> to vector<8x128xf32>
    %312 = math.tanh %311 : vector<8x128xf32>
    %313 = vector.extract_strided_slice %310 {offsets = [0, 128], sizes = [8, 128], strides = [1, 1]} : vector<8x384xf32> to vector<8x128xf32>
    %314 = arith.mulf %313, %294 : vector<8x128xf32>
    %315 = vector.extract_strided_slice %310 {offsets = [0, 0], sizes = [8, 128], strides = [1, 1]} : vector<8x384xf32> to vector<8x128xf32>
    %316 = arith.mulf %315, %312 : vector<8x128xf32>
    %317 = arith.addf %314, %316 : vector<8x128xf32>
    %318 = vector.extract_strided_slice %310 {offsets = [0, 256], sizes = [8, 128], strides = [1, 1]} : vector<8x384xf32> to vector<8x128xf32>
    %319 = math.tanh %317 : vector<8x128xf32>
    %320 = arith.mulf %318, %319 : vector<8x128xf32>
    %c16_106 = arith.constant 16 : index
    %c0_107 = arith.constant 0 : index
    %321 = vector.load %arg15[%c16_106, %c0_107] : memref<64x128xf32, #tpu.memory_space<vmem>>, vector<8x128xf32>
    tpu.vector_store %arg15[%c16_106, %c0_107], %320 {strides = array<i32>} : memref<64x128xf32, #tpu.memory_space<vmem>>, vector<8x128xf32>,
    %322 = arith.truncf %320 : vector<8x128xf32> to vector<8x128xbf16>
    %c0_108 = arith.constant 0 : index
    %c0_109 = arith.constant 0 : index
    %323 = vector.load %arg10[%c0_108, %c0_109] : memref<128x512xbf16, #tpu.memory_space<vmem>>, vector<128x512xbf16>
    %cst_110 = arith.constant dense<0.000000e+00> : vector<8x512xf32>
    %324 = tpu.matmul %322, %323, %cst_110 {dimension_numbers = #tpu.dot_dimension_numbers<[1], [0], [0], [1], [0, 0, 1, 1], [], []>} : vector<8x128xbf16>, vector<128x512xbf16>, vector<8x512xf32> -> vector<8x512xf32>
    %325 = arith.addf %250, %324 : vector<8x512xf32>
    %326 = vector.extract_strided_slice %325 {offsets = [0, 0], sizes = [8, 384], strides = [1, 1]} : vector<8x512xf32> to vector<8x384xf32>
    %cst_111 = arith.constant 5.000000e-01 : f32
    %327 = vector.broadcast %cst_111 : f32 to vector<8x384xf32>
    %328 = arith.mulf %327, %326 : vector<8x384xf32>
    %329 = math.tanh %328 : vector<8x384xf32>
    %cst_112 = arith.constant 5.000000e-01 : f32
    %330 = vector.broadcast %cst_112 : f32 to vector<8x384xf32>
    %331 = arith.mulf %330, %329 : vector<8x384xf32>
    %cst_113 = arith.constant 5.000000e-01 : f32
    %332 = vector.broadcast %cst_113 : f32 to vector<8x384xf32>
    %333 = arith.addf %331, %332 : vector<8x384xf32>
    %334 = vector.extract_strided_slice %325 {offsets = [0, 384], sizes = [8, 128], strides = [1, 1]} : vector<8x512xf32> to vector<8x128xf32>
    %335 = math.tanh %334 : vector<8x128xf32>
    %336 = vector.extract_strided_slice %333 {offsets = [0, 128], sizes = [8, 128], strides = [1, 1]} : vector<8x384xf32> to vector<8x128xf32>
    %337 = arith.mulf %336, %317 : vector<8x128xf32>
    %338 = vector.extract_strided_slice %333 {offsets = [0, 0], sizes = [8, 128], strides = [1, 1]} : vector<8x384xf32> to vector<8x128xf32>
    %339 = arith.mulf %338, %335 : vector<8x128xf32>
    %340 = arith.addf %337, %339 : vector<8x128xf32>
    %341 = vector.extract_strided_slice %333 {offsets = [0, 256], sizes = [8, 128], strides = [1, 1]} : vector<8x384xf32> to vector<8x128xf32>
    %342 = math.tanh %340 : vector<8x128xf32>
    %343 = arith.mulf %341, %342 : vector<8x128xf32>
    %c24_114 = arith.constant 24 : index
    %c0_115 = arith.constant 0 : index
    %344 = vector.load %arg15[%c24_114, %c0_115] : memref<64x128xf32, #tpu.memory_space<vmem>>, vector<8x128xf32>
    tpu.vector_store %arg15[%c24_114, %c0_115], %343 {strides = array<i32>} : memref<64x128xf32, #tpu.memory_space<vmem>>, vector<8x128xf32>,
    %345 = arith.truncf %343 : vector<8x128xf32> to vector<8x128xbf16>
    %c0_116 = arith.constant 0 : index
    %c0_117 = arith.constant 0 : index
    %346 = vector.load %arg10[%c0_116, %c0_117] : memref<128x512xbf16, #tpu.memory_space<vmem>>, vector<128x512xbf16>
    %cst_118 = arith.constant dense<0.000000e+00> : vector<8x512xf32>
    %347 = tpu.matmul %345, %346, %cst_118 {dimension_numbers = #tpu.dot_dimension_numbers<[1], [0], [0], [1], [0, 0, 1, 1], [], []>} : vector<8x128xbf16>, vector<128x512xbf16>, vector<8x512xf32> -> vector<8x512xf32>
    %348 = arith.addf %250, %347 : vector<8x512xf32>
    %349 = vector.extract_strided_slice %348 {offsets = [0, 0], sizes = [8, 384], strides = [1, 1]} : vector<8x512xf32> to vector<8x384xf32>
    %cst_119 = arith.constant 5.000000e-01 : f32
    %350 = vector.broadcast %cst_119 : f32 to vector<8x384xf32>
    %351 = arith.mulf %350, %349 : vector<8x384xf32>
    %352 = math.tanh %351 : vector<8x384xf32>
    %cst_120 = arith.constant 5.000000e-01 : f32
    %353 = vector.broadcast %cst_120 : f32 to vector<8x384xf32>
    %354 = arith.mulf %353, %352 : vector<8x384xf32>
    %cst_121 = arith.constant 5.000000e-01 : f32
    %355 = vector.broadcast %cst_121 : f32 to vector<8x384xf32>
    %356 = arith.addf %354, %355 : vector<8x384xf32>
    %357 = vector.extract_strided_slice %348 {offsets = [0, 384], sizes = [8, 128], strides = [1, 1]} : vector<8x512xf32> to vector<8x128xf32>
    %358 = math.tanh %357 : vector<8x128xf32>
    %359 = vector.extract_strided_slice %356 {offsets = [0, 128], sizes = [8, 128], strides = [1, 1]} : vector<8x384xf32> to vector<8x128xf32>
    %360 = arith.mulf %359, %340 : vector<8x128xf32>
    %361 = vector.extract_strided_slice %356 {offsets = [0, 0], sizes = [8, 128], strides = [1, 1]} : vector<8x384xf32> to vector<8x128xf32>
    %362 = arith.mulf %361, %358 : vector<8x128xf32>
    %363 = arith.addf %360, %362 : vector<8x128xf32>
    %364 = vector.extract_strided_slice %356 {offsets = [0, 256], sizes = [8, 128], strides = [1, 1]} : vector<8x384xf32> to vector<8x128xf32>
    %365 = math.tanh %363 : vector<8x128xf32>
    %366 = arith.mulf %364, %365 : vector<8x128xf32>
    %c32_122 = arith.constant 32 : index
    %c0_123 = arith.constant 0 : index
    %367 = vector.load %arg15[%c32_122, %c0_123] : memref<64x128xf32, #tpu.memory_space<vmem>>, vector<8x128xf32>
    tpu.vector_store %arg15[%c32_122, %c0_123], %366 {strides = array<i32>} : memref<64x128xf32, #tpu.memory_space<vmem>>, vector<8x128xf32>,
    %368 = arith.truncf %366 : vector<8x128xf32> to vector<8x128xbf16>
    %c0_124 = arith.constant 0 : index
    %c0_125 = arith.constant 0 : index
    %369 = vector.load %arg10[%c0_124, %c0_125] : memref<128x512xbf16, #tpu.memory_space<vmem>>, vector<128x512xbf16>
    %cst_126 = arith.constant dense<0.000000e+00> : vector<8x512xf32>
    %370 = tpu.matmul %368, %369, %cst_126 {dimension_numbers = #tpu.dot_dimension_numbers<[1], [0], [0], [1], [0, 0, 1, 1], [], []>} : vector<8x128xbf16>, vector<128x512xbf16>, vector<8x512xf32> -> vector<8x512xf32>
    %371 = arith.addf %250, %370 : vector<8x512xf32>
    %372 = vector.extract_strided_slice %371 {offsets = [0, 0], sizes = [8, 384], strides = [1, 1]} : vector<8x512xf32> to vector<8x384xf32>
    %cst_127 = arith.constant 5.000000e-01 : f32
    %373 = vector.broadcast %cst_127 : f32 to vector<8x384xf32>
    %374 = arith.mulf %373, %372 : vector<8x384xf32>
    %375 = math.tanh %374 : vector<8x384xf32>
    %cst_128 = arith.constant 5.000000e-01 : f32
    %376 = vector.broadcast %cst_128 : f32 to vector<8x384xf32>
    %377 = arith.mulf %376, %375 : vector<8x384xf32>
    %cst_129 = arith.constant 5.000000e-01 : f32
    %378 = vector.broadcast %cst_129 : f32 to vector<8x384xf32>
    %379 = arith.addf %377, %378 : vector<8x384xf32>
    %380 = vector.extract_strided_slice %371 {offsets = [0, 384], sizes = [8, 128], strides = [1, 1]} : vector<8x512xf32> to vector<8x128xf32>
    %381 = math.tanh %380 : vector<8x128xf32>
    %382 = vector.extract_strided_slice %379 {offsets = [0, 128], sizes = [8, 128], strides = [1, 1]} : vector<8x384xf32> to vector<8x128xf32>
    %383 = arith.mulf %382, %363 : vector<8x128xf32>
    %384 = vector.extract_strided_slice %379 {offsets = [0, 0], sizes = [8, 128], strides = [1, 1]} : vector<8x384xf32> to vector<8x128xf32>
    %385 = arith.mulf %384, %381 : vector<8x128xf32>
    %386 = arith.addf %383, %385 : vector<8x128xf32>
    %387 = vector.extract_strided_slice %379 {offsets = [0, 256], sizes = [8, 128], strides = [1, 1]} : vector<8x384xf32> to vector<8x128xf32>
    %388 = math.tanh %386 : vector<8x128xf32>
    %389 = arith.mulf %387, %388 : vector<8x128xf32>
    %c40_130 = arith.constant 40 : index
    %c0_131 = arith.constant 0 : index
    %390 = vector.load %arg15[%c40_130, %c0_131] : memref<64x128xf32, #tpu.memory_space<vmem>>, vector<8x128xf32>
    tpu.vector_store %arg15[%c40_130, %c0_131], %389 {strides = array<i32>} : memref<64x128xf32, #tpu.memory_space<vmem>>, vector<8x128xf32>,
    %391 = arith.truncf %389 : vector<8x128xf32> to vector<8x128xbf16>
    %c0_132 = arith.constant 0 : index
    %c0_133 = arith.constant 0 : index
    %392 = vector.load %arg10[%c0_132, %c0_133] : memref<128x512xbf16, #tpu.memory_space<vmem>>, vector<128x512xbf16>
    %cst_134 = arith.constant dense<0.000000e+00> : vector<8x512xf32>
    %393 = tpu.matmul %391, %392, %cst_134 {dimension_numbers = #tpu.dot_dimension_numbers<[1], [0], [0], [1], [0, 0, 1, 1], [], []>} : vector<8x128xbf16>, vector<128x512xbf16>, vector<8x512xf32> -> vector<8x512xf32>
    %394 = arith.addf %250, %393 : vector<8x512xf32>
    %395 = vector.extract_strided_slice %394 {offsets = [0, 0], sizes = [8, 384], strides = [1, 1]} : vector<8x512xf32> to vector<8x384xf32>
    %cst_135 = arith.constant 5.000000e-01 : f32
    %396 = vector.broadcast %cst_135 : f32 to vector<8x384xf32>
    %397 = arith.mulf %396, %395 : vector<8x384xf32>
    %398 = math.tanh %397 : vector<8x384xf32>
    %cst_136 = arith.constant 5.000000e-01 : f32
    %399 = vector.broadcast %cst_136 : f32 to vector<8x384xf32>
    %400 = arith.mulf %399, %398 : vector<8x384xf32>
    %cst_137 = arith.constant 5.000000e-01 : f32
    %401 = vector.broadcast %cst_137 : f32 to vector<8x384xf32>
    %402 = arith.addf %400, %401 : vector<8x384xf32>
    %403 = vector.extract_strided_slice %394 {offsets = [0, 384], sizes = [8, 128], strides = [1, 1]} : vector<8x512xf32> to vector<8x128xf32>
    %404 = math.tanh %403 : vector<8x128xf32>
    %405 = vector.extract_strided_slice %402 {offsets = [0, 128], sizes = [8, 128], strides = [1, 1]} : vector<8x384xf32> to vector<8x128xf32>
    %406 = arith.mulf %405, %386 : vector<8x128xf32>
    %407 = vector.extract_strided_slice %402 {offsets = [0, 0], sizes = [8, 128], strides = [1, 1]} : vector<8x384xf32> to vector<8x128xf32>
    %408 = arith.mulf %407, %404 : vector<8x128xf32>
    %409 = arith.addf %406, %408 : vector<8x128xf32>
    %410 = vector.extract_strided_slice %402 {offsets = [0, 256], sizes = [8, 128], strides = [1, 1]} : vector<8x384xf32> to vector<8x128xf32>
    %411 = math.tanh %409 : vector<8x128xf32>
    %412 = arith.mulf %410, %411 : vector<8x128xf32>
    %c48_138 = arith.constant 48 : index
    %c0_139 = arith.constant 0 : index
    %413 = vector.load %arg15[%c48_138, %c0_139] : memref<64x128xf32, #tpu.memory_space<vmem>>, vector<8x128xf32>
    tpu.vector_store %arg15[%c48_138, %c0_139], %412 {strides = array<i32>} : memref<64x128xf32, #tpu.memory_space<vmem>>, vector<8x128xf32>,
    %414 = arith.truncf %412 : vector<8x128xf32> to vector<8x128xbf16>
    %c0_140 = arith.constant 0 : index
    %c0_141 = arith.constant 0 : index
    %415 = vector.load %arg10[%c0_140, %c0_141] : memref<128x512xbf16, #tpu.memory_space<vmem>>, vector<128x512xbf16>
    %cst_142 = arith.constant dense<0.000000e+00> : vector<8x512xf32>
    %416 = tpu.matmul %414, %415, %cst_142 {dimension_numbers = #tpu.dot_dimension_numbers<[1], [0], [0], [1], [0, 0, 1, 1], [], []>} : vector<8x128xbf16>, vector<128x512xbf16>, vector<8x512xf32> -> vector<8x512xf32>
    %417 = arith.addf %250, %416 : vector<8x512xf32>
    %418 = vector.extract_strided_slice %417 {offsets = [0, 0], sizes = [8, 384], strides = [1, 1]} : vector<8x512xf32> to vector<8x384xf32>
    %cst_143 = arith.constant 5.000000e-01 : f32
    %419 = vector.broadcast %cst_143 : f32 to vector<8x384xf32>
    %420 = arith.mulf %419, %418 : vector<8x384xf32>
    %421 = math.tanh %420 : vector<8x384xf32>
    %cst_144 = arith.constant 5.000000e-01 : f32
    %422 = vector.broadcast %cst_144 : f32 to vector<8x384xf32>
    %423 = arith.mulf %422, %421 : vector<8x384xf32>
    %cst_145 = arith.constant 5.000000e-01 : f32
    %424 = vector.broadcast %cst_145 : f32 to vector<8x384xf32>
    %425 = arith.addf %423, %424 : vector<8x384xf32>
    %426 = vector.extract_strided_slice %417 {offsets = [0, 384], sizes = [8, 128], strides = [1, 1]} : vector<8x512xf32> to vector<8x128xf32>
    %427 = math.tanh %426 : vector<8x128xf32>
    %428 = vector.extract_strided_slice %425 {offsets = [0, 128], sizes = [8, 128], strides = [1, 1]} : vector<8x384xf32> to vector<8x128xf32>
    %429 = arith.mulf %428, %409 : vector<8x128xf32>
    %430 = vector.extract_strided_slice %425 {offsets = [0, 0], sizes = [8, 128], strides = [1, 1]} : vector<8x384xf32> to vector<8x128xf32>
    %431 = arith.mulf %430, %427 : vector<8x128xf32>
    %432 = arith.addf %429, %431 : vector<8x128xf32>
    %433 = vector.extract_strided_slice %425 {offsets = [0, 256], sizes = [8, 128], strides = [1, 1]} : vector<8x384xf32> to vector<8x128xf32>
    %434 = math.tanh %432 : vector<8x128xf32>
    %435 = arith.mulf %433, %434 : vector<8x128xf32>
    %c56_146 = arith.constant 56 : index
    %c0_147 = arith.constant 0 : index
    %436 = vector.load %arg15[%c56_146, %c0_147] : memref<64x128xf32, #tpu.memory_space<vmem>>, vector<8x128xf32>
    tpu.vector_store %arg15[%c56_146, %c0_147], %435 {strides = array<i32>} : memref<64x128xf32, #tpu.memory_space<vmem>>, vector<8x128xf32>,
    %c0_148 = arith.constant 0 : index
    %c0_149 = arith.constant 0 : index
    %437 = vector.load %arg15[%c0_148, %c0_149] : memref<64x128xf32, #tpu.memory_space<vmem>>, vector<64x128xf32>
    %438 = arith.truncf %437 : vector<64x128xf32> to vector<64x128xbf16>
    %c0_150 = arith.constant 0 : index
    %c0_151 = arith.constant 0 : index
    %439 = vector.load %arg11[%c0_150, %c0_151] : memref<128x128xbf16, #tpu.memory_space<vmem>>, vector<128x128xbf16>
    %cst_152 = arith.constant dense<0.000000e+00> : vector<64x128xf32>
    %440 = tpu.matmul %438, %439, %cst_152 {dimension_numbers = #tpu.dot_dimension_numbers<[1], [0], [0], [1], [0, 0, 1, 1], [], []>} : vector<64x128xbf16>, vector<128x128xbf16>, vector<64x128xf32> -> vector<64x128xf32>
    %c0_153 = arith.constant 0 : index
    %c0_154 = arith.constant 0 : index
    %441 = vector.load %arg12[%c0_153, %c0_154] : memref<1x128xf32, #tpu.memory_space<vmem>>, vector<1x128xf32>
    %442 = vector.broadcast %441 : vector<1x128xf32> to vector<64x128xf32>
    %443 = arith.addf %440, %442 : vector<64x128xf32>
    %444 = tpu.iota {dimensions = array<i32: 1>} : vector<64x128xi32>
    %c2_i32 = arith.constant 2 : i32
    %445 = vector.broadcast %c2_i32 : i32 to vector<64x128xi32>
    %446 = arith.cmpi sge, %444, %445 : vector<64x128xi32>
    %c4_i32 = arith.constant 4 : i32
    %447 = vector.broadcast %c4_i32 : i32 to vector<64x128xi32>
    %448 = arith.cmpi slt, %444, %447 : vector<64x128xi32>
    %449 = arith.andi %446, %448 : vector<64x128xi1>
    %cst_155 = arith.constant 0.000000e+00 : f32
    %450 = vector.broadcast %cst_155 : f32 to vector<64x128xf32>
    %451 = arith.select %449, %443, %450 : vector<64x128xi1>, vector<64x128xf32>
    %452 = math.exp %451 : vector<64x128xf32>
    %c2_i32_156 = arith.constant 2 : i32
    %453 = vector.broadcast %c2_i32_156 : i32 to vector<64x128xi32>
    %454 = arith.cmpi slt, %444, %453 : vector<64x128xi32>
    %c4_i32_157 = arith.constant 4 : i32
    %455 = vector.broadcast %c4_i32_157 : i32 to vector<64x128xi32>
    %456 = arith.cmpi slt, %444, %455 : vector<64x128xi32>
    %457 = math.tanh %443 : vector<64x128xf32>
    %458 = arith.select %456, %452, %457 : vector<64x128xi1>, vector<64x128xf32>
    %459 = arith.select %454, %443, %458 : vector<64x128xi1>, vector<64x128xf32>
    %c0_158 = arith.constant 0 : index
    %c0_159 = arith.constant 0 : index
    %460 = vector.load %arg13[%c0_158, %c0_159] : memref<64x128xf32, #tpu.memory_space<vmem>>, vector<64x128xf32>
    tpu.vector_store %arg13[%c0_158, %c0_159], %459 {strides = array<i32>} : memref<64x128xf32, #tpu.memory_space<vmem>>, vector<64x128xf32>,
    return
  }
}

</mosaic_0001>

<bundles_post_ra>
// kernel: indy_net_forward.1
= control target key start
LH: loop header
LB: loop body
LE: loop exit
PB: predicated region body
PF: predicated region fallthrough
CT: control target
= control target key end

     0   :  { %v5669_v0 = vmov 1   ;;  %v7733_v1 = vmov 0   ;;  %v5671_v4 = vmov 2   ;;  %v5672_v5 = vmov 3   ;;  %s7718_s0 = inlined_call_operand.vmem [shape: f32[64,6], index: 0, kind: input, shape index: {}]   ;;  %s7719_s3 = inlined_call_operand.vmem [shape: bf16[48,512], index: 3, kind: input, shape index: {}]   ;;  %s7720_s4 = inlined_call_operand.vmem [shape: bf16[128,512], index: 4, kind: input, shape index: {}]   ;;  %s7721_s1 = inlined_call_operand.vmem [shape: f32[6,48], index: 1, kind: input, shape index: {}]   ;;  %s7722_s2 = inlined_call_operand.vmem [shape: f32[1,48], index: 2, kind: input, shape index: {}]   ;;  %s7723_s5 = inlined_call_operand.vmem [shape: f32[1,512], index: 5, kind: input, shape index: {}]   ;;  %s7724_s6 = inlined_call_operand.vmem [shape: bf16[128,128], index: 6, kind: input, shape index: {}]   ;;  %s7725_s8 = inlined_call_operand.vmem [shape: bf16[128,512], index: 8, kind: input, shape index: {}]   ;;  %s7726_s10 = inlined_call_operand.vmem [shape: bf16[128,512], index: 10, kind: input, shape index: {}]   ;;  %s7727_s7 = inlined_call_operand.vmem [shape: f32[1,128], index: 7, kind: input, shape index: {}]   ;;  %s7728_s9 = inlined_call_operand.vmem [shape: f32[1,512], index: 9, kind: input, shape index: {}]   ;;  %s7729_s11 = inlined_call_operand.vmem [shape: bf16[128,128], index: 11, kind: input, shape index: {}]   ;;  %s7730_s12 = inlined_call_operand.vmem [shape: f32[1,128], index: 12, kind: input, shape index: {}]   ;;  %s7731_s13 = inlined_call_operand.vmem [shape: f32[64,128], index: 13, kind: output, shape index: {}]  }
   0x1   :  { %5190 = vset.pattern.permute.xlu1 %v5669_v0  ;;  %5189 = vset.pattern.permute.xlu0 %v7733_v1  ;;  %v45_v2 = vld [vmem:[%s7718_s0] sm:$0xff]  ;;  %v46_v3 = vld [vmem:[%s7718_s0 + $0x8] sm:$0xff]  ;;  %v5762_v6 = vld [vmem:[%s7718_s0 + $0x18] sm:$0xff]  ;;  %v5673_v8 = vmov 4   ;;  %v5674_v12 = vmov 5   ;;  %v7732_v36 = vlaneseq  ;;  %vm495_vm0 = vcmask 392192  }
   0x2   :  { %122 = vperm.xlu1 %5190, %v45_v2   ;;  %57 = vperm.xlu0 %5189, %v45_v2   ;;  %v5769_v7 = vld [vmem:[%s7718_s0 + $0x10] sm:$0xff]  ;;  %v5779_v9 = vld [vmem:[%s7718_s0 + $0x20] sm:$0xff]  ;;  %v5789_v10 = vld [vmem:[%s7718_s0 + $0x28] sm:$0xff]  ;;  %vm5676_vm1 = vmmov 0  }
   0x3   :  { %540 = vmatprep.mubr.bf16.mxu0 %v7733_v1  ;;  %613 = vmatprep.mubr.bf16.mxu1 %v7733_v1  ;;  %v5796_v11 = vld [vmem:[%s7718_s0 + $0x38] sm:$0xff]  ;;  %v5219_v13 = vld [vmem:[%s7719_s3 + $0x4] ss:$16 sps:$4 sm:$0xff]   ;;  %v5223_v15 = vld [vmem:[%s7719_s3] ss:$16 sps:$4 sm:$0xff]   ;;  %v96_v38 = vshrl.u32 %v7732_v36, 7 }
   0x4   :  { %v5221_v14 = vld [vmem:[%s7719_s3 + $0xc] ss:$16 sps:$4 sm:$0xff]   ;;  %508 = vmatprep.subr.bf16.mxu0 %v5219_v13  ;;  %v5224_v16 = vld [vmem:[%s7719_s3 + $0x8] ss:$16 sps:$4 sm:$0xff]   ;;  %v5225_v17 = vld [vmem:[%s7719_s3 + $0x24] ss:$16 sps:$4 sm:$0xff]  }
   0x5   :  { %581 = vmatprep.subr.bf16.mxu1 %v5221_v14  ;;  %509 = vmatpush1.bf16.msra.mxu0 %v5223_v15  ;;  %v5227_v18 = vld [vmem:[%s7719_s3 + $0x2c] ss:$16 sps:$4 sm:$0xff]   ;;  %v5229_v19 = vld [vmem:[%s7719_s3 + $0x20] ss:$16 sps:$4 sm:$0xff]   ;;  %v5230_v20 = vld [vmem:[%s7719_s3 + $0x28] ss:$16 sps:$4 sm:$0xff]  }
   0x6   :  { %126 = vperm.xlu1 %5190, %v46_v3   ;;  %62 = vperm.xlu0 %5189, %v46_v3   ;;  %v51_v21 = vld [vmem:[%s7718_s0 + $0x30] sm:$0xff]  ;;  %v5233_v23 = vld [vmem:[%s7719_s3 + $0x4c] ss:$16 sps:$4 sm:$0xff]   ;;  %v5236_v25 = vld [vmem:[%s7719_s3 + $0x48] ss:$16 sps:$4 sm:$0xff]   ;;  %v5898_v41 = vsub.s32 0, %v96_v38 }
   0x7   :  { %582 = vmatpush1.bf16.msra.mxu1 %v5224_v16  ;;  %510 = vmatprep.subr.bf16.mxu0 %v5225_v17  ;;  %v5231_v22 = vld [vmem:[%s7719_s3 + $0x44] ss:$16 sps:$4 sm:$0xff]   ;;  %v5235_v24 = vld [vmem:[%s7719_s3 + $0x40] ss:$16 sps:$4 sm:$0xff]   ;;  %v5884_v29 = vld [vmem:[%s7720_s4 + $0xc] ss:$16 sps:$4 sm:$0xff]  }
   0x8   :  { %583 = vmatprep.subr.bf16.mxu1 %v5227_v18  ;;  %v5877_v26 = vld [vmem:[%s7720_s4 + $0x4] ss:$16 sps:$4 sm:$0xff]   ;;  %7748 = vst [vmem:[#allocation5_spill] sm:$0xff] %v5884_v29  ;;  %7749 = vst [vmem:[#allocation6_spill] sm:$0xff] %v5898_v41  ;;  %v5910_v47 = vsub.s32 1, %v96_v38  ;;  %v5913_v49 = vsub.s32 2, %v96_v38 }
   0x9   :  { %511 = vmatpush1.bf16.msra.mxu0 %v5229_v19  ;;  %7747 = vst [vmem:[#allocation4_spill] sm:$0xff] %v5877_v26  ;;  %v53_v43 = vld [vmem:[%s7721_s1] sm:$0x3f]  ;;  %v5929_v55 = vsub.s32 3, %v96_v38  ;;  %v311_v58 = vsub.s32 4, %v96_v38 }
   0xa   :  { %5191 = vset.pattern.permute.xlu1 %v5671_v4  ;;  %5193 = vset.pattern.permute.xlu0 %v5672_v5  ;;  %v5908_v45 = vrot.slane %v53_v43, %v5898_v41  ;;  %7750 = vst [vmem:[#allocation7_spill] sm:$0xff] %v5910_v47  ;;  %7751 = vst [vmem:[#allocation8_spill] sm:$0xff] %v5913_v49  ;;  %v5920_v51 = vld [vmem:[%s7722_s2] ss:$0 sm:$0xff]  ;;  %v5923_v52 = vrot.slane %v53_v43, %v5910_v47 }
   0xb   :  { %178 = vperm.xlu1 %5191, %v46_v3   ;;  %230 = vperm.xlu0 %5193, %v46_v3   ;;  %v5927_v54 = vrot.slane %v53_v43, %v5913_v49  ;;  %7752 = vst [vmem:[#allocation9_spill] sm:$0xff] %v5929_v55  ;;  %v5937_v63 = vrot.slane %v53_v43, %v5929_v55 }
   0xc   :  { %584 = vmatpush1.bf16.msra.mxu1 %v5230_v20  ;;  %512 = vmatprep.subr.bf16.mxu0 %v5231_v22 }
   0xd   :  { %585 = vmatprep.subr.bf16.mxu1 %v5233_v23  ;;  %513 = vmatpush1.bf16.msra.mxu0 %v5235_v24 }
   0xe   :  { %882 = vmatprep.subr.bf16.mxu0 %v5877_v26 }
   0xf   :  { %5192 = vset.pattern.permute.xlu1 %v5672_v5  ;;  %238 = vperm.xlu0 %5193, %v5762_v6  }
  0x10   :  { %226 = vperm.xlu1 %5192, %v45_v2   ;;  %586 = vmatpush1.bf16.msra.mxu1 %v5236_v25 }
  0x11   :  { %923 = vmatprep.subr.bf16.mxu1 %v5884_v29 }
  0x13   :  { %5200 = vset.pattern.permute.xlu0 %v5673_v8 }
  0x14   :  { %5194 = vset.pattern.permute.xlu1 %v7733_v1  ;;  %278 = vperm.xlu0 %5200, %v45_v2  }
  0x15   :  { %67 = vperm.xlu1 %5194, %v5769_v7  }
  0x18   :  { %286 = vperm.xlu0 %5200, %v5769_v7  }
  0x19   :  { %72 = vperm.xlu1 %5194, %v5762_v6  }
  0x1c   :  { %294 = vperm.xlu0 %5200, %v5779_v9  }
  0x1d   :  { %5195 = vset.pattern.permute.xlu1 %v5673_v8 }
  0x1e   :  { %282 = vperm.xlu1 %5195, %v46_v3  }
  0x20   :  { %5208 = vset.pattern.permute.xlu0 %v5669_v0 }
  0x21   :  { %134 = vperm.xlu0 %5208, %v5762_v6  }
  0x22   :  { %5196 = vset.pattern.permute.xlu1 %v5669_v0 }
  0x23   :  { %130 = vperm.xlu1 %5196, %v5769_v7  }
  0x25   :  { %142 = vperm.xlu0 %5208, %v5789_v10  }
  0x27   :  { %5197 = vset.pattern.permute.xlu1 %v5674_v12 }
  0x28   :  { %330 = vperm.xlu1 %5197, %v45_v2  }
  0x29   :  { %150 = vperm.xlu0 %5208, %v5796_v11  }
  0x2c   :  { %334 = vperm.xlu1 %5197, %v46_v3   ;;  %v363_v3 = vsub.s32 5, %v96_v38 }
  0x2d   :  { %5211 = vset.pattern.permute.xlu0 %v5671_v4 }
  0x2e   :  { %174 = vperm.xlu0 %5211, %v45_v2   ;;  %v5939_v2 = vrot.slane %v53_v43, %v311_v58  ;;  %v5989_v58 = vld [vmem:[%s7720_s4 + $0x20] ss:$16 sps:$4 sm:$0xff]  }
  0x30   :  { %5198 = vset.pattern.permute.xlu1 %v5671_v4 }
  0x31   :  { %186 = vperm.xlu1 %5198, %v5762_v6  }
  0x32   :  { %182 = vperm.xlu0 %5211, %v5769_v7  }
  0x35   :  { %5199 = vset.pattern.permute.xlu1 %v5672_v5 }
  0x36   :  { %234 = vperm.xlu1 %5199, %v5769_v7   ;;  %190 = vperm.xlu0 %5211, %v5779_v9  }
  0x3a   :  { %5201 = vset.pattern.permute.xlu1 %v7733_v1  ;;  %198 = vperm.xlu0 %5211, %v51_v21  }
  0x3b   :  { %77 = vperm.xlu1 %5201, %v5779_v9  }
  0x3e   :  { %5213 = vset.pattern.permute.xlu0 %v5672_v5 }
  0x3f   :  { %82 = vperm.xlu1 %5201, %v5789_v10   ;;  %246 = vperm.xlu0 %5213, %v5789_v10  }
  0x43   :  { %5202 = vset.pattern.permute.xlu1 %v5673_v8  ;;  %254 = vperm.xlu0 %5213, %v5796_v11  }
  0x44   :  { %290 = vperm.xlu1 %5202, %v5762_v6  }
  0x47   :  { %5217 = vset.pattern.permute.xlu0 %v5674_v12 }
  0x48   :  { %5203 = vset.pattern.permute.xlu1 %v5669_v0  ;;  %354 = vperm.xlu0 %5217, %v51_v21  }
  0x49   :  { %138 = vperm.xlu1 %5203, %v5779_v9  }
  0x4d   :  { %5204 = vset.pattern.permute.xlu1 %v5674_v12 }
  0x4e   :  { %338 = vperm.xlu1 %5204, %v5769_v7  }
  0x52   :  { %342 = vperm.xlu1 %5204, %v5762_v6  }
  0x56   :  { %5205 = vset.pattern.permute.xlu1 %v5671_v4 }
  0x57   :  { %194 = vperm.xlu1 %5205, %v5789_v10  }
  0x5b   :  { %5206 = vset.pattern.permute.xlu1 %v5672_v5 }
  0x5c   :  { %242 = vperm.xlu1 %5206, %v5779_v9  }
  0x60   :  { %5207 = vset.pattern.permute.xlu1 %v7733_v1 }
  0x61   :  { %87 = vperm.xlu1 %5207, %v51_v21  }
  0x65   :  { %92 = vperm.xlu1 %5207, %v5796_v11  }
  0x69   :  { %5209 = vset.pattern.permute.xlu1 %v5673_v8 }
  0x6a   :  { %298 = vperm.xlu1 %5209, %v5789_v10  }
  0x6e   :  { %5210 = vset.pattern.permute.xlu1 %v5669_v0 }
  0x6f   :  { %146 = vperm.xlu1 %5210, %v51_v21  }
  0x73   :  { %5212 = vset.pattern.permute.xlu1 %v5674_v12 }
  0x74   :  { %346 = vperm.xlu1 %5212, %v5779_v9  }
  0x78   :  { %350 = vperm.xlu1 %5212, %v5789_v10  }
  0x7c   :  { %5214 = vset.pattern.permute.xlu1 %v5671_v4 }
  0x7d   :  { %202 = vperm.xlu1 %5214, %v5796_v11  }
  0x81   :  { %5215 = vset.pattern.permute.xlu1 %v5672_v5  ;;  %v123_v27 = vpop.permute.xlu1 %122  ;;  %v58_v28 = vpop.permute.xlu0 %57 }
  0x82   :  { %250 = vperm.xlu1 %5215, %v51_v21   ;;  %v99_v60 = vmul.f32 %v5908_v45, %v58_v28  ;;  %v157_v9 = vmul.f32 %v5923_v52, %v123_v27 }
  0x84   :  { %v113_v5 = vadd.f32 %v5920_v51, %v99_v60  ;;  %v5994_v60 = vld [vmem:[%s7720_s4 + $0x28] ss:$16 sps:$4 sm:$0xff]  }
  0x85   :  { %v127_v30 = vpop.permute.xlu1 %126  ;;  %v63_v31 = vpop.permute.xlu0 %62 }
  0x86   :  { %5216 = vset.pattern.permute.xlu1 %v5673_v8  ;;  %v100_v48 = vmul.f32 %v5908_v45, %v63_v31  ;;  %v158_v57 = vmul.f32 %v5923_v52, %v127_v30  ;;  %v165_v15 = vadd.f32 %v157_v9, %v113_v5  ;;  %v6035_v9 = vld [vmem:[%s7720_s4 + $0x6c] ss:$16 sps:$4 sm:$0xff]  }
  0x87   :  { %302 = vperm.xlu1 %5216, %v51_v21  }
  0x88   :  { %v114_v53 = vadd.f32 %v5920_v51, %v100_v48  ;;  %v5974_v48 = vld [vmem:[%s7720_s4 + $0x2c] ss:$16 sps:$4 sm:$0xff]  }
  0x8a   :  { %v179_v32 = vpop.permute.xlu1 %178  ;;  %v231_v33 = vpop.permute.xlu0 %230  ;;  %v166_v61 = vadd.f32 %v158_v57, %v114_v53 }
  0x8b   :  { %306 = vperm.xlu1 %5216, %v5796_v11   ;;  %v210_v62 = vmul.f32 %v5927_v54, %v179_v32  ;;  %v262_v7 = vmul.f32 %v5937_v63, %v231_v33 }
  0x8d   :  { %v218_v6 = vadd.f32 %v210_v62, %v166_v61  ;;  %v6006_v62 = vld [vmem:[%s7720_s4 + $0x4c] ss:$16 sps:$4 sm:$0xff]  }
  0x8e   :  { %v5889_v34 = vpop.permute.xlu0 %238 }
  0x8f   :  { %5218 = vset.pattern.permute.xlu1 %v5674_v12  ;;  %v227_v35 = vpop.permute.xlu1 %226  ;;  %v270_v13 = vadd.f32 %v262_v7, %v218_v6 }
  0x90   :  { %358 = vperm.xlu1 %5218, %v5796_v11   ;;  %v5947_v11 = vrot.slane %v53_v43, %v363_v3  ;;  %v261_v17 = vmul.f32 %v5937_v63, %v227_v35  ;;  %v5964_v43 = vld [vmem:[%s7720_s4 + $0x8] ss:$16 sps:$4 sm:$0xff]  }
  0x93   :  { %v279_v37 = vpop.permute.xlu0 %278 }
  0x94   :  { %v5894_v39 = vpop.permute.xlu1 %67  ;;  %v313_v18 = vmul.f32 %v5939_v2, %v279_v37  ;;  %v5959_v37 = vld [vmem:[%s7720_s4] ss:$16 sps:$4 sm:$0xff]  }
  0x95   :  { %v101_v57 = vmul.f32 %v5908_v45, %v5894_v39  ;;  %v6001_v39 = vld [vmem:[%s7720_s4 + $0x44] ss:$16 sps:$4 sm:$0xff]  }
  0x97   :  { %v5896_v40 = vpop.permute.xlu0 %286  ;;  %v115_v5 = vadd.f32 %v5920_v51, %v101_v57 }
  0x98   :  { %v5900_v42 = vpop.permute.xlu1 %72 }
  0x99   :  { %v102_v6 = vmul.f32 %v5908_v45, %v5900_v42  ;;  %v6030_v42 = vld [vmem:[%s7720_s4 + $0x64] ss:$16 sps:$4 sm:$0xff]  }
  0x9b   :  { %v5905_v44 = vpop.permute.xlu0 %294 }
  0x9d   :  { %v283_v46 = vpop.permute.xlu1 %282 }
  0x9e   :  { %v314_v10 = vmul.f32 %v5939_v2, %v283_v46  ;;  %v5969_v46 = vld [vmem:[%s7720_s4 + $0x24] ss:$16 sps:$4 sm:$0xff]  }
  0xa0   :  { %v5915_v50 = vpop.permute.xlu0 %134  ;;  %v322_v19 = vadd.f32 %v314_v10, %v270_v13 }
  0xa1   :  { %v160_v10 = vmul.f32 %v5923_v52, %v5915_v50  ;;  %v6054_v50 = vld [vmem:[%s7720_s4 + $0x68] ss:$16 sps:$4 sm:$0xff]  }
  0xa2   :  { %v131_v56 = vpop.permute.xlu1 %130 }
  0xa4   :  { %v5932_v59 = vpop.permute.xlu0 %142 }
  0xa5   :  { %v162_v36 = vmul.f32 %v5923_v52, %v5932_v59 }
  0xa7   :  { %v331_v0 = vpop.permute.xlu1 %330 }
  0xa8   :  { %v5941_v4 = vpop.permute.xlu0 %150  ;;  %v365_v24 = vmul.f32 %v5947_v11, %v331_v0  ;;  %v159_v0 = vmul.f32 %v5923_v52, %v131_v56  ;;  %v6023_v56 = vld [vmem:[%s7720_s4 + $0x48] ss:$16 sps:$4 sm:$0xff]  }
  0xab   :  { %v335_v8 = vpop.permute.xlu1 %334 }
  0xac   :  { %v366_v14 = vmul.f32 %v5947_v11, %v335_v8  ;;  %v6018_v8 = vld [vmem:[%s7720_s4 + $0x40] ss:$16 sps:$4 sm:$0xff]  }
  0xad   :  { %v175_v12 = vpop.permute.xlu0 %174 }
  0xae   :  { %v209_v16 = vmul.f32 %v5927_v54, %v175_v12  ;;  %v374_v22 = vadd.f32 %v366_v14, %v322_v19  ;;  %v167_v12 = vadd.f32 %v159_v0, %v115_v5  ;;  %v116_v14 = vadd.f32 %v5920_v51, %v102_v6  ;;  %v6061_v19 = vld [vmem:[%s7720_s4 + $0x84] ss:$16 sps:$4 sm:$0xff]   ;;  %v6108_v0 = vld [vmem:[%s7720_s4 + $0xa8] ss:$16 sps:$4 sm:$0xff]   ;;  %v6120_v6 = vld [vmem:[%s7720_s4 + $0xcc] ss:$16 sps:$4 sm:$0xff]  }
  0xaf   :  { %v6115_v5 = vld [vmem:[%s7720_s4 + $0xc4] ss:$16 sps:$4 sm:$0xff]  }
  0xb0   :  { %v217_v20 = vadd.f32 %v209_v16, %v165_v15  ;;  %v187_v21 = vpop.permute.xlu1 %186  ;;  %v382_v28 = vmul.f32 0.1, %v374_v22 }
  0xb1   :  { %v183_v61 = vpop.permute.xlu0 %182  ;;  %v212_v15 = vmul.f32 %v5927_v54, %v187_v21  ;;  %v315_v21 = vmul.f32 %v5939_v2, %v5896_v40 }
  0xb2   :  { %v269_v23 = vadd.f32 %v261_v17, %v217_v20  ;;  %v390_v32 = vmax.f32 %v374_v22, %v382_v28  ;;  %v211_v7 = vmul.f32 %v5927_v54, %v183_v61  ;;  %v6066_v20 = vld [vmem:[%s7720_s4 + $0x8c] ss:$16 sps:$4 sm:$0xff]   ;;  %v168_v22 = vadd.f32 %v160_v10, %v116_v14  ;;  %v6082_v28 = vld [vmem:[%s7720_s4 + $0x88] ss:$16 sps:$4 sm:$0xff]   ;;  %v6103_v61 = vld [vmem:[%s7720_s4 + $0xa0] ss:$16 sps:$4 sm:$0xff]  }
  0xb3   :  { %v6128_v14 = vld [vmem:[%s7720_s4 + $0xc0] ss:$16 sps:$4 sm:$0xff]  }
  0xb4   :  { %v321_v25 = vadd.f32 %v313_v18, %v269_v23  ;;  %v219_v16 = vadd.f32 %v211_v7, %v167_v12  ;;  %v6049_v18 = vld [vmem:[%s7720_s4 + $0x60] ss:$16 sps:$4 sm:$0xff]  }
  0xb5   :  { %v235_v27 = vpop.permute.xlu1 %234 }
  0xb6   :  { %v373_v30 = vadd.f32 %v365_v24, %v321_v25  ;;  %v263_v13 = vmul.f32 %v5937_v63, %v235_v27  ;;  %v264_v24 = vmul.f32 %v5937_v63, %v5889_v34  ;;  %v220_v25 = vadd.f32 %v212_v15, %v168_v22  ;;  %v6077_v27 = vld [vmem:[%s7720_s4 + $0x80] ss:$16 sps:$4 sm:$0xff]   ;;  %v6089_v34 = vld [vmem:[%s7720_s4 + $0xa4] ss:$16 sps:$4 sm:$0xff]   ;;  %v6133_v15 = vld [vmem:[%s7720_s4 + $0xc8] ss:$16 sps:$4 sm:$0xff]  }
  0xb8   :  { %v381_v31 = vmul.f32 0.1, %v373_v30  ;;  %v271_v23 = vadd.f32 %v263_v13, %v219_v16  ;;  %v6140_v16 = vld [vmem:[%s7720_s4 + $0xe4] ss:$16 sps:$4 sm:$0xff]  }
  0xba   :  { %v5954_v33 = vpop.permute.xlu1 %77  ;;  %v389_v38 = vmax.f32 %v373_v30, %v381_v31  ;;  %v6094_v30 = vld [vmem:[%s7720_s4 + $0xac] ss:$16 sps:$4 sm:$0xff]  }
  0xbc   :  { %v397_v35 = vpack.c.bf16 %v390_v32, %v389_v38  ;;  %v323_v32 = vadd.f32 %v315_v21, %v271_v23  ;;  %v6145_v21 = vld [vmem:[%s7720_s4 + $0xec] ss:$16 sps:$4 sm:$0xff]  }
  0xbe   :  { %v5976_v53 = vpop.permute.xlu1 %82  ;;  %4770 = vmatmul.mubr.msk.bf16.vlgmr.msra.gmra.mrb[0].mxu0 %vm495_vm0, %v397_v35  ;;  %4774 = vmatmul.mubr.msk.bf16.vlgmr.msra.gmra.mrb[0].mxu1 %vm495_vm0, %v397_v35  ;;  %v272_v35 = vadd.f32 %v264_v24, %v220_v25 }
  0xbf   :  { %550 = vmatprep.mubr.bf16.mxu0 %v7733_v1  ;;  %623 = vmatprep.mubr.bf16.mxu1 %v7733_v1 }
  0xc0   :  { %883 = vmatpush1.bf16.msra.mxu0 %v5959_v37  ;;  %924 = vmatpush1.bf16.msra.mxu1 %v5964_v43 }
  0xc1   :  { %884 = vmatprep.subr.bf16.mxu0 %v5969_v46  ;;  %925 = vmatprep.subr.bf16.mxu1 %v5974_v48 }
  0xc3   :  { %v291_v3 = vpop.permute.xlu1 %290 }
  0xc4   :  { %885 = vmatpush1.bf16.msra.mxu0 %v5989_v58  ;;  %926 = vmatpush1.bf16.msra.mxu1 %v5994_v60  ;;  %v316_v31 = vmul.f32 %v5939_v2, %v291_v3 }
  0xc5   :  { %886 = vmatprep.subr.bf16.mxu0 %v6001_v39  ;;  %927 = vmatprep.subr.bf16.mxu1 %v6006_v62 }
  0xc6   :  { %v324_v7 = vadd.f32 %v316_v31, %v272_v35  ;;  %v6154_v31 = vld [vmem:[%s7720_s4 + $0xe0] ss:$16 sps:$4 sm:$0xff]  }
  0xc8   :  { %v6042_v17 = vpop.permute.xlu1 %138  ;;  %887 = vmatpush1.bf16.msra.mxu0 %v6018_v8  ;;  %928 = vmatpush1.bf16.msra.mxu1 %v6023_v56 }
  0xc9   :  { %888 = vmatprep.subr.bf16.mxu0 %v6030_v42  ;;  %929 = vmatprep.subr.bf16.mxu1 %v6035_v9 }
  0xcc   :  { %889 = vmatpush1.bf16.msra.mxu0 %v6049_v18  ;;  %930 = vmatpush1.bf16.msra.mxu1 %v6054_v50 }
  0xcd   :  { %v339_v40 = vpop.permute.xlu1 %338  ;;  %890 = vmatprep.subr.bf16.mxu0 %v6061_v19  ;;  %931 = vmatprep.subr.bf16.mxu1 %v6066_v20 }
  0xce   :  { %v367_v38 = vmul.f32 %v5947_v11, %v339_v40 }
  0xd0   :  { %v375_v57 = vadd.f32 %v367_v38, %v323_v32  ;;  %891 = vmatpush1.bf16.msra.mxu0 %v6077_v27  ;;  %932 = vmatpush1.bf16.msra.mxu1 %v6082_v28  ;;  %v6159_v32 = vld [vmem:[%s7720_s4 + $0xe8] ss:$16 sps:$4 sm:$0xff]  }
  0xd1   :  { %v343_v3 = vpop.permute.xlu1 %342  ;;  %892 = vmatprep.subr.bf16.mxu0 %v6089_v34  ;;  %933 = vmatprep.subr.bf16.mxu1 %v6094_v30 }
  0xd2   :  { %v368_v10 = vmul.f32 %v5947_v11, %v343_v3  ;;  %v383_v12 = vmul.f32 0.1, %v375_v57 }
  0xd4   :  { %v376_v13 = vadd.f32 %v368_v10, %v324_v7  ;;  %893 = vmatpush1.bf16.msra.mxu0 %v6103_v61  ;;  %934 = vmatpush1.bf16.msra.mxu1 %v6108_v0  ;;  %v391_v24 = vmax.f32 %v375_v57, %v383_v12  ;;  %v103_v57 = vmul.f32 %v5908_v45, %v5954_v33  ;;  %v191_v7 = vpop.permute.xlu0 %190 }
  0xd5   :  { %894 = vmatprep.subr.bf16.mxu0 %v6115_v5  ;;  %935 = vmatprep.subr.bf16.mxu1 %v6120_v6  ;;  %v161_v10 = vmul.f32 %v5923_v52, %v6042_v17 }
  0xd6   :  { %v384_v22 = vmul.f32 0.1, %v376_v13  ;;  %v195_v23 = vpop.permute.xlu1 %194  ;;  %v117_v12 = vadd.f32 %v5920_v51, %v103_v57 }
  0xd7   :  { %v214_v17 = vmul.f32 %v5927_v54, %v195_v23 }
  0xd8   :  { %v392_v25 = vmax.f32 %v376_v13, %v384_v22  ;;  %895 = vmatpush1.bf16.msra.mxu0 %v6128_v14  ;;  %936 = vmatpush1.bf16.msra.mxu1 %v6133_v15  ;;  %v104_v13 = vmul.f32 %v5908_v45, %v5976_v53  ;;  %v199_v22 = vpop.permute.xlu0 %198  ;;  %v317_v53 = vmul.f32 %v5939_v2, %v5905_v44 }
  0xd9   :  { %896 = vmatprep.subr.bf16.mxu0 %v6140_v16  ;;  %937 = vmatprep.subr.bf16.mxu1 %v6145_v21 }
  0xda   :  { %v398_v40 = vpack.c.bf16 %v392_v25, %v391_v24  ;;  %v169_v25 = vadd.f32 %v161_v10, %v117_v12  ;;  %v118_v33 = vadd.f32 %v5920_v51, %v104_v13 }
  0xdb   :  { %v243_v38 = vpop.permute.xlu1 %242 }
  0xdc   :  { %4771 = vmatmul.mubr.msk.bf16.gmra.mrb[4].mxu0 %vm495_vm0, %v398_v40  ;;  %4775 = vmatmul.mubr.msk.bf16.gmra.mrb[4].mxu1 %vm495_vm0, %v398_v40  ;;  %v213_v40 = vmul.f32 %v5927_v54, %v191_v7  ;;  %v247_v57 = vpop.permute.xlu0 %246  ;;  %v170_v49 = vadd.f32 %v162_v36, %v118_v33 }
  0xdd   :  { %560 = vmatprep.mubr.bf16.mxu0 %v7733_v1  ;;  %633 = vmatprep.mubr.bf16.mxu1 %v7733_v1  ;;  %v265_v1 = vmul.f32 %v5937_v63, %v243_v38  ;;  %v266_v7 = vmul.f32 %v5937_v63, %v247_v57 }
  0xde   :  { %897 = vmatpush1.bf16.msra.mxu0 %v6154_v31  ;;  %938 = vmatpush1.bf16.msra.mxu1 %v6159_v32  ;;  %v221_v55 = vadd.f32 %v213_v40, %v169_v25  ;;  %v222_v10 = vadd.f32 %v214_v17, %v170_v49 }
  0xdf   :  { %991 = vmatprep.subr.bf16.mxu0 %v5877_v26  ;;  %1032 = vmatprep.subr.bf16.mxu1 %v5884_v29 }
  0xe0   :  { %v88_v35 = vpop.permute.xlu1 %87  ;;  %v273_v41 = vadd.f32 %v265_v1, %v221_v55  ;;  %v274_v38 = vadd.f32 %v266_v7, %v222_v10  ;;  %v215_v10 = vmul.f32 %v5927_v54, %v199_v22 }
  0xe1   :  { %v105_v55 = vmul.f32 %v5908_v45, %v88_v35  ;;  %v7753_v35 = vmov 0  }
  0xe2   :  { %v325_v29 = vadd.f32 %v317_v53, %v273_v41 }
  0xe3   :  { %v119_v41 = vadd.f32 %v5920_v51, %v105_v55 }
  0xe4   :  { %v93_v3 = vpop.permute.xlu1 %92 }
  0xe9   :  { %v299_v24 = vpop.permute.xlu1 %298 }
  0xea   :  { %v318_v59 = vmul.f32 %v5939_v2, %v299_v24  ;;  %v106_v24 = vmul.f32 %v5908_v45, %v93_v3  ;;  %v164_v45 = vmul.f32 %v5923_v52, %v5941_v4 }
  0xec   :  { %v326_v23 = vadd.f32 %v318_v59, %v274_v38 }
  0xee   :  { %v147_v47 = vpop.permute.xlu1 %146 }
  0xef   :  { %v163_v33 = vmul.f32 %v5923_v52, %v147_v47  ;;  %v120_v47 = vadd.f32 %v5920_v51, %v106_v24 }
  0xf1   :  { %v171_v7 = vadd.f32 %v163_v33, %v119_v41 }
  0xf3   :  { %v347_v12 = vpop.permute.xlu1 %346  ;;  %v223_v22 = vadd.f32 %v215_v10, %v171_v7 }
  0xf4   :  { %v369_v13 = vmul.f32 %v5947_v11, %v347_v12 }
  0xf6   :  { %v377_v25 = vadd.f32 %v369_v13, %v325_v29 }
  0xf7   :  { %v351_v40 = vpop.permute.xlu1 %350 }
  0xf8   :  { %v370_v26 = vmul.f32 %v5947_v11, %v351_v40  ;;  %v385_v36 = vmul.f32 0.1, %v377_v25 }
  0xfa   :  { %v378_v1 = vadd.f32 %v370_v26, %v326_v23  ;;  %v393_v17 = vmax.f32 %v377_v25, %v385_v36  ;;  %v255_v26 = vpop.permute.xlu0 %254  ;;  %v172_v25 = vadd.f32 %v164_v45, %v120_v47 }
  0xfb   :  { %v268_v36 = vmul.f32 %v5937_v63, %v255_v26 }
  0xfc   :  { %v386_v44 = vmul.f32 0.1, %v378_v1  ;;  %v203_v49 = vpop.permute.xlu1 %202 }
  0xfd   :  { %v216_v3 = vmul.f32 %v5927_v54, %v203_v49 }
  0xfe   :  { %v394_v57 = vmax.f32 %v378_v1, %v386_v44  ;;  %v355_v38 = vpop.permute.xlu0 %354 }
  0xff   :  { %v224_v23 = vadd.f32 %v216_v3, %v172_v25  ;;  %v371_v51 = vmul.f32 %v5947_v11, %v355_v38 }
 0x100   :  { %v399_v53 = vpack.c.bf16 %v394_v57, %v393_v17 }
 0x101   :  { %v251_v29 = vpop.permute.xlu1 %250  ;;  %v276_v33 = vadd.f32 %v268_v36, %v224_v23 }
 0x102   :  { %4772 = vmatmul.mubr.msk.bf16.gmra.mrb[8].mxu0 %vm495_vm0, %v399_v53  ;;  %4776 = vmatmul.mubr.msk.bf16.gmra.mrb[8].mxu1 %vm495_vm0, %v399_v53  ;;  %v267_v12 = vmul.f32 %v5937_v63, %v251_v29  ;;  %v7754_v63 = vld [vmem:[#allocation4_spill] sm:$0xff] }
 0x103   :  { %570 = vmatprep.mubr.bf16.mxu0 %v7753_v35  ;;  %643 = vmatprep.mubr.bf16.mxu1 %v7753_v35 }
 0x104   :  { %v275_v40 = vadd.f32 %v267_v12, %v223_v22 }
 0x106   :  { %v303_v59 = vpop.permute.xlu1 %302 }
 0x107   :  { %v319_v13 = vmul.f32 %v5939_v2, %v303_v59 }
 0x109   :  { %v327_v1 = vadd.f32 %v319_v13, %v275_v40 }
 0x10a   :  { %v307_v55 = vpop.permute.xlu1 %306 }
 0x10b   :  { %v320_v44 = vmul.f32 %v5939_v2, %v307_v55  ;;  %v379_v52 = vadd.f32 %v371_v51, %v327_v1  ;;  %v7755_v2 = vld [vmem:[#allocation5_spill] sm:$0xff] }
 0x10d   :  { %v328_v54 = vadd.f32 %v320_v44, %v276_v33  ;;  %v387_v17 = vmul.f32 0.1, %v379_v52 }
 0x10f   :  { %v359_v4 = vpop.permute.xlu1 %358  ;;  %v395_v24 = vmax.f32 %v379_v52, %v387_v17 }
 0x110   :  { %v372_v49 = vmul.f32 %v5947_v11, %v359_v4 }
 0x112   :  { %v380_v57 = vadd.f32 %v372_v49, %v328_v54  ;;  %v413_v49 = vld [vmem:[%s7723_s5] sm:$0xf] }
 0x114   :  { %v388_v41 = vmul.f32 0.1, %v380_v57 }
 0x116   :  { %v396_v53 = vmax.f32 %v380_v57, %v388_v41 }
 0x118   :  { %v400_v29 = vpack.c.bf16 %v396_v53, %v395_v24 }
 0x11a   :  { %4773 = vmatmul.mubr.msk.bf16.gmra.mrb[12].mxu0 %vm495_vm0, %v400_v29  ;;  %4777 = vmatmul.mubr.msk.bf16.gmra.mrb[12].mxu1 %vm495_vm0, %v400_v29 }
 0x11b   :  { %914 = vmatprep.mubr.bf16.mxu0 %v7753_v35  ;;  %955 = vmatprep.mubr.bf16.mxu1 %v7753_v35 }
 0x122   :  { %915 = vmatmul.mubr.bf16.vlgmr.msra.gmra.mrb[16].mxu0 %v7753_v35  ;;  %956 = vmatmul.mubr.bf16.vlgmr.msra.gmra.mrb[16].mxu1 %v7753_v35 }
 0x123   :  { %992 = vmatpush1.bf16.msra.mxu0 %v5959_v37  ;;  %1033 = vmatpush1.bf16.msra.mxu1 %v5964_v43 }
 0x124   :  { %993 = vmatprep.subr.bf16.mxu0 %v5969_v46  ;;  %1034 = vmatprep.subr.bf16.mxu1 %v5974_v48 }
 0x125   :  { %1023 = vmatprep.mubr.bf16.mxu0 %v7753_v35  ;;  %1064 = vmatprep.mubr.bf16.mxu1 %v7753_v35 }
 0x127   :  { %994 = vmatpush1.bf16.msra.mxu0 %v5989_v58  ;;  %1035 = vmatpush1.bf16.msra.mxu1 %v5994_v60 }
 0x128   :  { %995 = vmatprep.subr.bf16.mxu0 %v6001_v39  ;;  %1036 = vmatprep.subr.bf16.mxu1 %v6006_v62 }
 0x12b   :  { %996 = vmatpush1.bf16.msra.mxu0 %v6018_v8  ;;  %1037 = vmatpush1.bf16.msra.mxu1 %v6023_v56 }
 0x12c   :  { %997 = vmatprep.subr.bf16.mxu0 %v6030_v42  ;;  %1038 = vmatprep.subr.bf16.mxu1 %v6035_v9 }
 0x12f   :  { %998 = vmatpush1.bf16.msra.mxu0 %v6049_v18  ;;  %1039 = vmatpush1.bf16.msra.mxu1 %v6054_v50 }
 0x130   :  { %999 = vmatprep.subr.bf16.mxu0 %v6061_v19  ;;  %1040 = vmatprep.subr.bf16.mxu1 %v6066_v20 }
 0x133   :  { %1000 = vmatpush1.bf16.msra.mxu0 %v6077_v27  ;;  %1041 = vmatpush1.bf16.msra.mxu1 %v6082_v28 }
 0x134   :  { %1001 = vmatprep.subr.bf16.mxu0 %v6089_v34  ;;  %1042 = vmatprep.subr.bf16.mxu1 %v6094_v30 }
 0x137   :  { %1002 = vmatpush1.bf16.msra.mxu0 %v6103_v61  ;;  %1043 = vmatpush1.bf16.msra.mxu1 %v6108_v0 }
 0x138   :  { %1003 = vmatprep.subr.bf16.mxu0 %v6115_v5  ;;  %1044 = vmatprep.subr.bf16.mxu1 %v6120_v6 }
 0x13b   :  { %1004 = vmatpush1.bf16.msra.mxu0 %v6128_v14  ;;  %1045 = vmatpush1.bf16.msra.mxu1 %v6133_v15 }
 0x13c   :  { %1005 = vmatprep.subr.bf16.mxu0 %v6140_v16  ;;  %1046 = vmatprep.subr.bf16.mxu1 %v6145_v21 }
 0x13f   :  { %1006 = vmatpush1.bf16.msra.mxu0 %v6154_v31  ;;  %1047 = vmatpush1.bf16.msra.mxu1 %v6159_v32 }
 0x140   :  { %1100 = vmatprep.subr.bf16.mxu0 %v7754_v63  ;;  %1141 = vmatprep.subr.bf16.mxu1 %v7755_v2 }
 0x191   :  { %v542_v11 = vpop.f32.mrb[0].mxu0  ;;  %v615_v10 = vpop.f32.mrb[0].mxu1 }
 0x192   :  { %v544_v7 = vpop.f32.mrb[1].mxu0  ;;  %v617_v26 = vpop.f32.mrb[1].mxu1 }
 0x193   :  { %v6247_v47 = vpop.f32.mrb[2].mxu0  ;;  %v6249_v12 = vpop.f32.mrb[2].mxu1 }
 0x194   :  { %v6251_v45 = vpop.f32.mrb[3].mxu0  ;;  %v6253_v3 = vpop.f32.mrb[3].mxu1 }
 0x1af   :  { %v6255_v22 = vpop.f32.mrb[4].mxu0  ;;  %v6257_v59 = vpop.f32.mrb[4].mxu1 }
 0x1b0   :  { %7756 = vst [vmem:[#allocation4_spill] sm:$0xff] %v6255_v22  ;;  %7757 = vst [vmem:[#allocation5_spill] sm:$0xff] %v6257_v59  ;;  %v6259_v13 = vpop.f32.mrb[5].mxu0  ;;  %v6261_v38 = vpop.f32.mrb[5].mxu1 }
 0x1b1   :  { %7758 = vst [vmem:[#allocation10_spill] sm:$0xff] %v6259_v13  ;;  %7759 = vst [vmem:[#allocation11_spill] sm:$0xff] %v6261_v38  ;;  %v6263_v25 = vpop.f32.mrb[6].mxu0  ;;  %v6265_v40 = vpop.f32.mrb[6].mxu1 }
 0x1b2   :  { %7760 = vst [vmem:[#allocation12_spill] sm:$0xff] %v6263_v25  ;;  %7761 = vst [vmem:[#allocation13_spill] sm:$0xff] %v6265_v40  ;;  %v6267_v23 = vpop.f32.mrb[7].mxu0  ;;  %v6269_v36 = vpop.f32.mrb[7].mxu1 }
 0x1b3   :  { %7762 = vst [vmem:[#allocation14_spill] sm:$0xff] %v6267_v23  ;;  %7763 = vst [vmem:[#allocation15_spill] sm:$0xff] %v6269_v36 }
 0x1d5   :  { %v6271_v1 = vpop.f32.mrb[8].mxu0  ;;  %v6273_v51 = vpop.f32.mrb[8].mxu1 }
 0x1d6   :  { %7764 = vst [vmem:[#allocation16_spill] sm:$0xff] %v6271_v1  ;;  %7765 = vst [vmem:[#allocation17_spill] sm:$0xff] %v6273_v51  ;;  %v6275_v55 = vpop.f32.mrb[9].mxu0  ;;  %v6277_v44 = vpop.f32.mrb[9].mxu1 }
 0x1d7   :  { %7766 = vst [vmem:[#allocation18_spill] sm:$0xff] %v6275_v55  ;;  %7767 = vst [vmem:[#allocation19_spill] sm:$0xff] %v6277_v44  ;;  %v6279_v33 = vpop.f32.mrb[10].mxu0  ;;  %v6281_v52 = vpop.f32.mrb[10].mxu1 }
 0x1d8   :  { %7768 = vst [vmem:[#allocation20_spill] sm:$0xff] %v6279_v33  ;;  %7769 = vst [vmem:[#allocation21_spill] sm:$0xff] %v6281_v52  ;;  %v6283_v4 = vpop.f32.mrb[11].mxu0  ;;  %v6285_v54 = vpop.f32.mrb[11].mxu1  ;;  %v7778_v52 = vld [vmem:[#allocation6_spill] sm:$0xff] }
 0x1d9   :  { %7770 = vst [vmem:[#allocation22_spill] sm:$0xff] %v6283_v4  ;;  %7771 = vst [vmem:[#allocation23_spill] sm:$0xff] %v6285_v54  ;;  %v6303_v4 = vrot.slane %v413_v49, %v7778_v52  ;;  %v7779_v54 = vld [vmem:[#allocation8_spill] sm:$0xff] }
 0x1da   :  { %v6306_v33 = vrot.slane %v413_v49, %v7779_v54 }
 0x1ed   :  { %v6290_v17 = vpop.f32.mrb[12].mxu0  ;;  %v6292_v57 = vpop.f32.mrb[12].mxu1 }
 0x1ee   :  { %7772 = vst [vmem:[#allocation24_spill] sm:$0xff] %v6290_v17  ;;  %7773 = vst [vmem:[#allocation25_spill] sm:$0xff] %v6292_v57  ;;  %v6294_v41 = vpop.f32.mrb[13].mxu0  ;;  %v6296_v24 = vpop.f32.mrb[13].mxu1  ;;  %v7782_v17 = vld [vmem:[#allocation7_spill] sm:$0xff] }
 0x1ef   :  { %7774 = vst [vmem:[#allocation26_spill] sm:$0xff] %v6294_v41  ;;  %7775 = vst [vmem:[#allocation27_spill] sm:$0xff] %v6296_v24  ;;  %v6298_v53 = vpop.f32.mrb[14].mxu0  ;;  %v6300_v29 = vpop.f32.mrb[14].mxu1  ;;  %v6313_v57 = vrot.slane %v413_v49, %v7782_v17  ;;  %v7783_v41 = vld [vmem:[#allocation9_spill] sm:$0xff] }
 0x1f0   :  { %7776 = vst [vmem:[#allocation28_spill] sm:$0xff] %v6298_v53  ;;  %7777 = vst [vmem:[#allocation29_spill] sm:$0xff] %v6300_v29  ;;  %v6308_v44 = vpop.f32.mrb[15].mxu0  ;;  %v6310_v55 = vpop.f32.mrb[15].mxu1  ;;  %v6316_v51 = vrot.slane %v413_v49, %v7783_v41  ;;  %v543_v53 = vadd.f32 %v542_v11, %v6303_v4  ;;  %v616_v29 = vadd.f32 %v615_v10, %v6306_v33 }
 0x1f1   :  { %7780 = vst [vmem:[#allocation30_spill] sm:$0xff] %v6308_v44  ;;  %7781 = vst [vmem:[#allocation31_spill] sm:$0xff] %v6310_v55  ;;  %v545_v52 = vadd.f32 %v544_v7, %v6313_v57 }
 0x1f2   :  { %v618_v24 = vadd.f32 %v617_v26, %v6316_v51 }
 0x1f5   :  { %v916_v54 = vpop.f32.mrb[16].mxu0  ;;  %v957_v1 = vpop.f32.mrb[16].mxu1 }
 0x1f6   :  { %v964_v36 = vadd.f32 %v916_v54, %v543_v53  ;;  %v966_v44 = vadd.f32 %v957_v1, %v616_v29  ;;  %v918_v23 = vpop.f32.mrb[17].mxu0  ;;  %v959_v55 = vpop.f32.mrb[17].mxu1 }
 0x1f7   :  { %v965_v40 = vadd.f32 %v918_v23, %v545_v52  ;;  %v967_v17 = vadd.f32 %v959_v55, %v618_v24  ;;  %v920_v25 = vpop.f32.mrb[18].mxu0  ;;  %v961_v38 = vpop.f32.mrb[18].mxu1 }
 0x1f8   :  { %v968_v49 = vmul.f32 0.5, %v964_v36  ;;  %v921_v41 = vpop.f32.mrb[19].mxu0  ;;  %v962_v13 = vpop.f32.mrb[19].mxu1  ;;  %v970_v10 = vmul.f32 0.5, %v966_v44 }
 0x1f9   :  { %v969_v11 = vmul.f32 0.5, %v965_v40  ;;  %v622_v41 = vadd.f32 %v6253_v3, %v6316_v51 }
 0x1fa   :  { %5445 = vtanh.f32 %v968_v49 }
 0x1fb   :  { %5447 = vtanh.f32 %v969_v11 }
 0x1fc   :  { %5449 = vtanh.f32 %v967_v17  ;;  %v549_v17 = vadd.f32 %v6251_v45, %v6313_v57 }
 0x1fd   :  { %5451 = vtanh.f32 %v970_v10 }
 0x204   :  { %v5446_v7 = vpop.eup %5445 }
 0x205   :  { %v974_v26 = vmul.f32 0.5, %v5446_v7  ;;  %v5448_v59 = vpop.eup %5447 }
 0x206   :  { %v975_v1 = vmul.f32 0.5, %v5448_v59  ;;  %v5450_v54 = vpop.eup %5449  ;;  %v620_v59 = vadd.f32 %v6249_v12, %v6306_v33 }
 0x207   :  { %v977_v22 = vadd.f32 0.5, %v974_v26  ;;  %v5452_v13 = vpop.eup %5451 }
 0x208   :  { %v978_v53 = vadd.f32 0.5, %v975_v1  ;;  %v976_v38 = vmul.f32 0.5, %v5452_v13 }
 0x209   :  { %v982_v23 = vmul.f32 %v5450_v54, %v977_v22  ;;  %v547_v22 = vadd.f32 %v6247_v47, %v6303_v4 }
 0x20a   :  { %v981_v55 = vmul.f32 0.0, %v978_v53  ;;  %v979_v40 = vadd.f32 0.5, %v976_v38 }
 0x20c   :  { %v6322_v25 = vadd.f32 %v982_v23, %v981_v55 }
 0x20e   :  { %5453 = vtanh.f32 %v6322_v25 }
 0x218   :  { %v5454_v36 = vpop.eup %5453 }
 0x219   :  { %v985_v52 = vmul.f32 %v5454_v36, %v979_v40 }
 0x21b   :  { %v990_v44 = vpack.c.bf16 %v985_v52, %v985_v52 }
 0x21d   :  { %1024 = vmatmul.mubr.bf16.vlgmr.msra.gmra.mrb[20].mxu0 %v990_v44  ;;  %1065 = vmatmul.mubr.bf16.vlgmr.msra.gmra.mrb[20].mxu1 %v990_v44 }
 0x21e   :  { %1101 = vmatpush1.bf16.msra.mxu0 %v5959_v37  ;;  %1142 = vmatpush1.bf16.msra.mxu1 %v5964_v43 }
 0x21f   :  { %1102 = vmatprep.subr.bf16.mxu0 %v5969_v46  ;;  %1143 = vmatprep.subr.bf16.mxu1 %v5974_v48 }
 0x220   :  { %1132 = vmatprep.mubr.bf16.mxu0 %v7753_v35  ;;  %1173 = vmatprep.mubr.bf16.mxu1 %v7753_v35 }
 0x222   :  { %1103 = vmatpush1.bf16.msra.mxu0 %v5989_v58  ;;  %1144 = vmatpush1.bf16.msra.mxu1 %v5994_v60 }
 0x223   :  { %1104 = vmatprep.subr.bf16.mxu0 %v6001_v39  ;;  %1145 = vmatprep.subr.bf16.mxu1 %v6006_v62 }
 0x226   :  { %1105 = vmatpush1.bf16.msra.mxu0 %v6018_v8  ;;  %1146 = vmatpush1.bf16.msra.mxu1 %v6023_v56 }
 0x227   :  { %1106 = vmatprep.subr.bf16.mxu0 %v6030_v42  ;;  %1147 = vmatprep.subr.bf16.mxu1 %v6035_v9 }
 0x22a   :  { %1107 = vmatpush1.bf16.msra.mxu0 %v6049_v18  ;;  %1148 = vmatpush1.bf16.msra.mxu1 %v6054_v50 }
 0x22b   :  { %1108 = vmatprep.subr.bf16.mxu0 %v6061_v19  ;;  %1149 = vmatprep.subr.bf16.mxu1 %v6066_v20 }
 0x22e   :  { %1109 = vmatpush1.bf16.msra.mxu0 %v6077_v27  ;;  %1150 = vmatpush1.bf16.msra.mxu1 %v6082_v28 }
 0x22f   :  { %1110 = vmatprep.subr.bf16.mxu0 %v6089_v34  ;;  %1151 = vmatprep.subr.bf16.mxu1 %v6094_v30 }
 0x232   :  { %1111 = vmatpush1.bf16.msra.mxu0 %v6103_v61  ;;  %1152 = vmatpush1.bf16.msra.mxu1 %v6108_v0 }
 0x233   :  { %1112 = vmatprep.subr.bf16.mxu0 %v6115_v5  ;;  %1153 = vmatprep.subr.bf16.mxu1 %v6120_v6 }
 0x236   :  { %1113 = vmatpush1.bf16.msra.mxu0 %v6128_v14  ;;  %1154 = vmatpush1.bf16.msra.mxu1 %v6133_v15 }
 0x237   :  { %1114 = vmatprep.subr.bf16.mxu0 %v6140_v16  ;;  %1155 = vmatprep.subr.bf16.mxu1 %v6145_v21 }
 0x23a   :  { %1115 = vmatpush1.bf16.msra.mxu0 %v6154_v31  ;;  %1156 = vmatpush1.bf16.msra.mxu1 %v6159_v32 }
 0x23b   :  { %1209 = vmatprep.subr.bf16.mxu0 %v7754_v63  ;;  %1250 = vmatprep.subr.bf16.mxu1 %v7755_v2 }
 0x2f0   :  { %v1025_v24 = vpop.f32.mrb[20].mxu0  ;;  %v1066_v29 = vpop.f32.mrb[20].mxu1 }
 0x2f1   :  { %v1073_v49 = vadd.f32 %v1025_v24, %v547_v22  ;;  %v1075_v11 = vadd.f32 %v1066_v29, %v620_v59  ;;  %v1027_v10 = vpop.f32.mrb[21].mxu0  ;;  %v1068_v63 = vpop.f32.mrb[21].mxu1 }
 0x2f2   :  { %v1074_v7 = vadd.f32 %v1027_v10, %v549_v17  ;;  %v1076_v2 = vadd.f32 %v1068_v63, %v622_v41  ;;  %v1029_v26 = vpop.f32.mrb[22].mxu0  ;;  %v1070_v1 = vpop.f32.mrb[22].mxu1  ;;  %v7784_v10 = vld [vmem:[#allocation4_spill] sm:$0xff] }
 0x2f3   :  { %v1077_v47 = vmul.f32 0.5, %v1073_v49  ;;  %v1030_v54 = vpop.f32.mrb[23].mxu0  ;;  %v1071_v53 = vpop.f32.mrb[23].mxu1  ;;  %v1079_v45 = vmul.f32 0.5, %v1075_v11  ;;  %v6412_v11 = vld [vmem:[%s7720_s4 + $0xc] ss:$16 sps:$4 sm:$0xff]   ;;  %v553_v63 = vadd.f32 %v7784_v10, %v6303_v4 }
 0x2f4   :  { %v1078_v12 = vmul.f32 0.5, %v1074_v7  ;;  %v7785_v7 = vld [vmem:[#allocation5_spill] sm:$0xff]  ;;  %v7786_v26 = vld [vmem:[#allocation10_spill] sm:$0xff] }
 0x2f5   :  { %5455 = vtanh.f32 %v1077_v47  ;;  %v555_v1 = vadd.f32 %v7786_v26, %v6313_v57  ;;  %v7787_v47 = vld [vmem:[#allocation11_spill] sm:$0xff] }
 0x2f6   :  { %5457 = vtanh.f32 %v1078_v12  ;;  %v628_v54 = vadd.f32 %v7787_v47, %v6316_v51 }
 0x2f7   :  { %5459 = vtanh.f32 %v1076_v2  ;;  %v626_v2 = vadd.f32 %v7785_v7, %v6306_v33 }
 0x2f8   :  { %5461 = vtanh.f32 %v1079_v45 }
 0x2ff   :  { %v5456_v23 = vpop.eup %5455 }
 0x300   :  { %v1083_v3 = vmul.f32 0.5, %v5456_v23  ;;  %v5458_v55 = vpop.eup %5457 }
 0x301   :  { %v1084_v38 = vmul.f32 0.5, %v5458_v55  ;;  %v5460_v40 = vpop.eup %5459 }
 0x302   :  { %v1086_v13 = vadd.f32 0.5, %v1083_v3  ;;  %v5462_v59 = vpop.eup %5461 }
 0x303   :  { %v1087_v36 = vadd.f32 0.5, %v1084_v38  ;;  %v1085_v17 = vmul.f32 0.5, %v5462_v59 }
 0x304   :  { %v1091_v52 = vmul.f32 %v5460_v40, %v1086_v13 }
 0x305   :  { %v1090_v44 = vmul.f32 %v1087_v36, %v6322_v25  ;;  %v1088_v41 = vadd.f32 0.5, %v1085_v17  ;;  %v6406_v25 = vld [vmem:[%s7720_s4 + $0x4] ss:$16 sps:$4 sm:$0xff]  }
 0x307   :  { %v6368_v22 = vadd.f32 %v1091_v52, %v1090_v44 }
 0x309   :  { %5463 = vtanh.f32 %v6368_v22 }
 0x313   :  { %v5464_v24 = vpop.eup %5463 }
 0x314   :  { %v1094_v29 = vmul.f32 %v5464_v24, %v1088_v41 }
 0x316   :  { %v1099_v49 = vpack.c.bf16 %v1094_v29, %v1094_v29 }
 0x318   :  { %1133 = vmatmul.mubr.bf16.vlgmr.msra.gmra.mrb[24].mxu0 %v1099_v49  ;;  %1174 = vmatmul.mubr.bf16.vlgmr.msra.gmra.mrb[24].mxu1 %v1099_v49 }
 0x319   :  { %1210 = vmatpush1.bf16.msra.mxu0 %v5959_v37  ;;  %1251 = vmatpush1.bf16.msra.mxu1 %v5964_v43 }
 0x31a   :  { %1211 = vmatprep.subr.bf16.mxu0 %v5969_v46  ;;  %1252 = vmatprep.subr.bf16.mxu1 %v5974_v48 }
 0x31b   :  { %1241 = vmatprep.mubr.bf16.mxu0 %v7753_v35  ;;  %1282 = vmatprep.mubr.bf16.mxu1 %v7753_v35 }
 0x31d   :  { %1212 = vmatpush1.bf16.msra.mxu0 %v5989_v58  ;;  %1253 = vmatpush1.bf16.msra.mxu1 %v5994_v60 }
 0x31e   :  { %1213 = vmatprep.subr.bf16.mxu0 %v6001_v39  ;;  %1254 = vmatprep.subr.bf16.mxu1 %v6006_v62 }
 0x321   :  { %1214 = vmatpush1.bf16.msra.mxu0 %v6018_v8  ;;  %1255 = vmatpush1.bf16.msra.mxu1 %v6023_v56 }
 0x322   :  { %1215 = vmatprep.subr.bf16.mxu0 %v6030_v42  ;;  %1256 = vmatprep.subr.bf16.mxu1 %v6035_v9 }
 0x325   :  { %1216 = vmatpush1.bf16.msra.mxu0 %v6049_v18  ;;  %1257 = vmatpush1.bf16.msra.mxu1 %v6054_v50 }
 0x326   :  { %1217 = vmatprep.subr.bf16.mxu0 %v6061_v19  ;;  %1258 = vmatprep.subr.bf16.mxu1 %v6066_v20 }
 0x329   :  { %1218 = vmatpush1.bf16.msra.mxu0 %v6077_v27  ;;  %1259 = vmatpush1.bf16.msra.mxu1 %v6082_v28 }
 0x32a   :  { %1219 = vmatprep.subr.bf16.mxu0 %v6089_v34  ;;  %1260 = vmatprep.subr.bf16.mxu1 %v6094_v30 }
 0x32d   :  { %1220 = vmatpush1.bf16.msra.mxu0 %v6103_v61  ;;  %1261 = vmatpush1.bf16.msra.mxu1 %v6108_v0 }
 0x32e   :  { %1221 = vmatprep.subr.bf16.mxu0 %v6115_v5  ;;  %1262 = vmatprep.subr.bf16.mxu1 %v6120_v6 }
 0x331   :  { %1222 = vmatpush1.bf16.msra.mxu0 %v6128_v14  ;;  %1263 = vmatpush1.bf16.msra.mxu1 %v6133_v15 }
 0x332   :  { %1223 = vmatprep.subr.bf16.mxu0 %v6140_v16  ;;  %1264 = vmatprep.subr.bf16.mxu1 %v6145_v21 }
 0x335   :  { %1224 = vmatpush1.bf16.msra.mxu0 %v6154_v31  ;;  %1265 = vmatpush1.bf16.msra.mxu1 %v6159_v32 }
 0x336   :  { %1318 = vmatprep.subr.bf16.mxu0 %v6406_v25  ;;  %1359 = vmatprep.subr.bf16.mxu1 %v6412_v11 }
 0x3eb   :  { %v1134_v53 = vpop.f32.mrb[24].mxu0  ;;  %v1175_v12 = vpop.f32.mrb[24].mxu1 }
 0x3ec   :  { %v1182_v45 = vadd.f32 %v1134_v53, %v553_v63  ;;  %v1184_v23 = vadd.f32 %v1175_v12, %v626_v2  ;;  %v1136_v3 = vpop.f32.mrb[25].mxu0  ;;  %v1177_v55 = vpop.f32.mrb[25].mxu1 }
 0x3ed   :  { %v1183_v13 = vadd.f32 %v1136_v3, %v555_v1  ;;  %v1185_v38 = vadd.f32 %v1177_v55, %v628_v54  ;;  %v1138_v40 = vpop.f32.mrb[26].mxu0  ;;  %v1179_v36 = vpop.f32.mrb[26].mxu1 }
 0x3ee   :  { %v1186_v52 = vmul.f32 0.5, %v1182_v45  ;;  %v1139_v44 = vpop.f32.mrb[27].mxu0  ;;  %v1180_v59 = vpop.f32.mrb[27].mxu1  ;;  %v1188_v41 = vmul.f32 0.5, %v1184_v23 }
 0x3ef   :  { %v1187_v17 = vmul.f32 0.5, %v1183_v13 }
 0x3f0   :  { %5465 = vtanh.f32 %v1186_v52 }
 0x3f1   :  { %5467 = vtanh.f32 %v1187_v17 }
 0x3f2   :  { %5469 = vtanh.f32 %v1185_v38 }
 0x3f3   :  { %5471 = vtanh.f32 %v1188_v41 }
 0x3fa   :  { %v5466_v24 = vpop.eup %5465 }
 0x3fb   :  { %v1192_v29 = vmul.f32 0.5, %v5466_v24  ;;  %v5468_v49 = vpop.eup %5467 }
 0x3fc   :  { %v1193_v63 = vmul.f32 0.5, %v5468_v49  ;;  %v5470_v7 = vpop.eup %5469 }
 0x3fd   :  { %v1195_v10 = vadd.f32 0.5, %v1192_v29  ;;  %v5472_v54 = vpop.eup %5471 }
 0x3fe   :  { %v1196_v2 = vadd.f32 0.5, %v1193_v63  ;;  %v1194_v53 = vmul.f32 0.5, %v5472_v54 }
 0x3ff   :  { %v1200_v26 = vmul.f32 %v5470_v7, %v1195_v10 }
 0x400   :  { %v1199_v1 = vmul.f32 %v1196_v2, %v6368_v22  ;;  %v1197_v12 = vadd.f32 0.5, %v1194_v53 }
 0x402   :  { %v6424_v47 = vadd.f32 %v1200_v26, %v1199_v1 }
 0x404   :  { %5473 = vtanh.f32 %v6424_v47 }
 0x40e   :  { %v5474_v45 = vpop.eup %5473 }
 0x40f   :  { %v1203_v23 = vmul.f32 %v5474_v45, %v1197_v12 }
 0x411   :  { %v1208_v3 = vpack.c.bf16 %v1203_v23, %v1203_v23 }
 0x413   :  { %1242 = vmatmul.mubr.bf16.vlgmr.msra.gmra.mrb[28].mxu0 %v1208_v3  ;;  %1283 = vmatmul.mubr.bf16.vlgmr.msra.gmra.mrb[28].mxu1 %v1208_v3 }
 0x414   :  { %1319 = vmatpush1.bf16.msra.mxu0 %v5959_v37  ;;  %1360 = vmatpush1.bf16.msra.mxu1 %v5964_v43  ;;  %v7788_v37 = vld [vmem:[#allocation12_spill] sm:$0xff] }
 0x415   :  { %1320 = vmatprep.subr.bf16.mxu0 %v5969_v46  ;;  %1361 = vmatprep.subr.bf16.mxu1 %v5974_v48  ;;  %v557_v43 = vadd.f32 %v7788_v37, %v6303_v4  ;;  %v7789_v46 = vld [vmem:[#allocation13_spill] sm:$0xff] }
 0x416   :  { %1350 = vmatprep.mubr.bf16.mxu0 %v7753_v35  ;;  %1391 = vmatprep.mubr.bf16.mxu1 %v7753_v35  ;;  %v630_v48 = vadd.f32 %v7789_v46, %v6306_v33  ;;  %v6488_v46 = vld [vmem:[%s7720_s4 + $0x24] ss:$16 sps:$4 sm:$0xff]  }
 0x418   :  { %1321 = vmatpush1.bf16.msra.mxu0 %v5989_v58  ;;  %1362 = vmatpush1.bf16.msra.mxu1 %v5994_v60  ;;  %v7790_v58 = vld [vmem:[#allocation14_spill] sm:$0xff] }
 0x419   :  { %1322 = vmatprep.subr.bf16.mxu0 %v6001_v39  ;;  %1363 = vmatprep.subr.bf16.mxu1 %v6006_v62  ;;  %v559_v60 = vadd.f32 %v7790_v58, %v6313_v57  ;;  %v7791_v39 = vld [vmem:[#allocation15_spill] sm:$0xff]  ;;  %v6502_v58 = vld [vmem:[%s7720_s4 + $0x20] ss:$16 sps:$4 sm:$0xff]  }
 0x41a   :  { %v632_v62 = vadd.f32 %v7791_v39, %v6316_v51  ;;  %v6514_v39 = vld [vmem:[%s7720_s4 + $0x44] ss:$16 sps:$4 sm:$0xff]  }
 0x41c   :  { %1323 = vmatpush1.bf16.msra.mxu0 %v6018_v8  ;;  %1364 = vmatpush1.bf16.msra.mxu1 %v6023_v56 }
 0x41d   :  { %1324 = vmatprep.subr.bf16.mxu0 %v6030_v42  ;;  %1365 = vmatprep.subr.bf16.mxu1 %v6035_v9 }
 0x420   :  { %1325 = vmatpush1.bf16.msra.mxu0 %v6049_v18  ;;  %1366 = vmatpush1.bf16.msra.mxu1 %v6054_v50 }
 0x421   :  { %1326 = vmatprep.subr.bf16.mxu0 %v6061_v19  ;;  %1367 = vmatprep.subr.bf16.mxu1 %v6066_v20 }
 0x424   :  { %1327 = vmatpush1.bf16.msra.mxu0 %v6077_v27  ;;  %1368 = vmatpush1.bf16.msra.mxu1 %v6082_v28 }
 0x425   :  { %1328 = vmatprep.subr.bf16.mxu0 %v6089_v34  ;;  %1369 = vmatprep.subr.bf16.mxu1 %v6094_v30 }
 0x428   :  { %1329 = vmatpush1.bf16.msra.mxu0 %v6103_v61  ;;  %1370 = vmatpush1.bf16.msra.mxu1 %v6108_v0 }
 0x429   :  { %1330 = vmatprep.subr.bf16.mxu0 %v6115_v5  ;;  %1371 = vmatprep.subr.bf16.mxu1 %v6120_v6 }
 0x42c   :  { %1331 = vmatpush1.bf16.msra.mxu0 %v6128_v14  ;;  %1372 = vmatpush1.bf16.msra.mxu1 %v6133_v15 }
 0x42d   :  { %1332 = vmatprep.subr.bf16.mxu0 %v6140_v16  ;;  %1373 = vmatprep.subr.bf16.mxu1 %v6145_v21 }
 0x430   :  { %1333 = vmatpush1.bf16.msra.mxu0 %v6154_v31  ;;  %1374 = vmatpush1.bf16.msra.mxu1 %v6159_v32 }
 0x431   :  { %1427 = vmatprep.subr.bf16.mxu0 %v6406_v25  ;;  %1468 = vmatprep.subr.bf16.mxu1 %v6412_v11 }
 0x4e6   :  { %v1243_v8 = vpop.f32.mrb[28].mxu0  ;;  %v1284_v56 = vpop.f32.mrb[28].mxu1 }
 0x4e7   :  { %v1291_v42 = vadd.f32 %v1243_v8, %v557_v43  ;;  %v1293_v9 = vadd.f32 %v1284_v56, %v630_v48  ;;  %v1245_v22 = vpop.f32.mrb[29].mxu0  ;;  %v1286_v55 = vpop.f32.mrb[29].mxu1  ;;  %v6476_v43 = vld [vmem:[%s7720_s4] ss:$16 sps:$4 sm:$0xff]   ;;  %v6494_v48 = vld [vmem:[%s7720_s4 + $0x2c] ss:$16 sps:$4 sm:$0xff]  }
 0x4e8   :  { %v1292_v13 = vadd.f32 %v1245_v22, %v559_v60  ;;  %v1294_v38 = vadd.f32 %v1286_v55, %v632_v62  ;;  %v1247_v40 = vpop.f32.mrb[30].mxu0  ;;  %v1288_v36 = vpop.f32.mrb[30].mxu1  ;;  %v6508_v60 = vld [vmem:[%s7720_s4 + $0x28] ss:$16 sps:$4 sm:$0xff]   ;;  %v6520_v62 = vld [vmem:[%s7720_s4 + $0x4c] ss:$16 sps:$4 sm:$0xff]  }
 0x4e9   :  { %v1295_v52 = vmul.f32 0.5, %v1291_v42  ;;  %v1248_v44 = vpop.f32.mrb[31].mxu0  ;;  %v1289_v59 = vpop.f32.mrb[31].mxu1  ;;  %v1297_v41 = vmul.f32 0.5, %v1293_v9  ;;  %v6526_v8 = vld [vmem:[%s7720_s4 + $0x40] ss:$16 sps:$4 sm:$0xff]  }
 0x4ea   :  { %v1296_v17 = vmul.f32 0.5, %v1292_v13  ;;  %v6532_v56 = vld [vmem:[%s7720_s4 + $0x48] ss:$16 sps:$4 sm:$0xff]   ;;  %v6538_v42 = vld [vmem:[%s7720_s4 + $0x64] ss:$16 sps:$4 sm:$0xff]  }
 0x4eb   :  { %5475 = vtanh.f32 %v1295_v52  ;;  %v6544_v9 = vld [vmem:[%s7720_s4 + $0x6c] ss:$16 sps:$4 sm:$0xff]  }
 0x4ec   :  { %5477 = vtanh.f32 %v1296_v17 }
 0x4ed   :  { %5479 = vtanh.f32 %v1294_v38 }
 0x4ee   :  { %5481 = vtanh.f32 %v1297_v41 }
 0x4f5   :  { %v5476_v24 = vpop.eup %5475 }
 0x4f6   :  { %v1301_v29 = vmul.f32 0.5, %v5476_v24  ;;  %v5478_v49 = vpop.eup %5477 }
 0x4f7   :  { %v1302_v63 = vmul.f32 0.5, %v5478_v49  ;;  %v5480_v7 = vpop.eup %5479 }
 0x4f8   :  { %v1304_v10 = vadd.f32 0.5, %v1301_v29  ;;  %v5482_v53 = vpop.eup %5481 }
 0x4f9   :  { %v1305_v2 = vadd.f32 0.5, %v1302_v63  ;;  %v1303_v12 = vmul.f32 0.5, %v5482_v53 }
 0x4fa   :  { %v1309_v26 = vmul.f32 %v5480_v7, %v1304_v10 }
 0x4fb   :  { %v1308_v1 = vmul.f32 %v1305_v2, %v6424_v47  ;;  %v1306_v45 = vadd.f32 0.5, %v1303_v12  ;;  %v6482_v47 = vld [vmem:[%s7720_s4 + $0x8] ss:$16 sps:$4 sm:$0xff]  }
 0x4fc   :  { %v6602_v12 = vld [vmem:[%s7720_s4 + $0x68] ss:$16 sps:$4 sm:$0xff]  }
 0x4fd   :  { %v6470_v54 = vadd.f32 %v1309_v26, %v1308_v1 }
 0x4ff   :  { %5483 = vtanh.f32 %v6470_v54 }
 0x509   :  { %v5484_v23 = vpop.eup %5483 }
 0x50a   :  { %v1312_v3 = vmul.f32 %v5484_v23, %v1306_v45  ;;  %v6608_v45 = vld [vmem:[%s7720_s4 + $0x84] ss:$16 sps:$4 sm:$0xff]   ;;  %v6614_v23 = vld [vmem:[%s7720_s4 + $0x8c] ss:$16 sps:$4 sm:$0xff]  }
 0x50c   :  { %v1317_v37 = vpack.c.bf16 %v1312_v3, %v1312_v3  ;;  %v6620_v3 = vld [vmem:[%s7720_s4 + $0x80] ss:$16 sps:$4 sm:$0xff]  }
 0x50e   :  { %1351 = vmatmul.mubr.bf16.vlgmr.msra.gmra.mrb[32].mxu0 %v1317_v37  ;;  %1392 = vmatmul.mubr.bf16.vlgmr.msra.gmra.mrb[32].mxu1 %v1317_v37  ;;  %v6626_v37 = vld [vmem:[%s7720_s4 + $0x88] ss:$16 sps:$4 sm:$0xff]  }
 0x50f   :  { %1428 = vmatpush1.bf16.msra.mxu0 %v6476_v43  ;;  %1469 = vmatpush1.bf16.msra.mxu1 %v6482_v47 }
 0x510   :  { %1429 = vmatprep.subr.bf16.mxu0 %v6488_v46  ;;  %1470 = vmatprep.subr.bf16.mxu1 %v6494_v48 }
 0x511   :  { %1459 = vmatprep.mubr.bf16.mxu0 %v7753_v35  ;;  %1500 = vmatprep.mubr.bf16.mxu1 %v7753_v35 }
 0x513   :  { %1430 = vmatpush1.bf16.msra.mxu0 %v6502_v58  ;;  %1471 = vmatpush1.bf16.msra.mxu1 %v6508_v60 }
 0x514   :  { %1431 = vmatprep.subr.bf16.mxu0 %v6514_v39  ;;  %1472 = vmatprep.subr.bf16.mxu1 %v6520_v62 }
 0x517   :  { %1432 = vmatpush1.bf16.msra.mxu0 %v6526_v8  ;;  %1473 = vmatpush1.bf16.msra.mxu1 %v6532_v56 }
 0x518   :  { %1433 = vmatprep.subr.bf16.mxu0 %v6538_v42  ;;  %1474 = vmatprep.subr.bf16.mxu1 %v6544_v9 }
 0x51b   :  { %1434 = vmatpush1.bf16.msra.mxu0 %v6049_v18  ;;  %1475 = vmatpush1.bf16.msra.mxu1 %v6054_v50  ;;  %v7792_v18 = vld [vmem:[#allocation16_spill] sm:$0xff] }
 0x51c   :  { %1435 = vmatprep.subr.bf16.mxu0 %v6061_v19  ;;  %1476 = vmatprep.subr.bf16.mxu1 %v6066_v20  ;;  %v563_v50 = vadd.f32 %v7792_v18, %v6303_v4  ;;  %v7793_v19 = vld [vmem:[#allocation17_spill] sm:$0xff]  ;;  %v6632_v18 = vld [vmem:[%s7720_s4 + $0xa4] ss:$16 sps:$4 sm:$0xff]  }
 0x51d   :  { %v636_v20 = vadd.f32 %v7793_v19, %v6306_v33  ;;  %v6644_v19 = vld [vmem:[%s7720_s4 + $0xa0] ss:$16 sps:$4 sm:$0xff]  }
 0x51f   :  { %1436 = vmatpush1.bf16.msra.mxu0 %v6077_v27  ;;  %1477 = vmatpush1.bf16.msra.mxu1 %v6082_v28  ;;  %v7794_v27 = vld [vmem:[#allocation18_spill] sm:$0xff] }
 0x520   :  { %1437 = vmatprep.subr.bf16.mxu0 %v6089_v34  ;;  %1478 = vmatprep.subr.bf16.mxu1 %v6094_v30  ;;  %v565_v28 = vadd.f32 %v7794_v27, %v6313_v57  ;;  %v7795_v34 = vld [vmem:[#allocation19_spill] sm:$0xff]  ;;  %v6656_v27 = vld [vmem:[%s7720_s4 + $0xc4] ss:$16 sps:$4 sm:$0xff]  }
 0x521   :  { %v638_v30 = vadd.f32 %v7795_v34, %v6316_v51  ;;  %v6668_v34 = vld [vmem:[%s7720_s4 + $0xc0] ss:$16 sps:$4 sm:$0xff]  }
 0x523   :  { %1438 = vmatpush1.bf16.msra.mxu0 %v6103_v61  ;;  %1479 = vmatpush1.bf16.msra.mxu1 %v6108_v0 }
 0x524   :  { %1439 = vmatprep.subr.bf16.mxu0 %v6115_v5  ;;  %1480 = vmatprep.subr.bf16.mxu1 %v6120_v6 }
 0x527   :  { %1440 = vmatpush1.bf16.msra.mxu0 %v6128_v14  ;;  %1481 = vmatpush1.bf16.msra.mxu1 %v6133_v15 }
 0x528   :  { %1441 = vmatprep.subr.bf16.mxu0 %v6140_v16  ;;  %1482 = vmatprep.subr.bf16.mxu1 %v6145_v21 }
 0x52b   :  { %1442 = vmatpush1.bf16.msra.mxu0 %v6154_v31  ;;  %1483 = vmatpush1.bf16.msra.mxu1 %v6159_v32 }
 0x52c   :  { %1536 = vmatprep.subr.bf16.mxu0 %v6406_v25  ;;  %1577 = vmatprep.subr.bf16.mxu1 %v6412_v11 }
 0x5e1   :  { %v1352_v61 = vpop.f32.mrb[32].mxu0  ;;  %v1393_v0 = vpop.f32.mrb[32].mxu1 }
 0x5e2   :  { %v1400_v5 = vadd.f32 %v1352_v61, %v563_v50  ;;  %v1402_v6 = vadd.f32 %v1393_v0, %v636_v20  ;;  %v1354_v14 = vpop.f32.mrb[33].mxu0  ;;  %v1395_v15 = vpop.f32.mrb[33].mxu1  ;;  %v6638_v50 = vld [vmem:[%s7720_s4 + $0xac] ss:$16 sps:$4 sm:$0xff]   ;;  %v6650_v20 = vld [vmem:[%s7720_s4 + $0xa8] ss:$16 sps:$4 sm:$0xff]  }
 0x5e3   :  { %v1401_v16 = vadd.f32 %v1354_v14, %v565_v28  ;;  %v1403_v21 = vadd.f32 %v1395_v15, %v638_v30  ;;  %v1356_v31 = vpop.f32.mrb[34].mxu0  ;;  %v1397_v32 = vpop.f32.mrb[34].mxu1  ;;  %v6662_v28 = vld [vmem:[%s7720_s4 + $0xcc] ss:$16 sps:$4 sm:$0xff]   ;;  %v6674_v30 = vld [vmem:[%s7720_s4 + $0xc8] ss:$16 sps:$4 sm:$0xff]  }
 0x5e4   :  { %v1404_v22 = vmul.f32 0.5, %v1400_v5  ;;  %v1357_v55 = vpop.f32.mrb[35].mxu0  ;;  %v1398_v13 = vpop.f32.mrb[35].mxu1  ;;  %v1406_v40 = vmul.f32 0.5, %v1402_v6  ;;  %v6680_v61 = vld [vmem:[%s7720_s4 + $0xe4] ss:$16 sps:$4 sm:$0xff]  }
 0x5e5   :  { %v1405_v38 = vmul.f32 0.5, %v1401_v16  ;;  %v6686_v0 = vld [vmem:[%s7720_s4 + $0xec] ss:$16 sps:$4 sm:$0xff]   ;;  %v6692_v5 = vld [vmem:[%s7720_s4 + $0xe0] ss:$16 sps:$4 sm:$0xff]  }
 0x5e6   :  { %5485 = vtanh.f32 %v1404_v22  ;;  %v6698_v6 = vld [vmem:[%s7720_s4 + $0xe8] ss:$16 sps:$4 sm:$0xff]   ;;  %v7796_v14 = vld [vmem:[#allocation20_spill] sm:$0xff]  ;;  %v7798_v31 = vld [vmem:[#allocation22_spill] sm:$0xff] }
 0x5e7   :  { %5487 = vtanh.f32 %v1405_v38  ;;  %v567_v15 = vadd.f32 %v7796_v14, %v6303_v4  ;;  %v7797_v16 = vld [vmem:[#allocation21_spill] sm:$0xff]  ;;  %v569_v32 = vadd.f32 %v7798_v31, %v6313_v57  ;;  %v7799_v22 = vld [vmem:[#allocation23_spill] sm:$0xff] }
 0x5e8   :  { %5489 = vtanh.f32 %v1403_v21  ;;  %v640_v21 = vadd.f32 %v7797_v16, %v6306_v33  ;;  %v642_v55 = vadd.f32 %v7799_v22, %v6316_v51 }
 0x5e9   :  { %5491 = vtanh.f32 %v1406_v40 }
 0x5f0   :  { %v5486_v36 = vpop.eup %5485 }
 0x5f1   :  { %v1410_v52 = vmul.f32 0.5, %v5486_v36  ;;  %v5488_v44 = vpop.eup %5487 }
 0x5f2   :  { %v1411_v17 = vmul.f32 0.5, %v5488_v44  ;;  %v5490_v41 = vpop.eup %5489 }
 0x5f3   :  { %v1413_v59 = vadd.f32 0.5, %v1410_v52  ;;  %v5492_v63 = vpop.eup %5491 }
 0x5f4   :  { %v1414_v24 = vadd.f32 0.5, %v1411_v17  ;;  %v1412_v7 = vmul.f32 0.5, %v5492_v63 }
 0x5f5   :  { %v1418_v29 = vmul.f32 %v5490_v41, %v1413_v59 }
 0x5f6   :  { %v1417_v49 = vmul.f32 %v1414_v24, %v6470_v54  ;;  %v1415_v2 = vadd.f32 0.5, %v1412_v7  ;;  %v6596_v54 = vld [vmem:[%s7720_s4 + $0x60] ss:$16 sps:$4 sm:$0xff]  }
 0x5f8   :  { %v6576_v10 = vadd.f32 %v1418_v29, %v1417_v49 }
 0x5fa   :  { %5493 = vtanh.f32 %v6576_v10 }
 0x604   :  { %v5494_v26 = vpop.eup %5493 }
 0x605   :  { %v1421_v1 = vmul.f32 %v5494_v26, %v1415_v2 }
 0x607   :  { %v1426_v53 = vpack.c.bf16 %v1421_v1, %v1421_v1 }
 0x609   :  { %1460 = vmatmul.mubr.bf16.vlgmr.msra.gmra.mrb[36].mxu0 %v1426_v53  ;;  %1501 = vmatmul.mubr.bf16.vlgmr.msra.gmra.mrb[36].mxu1 %v1426_v53 }
 0x60a   :  { %1537 = vmatpush1.bf16.msra.mxu0 %v6476_v43  ;;  %1578 = vmatpush1.bf16.msra.mxu1 %v6482_v47 }
 0x60b   :  { %1538 = vmatprep.subr.bf16.mxu0 %v6488_v46  ;;  %1579 = vmatprep.subr.bf16.mxu1 %v6494_v48 }
 0x60c   :  { %1568 = vmatprep.mubr.bf16.mxu0 %v7753_v35  ;;  %1609 = vmatprep.mubr.bf16.mxu1 %v7753_v35 }
 0x60e   :  { %1539 = vmatpush1.bf16.msra.mxu0 %v6502_v58  ;;  %1580 = vmatpush1.bf16.msra.mxu1 %v6508_v60 }
 0x60f   :  { %1540 = vmatprep.subr.bf16.mxu0 %v6514_v39  ;;  %1581 = vmatprep.subr.bf16.mxu1 %v6520_v62 }
 0x612   :  { %1541 = vmatpush1.bf16.msra.mxu0 %v6526_v8  ;;  %1582 = vmatpush1.bf16.msra.mxu1 %v6532_v56 }
 0x613   :  { %1542 = vmatprep.subr.bf16.mxu0 %v6538_v42  ;;  %1583 = vmatprep.subr.bf16.mxu1 %v6544_v9 }
 0x616   :  { %1543 = vmatpush1.bf16.msra.mxu0 %v6596_v54  ;;  %1584 = vmatpush1.bf16.msra.mxu1 %v6602_v12 }
 0x617   :  { %1544 = vmatprep.subr.bf16.mxu0 %v6608_v45  ;;  %1585 = vmatprep.subr.bf16.mxu1 %v6614_v23 }
 0x61a   :  { %1545 = vmatpush1.bf16.msra.mxu0 %v6620_v3  ;;  %1586 = vmatpush1.bf16.msra.mxu1 %v6626_v37 }
 0x61b   :  { %1546 = vmatprep.subr.bf16.mxu0 %v6632_v18  ;;  %1587 = vmatprep.subr.bf16.mxu1 %v6638_v50 }
 0x61e   :  { %1547 = vmatpush1.bf16.msra.mxu0 %v6644_v19  ;;  %1588 = vmatpush1.bf16.msra.mxu1 %v6650_v20 }
 0x61f   :  { %1548 = vmatprep.subr.bf16.mxu0 %v6656_v27  ;;  %1589 = vmatprep.subr.bf16.mxu1 %v6662_v28 }
 0x622   :  { %1549 = vmatpush1.bf16.msra.mxu0 %v6668_v34  ;;  %1590 = vmatpush1.bf16.msra.mxu1 %v6674_v30 }
 0x623   :  { %1550 = vmatprep.subr.bf16.mxu0 %v6680_v61  ;;  %1591 = vmatprep.subr.bf16.mxu1 %v6686_v0 }
 0x626   :  { %1551 = vmatpush1.bf16.msra.mxu0 %v6692_v5  ;;  %1592 = vmatpush1.bf16.msra.mxu1 %v6698_v6 }
 0x627   :  { %1645 = vmatprep.subr.bf16.mxu0 %v6406_v25  ;;  %1686 = vmatprep.subr.bf16.mxu1 %v6412_v11 }
 0x6dc   :  { %v1461_v13 = vpop.f32.mrb[36].mxu0  ;;  %v1502_v38 = vpop.f32.mrb[36].mxu1 }
 0x6dd   :  { %v1509_v40 = vadd.f32 %v1461_v13, %v567_v15  ;;  %v1511_v36 = vadd.f32 %v1502_v38, %v640_v21  ;;  %v1463_v52 = vpop.f32.mrb[37].mxu0  ;;  %v1504_v25 = vpop.f32.mrb[37].mxu1 }
 0x6de   :  { %v1510_v44 = vadd.f32 %v1463_v52, %v569_v32  ;;  %v1512_v11 = vadd.f32 %v1504_v25, %v642_v55  ;;  %v1465_v59 = vpop.f32.mrb[38].mxu0  ;;  %v1506_v17 = vpop.f32.mrb[38].mxu1 }
 0x6df   :  { %v1513_v41 = vmul.f32 0.5, %v1509_v40  ;;  %v1466_v24 = vpop.f32.mrb[39].mxu0  ;;  %v1507_v29 = vpop.f32.mrb[39].mxu1  ;;  %v1515_v63 = vmul.f32 0.5, %v1511_v36 }
 0x6e0   :  { %v1514_v49 = vmul.f32 0.5, %v1510_v44  ;;  %v5285_v24 = vld [vmem:[%s7724_s6] sm:$0xff]   ;;  %v5675_v29 = vmov 0.0  }
 0x6e1   :  { %5495 = vtanh.f32 %v1513_v41 }
 0x6e2   :  { %5497 = vtanh.f32 %v1514_v49  ;;  %v5286_v49 = vld [vmem:[%s7724_s6 + $0x8] sm:$0xff]  }
 0x6e3   :  { %5499 = vtanh.f32 %v1512_v11 }
 0x6e4   :  { %5501 = vtanh.f32 %v1515_v63  ;;  %v5287_v63 = vld [vmem:[%s7724_s6 + $0x10] sm:$0xff]  }
 0x6eb   :  { %v5496_v7 = vpop.eup %5495 }
 0x6ec   :  { %v1519_v2 = vmul.f32 0.5, %v5496_v7  ;;  %v5498_v26 = vpop.eup %5497  ;;  %v5288_v7 = vld [vmem:[%s7724_s6 + $0x18] sm:$0xff]  }
 0x6ed   :  { %v1520_v53 = vmul.f32 0.5, %v5498_v26  ;;  %v5500_v14 = vpop.eup %5499  ;;  %v5290_v26 = vld [vmem:[%s7724_s6 + $0x28] sm:$0xff]  }
 0x6ee   :  { %v1522_v1 = vadd.f32 0.5, %v1519_v2  ;;  %v5502_v32 = vpop.eup %5501  ;;  %v5289_v2 = vld [vmem:[%s7724_s6 + $0x20] sm:$0xff]  }
 0x6ef   :  { %v1523_v15 = vadd.f32 0.5, %v1520_v53  ;;  %v1521_v22 = vmul.f32 0.5, %v5502_v32  ;;  %v5292_v53 = vld [vmem:[%s7724_s6 + $0x38] sm:$0xff]   ;;  %v5307_v32 = vld [vmem:[%s7725_s8 + $0x44] ss:$16 sps:$4 sm:$0xff]  }
 0x6f0   :  { %v1527_v16 = vmul.f32 %v5500_v14, %v1522_v1  ;;  %v5291_v1 = vld [vmem:[%s7724_s6 + $0x30] sm:$0xff]  }
 0x6f1   :  { %v1526_v21 = vmul.f32 %v1523_v15, %v6576_v10  ;;  %v1524_v55 = vadd.f32 0.5, %v1521_v22  ;;  %v5293_v14 = vld [vmem:[%s7725_s8] ss:$16 sps:$4 sm:$0xff]   ;;  %v5295_v15 = vld [vmem:[%s7725_s8 + $0x4] ss:$16 sps:$4 sm:$0xff]  }
 0x6f2   :  { %v5305_v22 = vld [vmem:[%s7725_s8 + $0x40] ss:$16 sps:$4 sm:$0xff]  }
 0x6f3   :  { %v6712_v31 = vadd.f32 %v1527_v16, %v1526_v21  ;;  %v5298_v16 = vld [vmem:[%s7725_s8 + $0xc] ss:$16 sps:$4 sm:$0xff]   ;;  %v5301_v21 = vld [vmem:[%s7725_s8 + $0x24] ss:$16 sps:$4 sm:$0xff]  }
 0x6f5   :  { %5503 = vtanh.f32 %v6712_v31 }
 0x6ff   :  { %v5504_v13 = vpop.eup %5503 }
 0x700   :  { %v1530_v38 = vmul.f32 %v5504_v13, %v1524_v55  ;;  %v5313_v55 = vld [vmem:[%s7725_s8 + $0x64] ss:$16 sps:$4 sm:$0xff]   ;;  %v5311_v13 = vld [vmem:[%s7725_s8 + $0x60] ss:$16 sps:$4 sm:$0xff]  }
 0x702   :  { %v1535_v40 = vpack.c.bf16 %v1530_v38, %v1530_v38  ;;  %v5319_v38 = vld [vmem:[%s7725_s8 + $0x84] ss:$16 sps:$4 sm:$0xff]  }
 0x704   :  { %1569 = vmatmul.mubr.bf16.vlgmr.msra.gmra.mrb[40].mxu0 %v1535_v40  ;;  %1610 = vmatmul.mubr.bf16.vlgmr.msra.gmra.mrb[40].mxu1 %v1535_v40  ;;  %v5317_v40 = vld [vmem:[%s7725_s8 + $0x80] ss:$16 sps:$4 sm:$0xff]  }
 0x705   :  { %1646 = vmatpush1.bf16.msra.mxu0 %v6476_v43  ;;  %1687 = vmatpush1.bf16.msra.mxu1 %v6482_v47  ;;  %v7800_v43 = vld [vmem:[#allocation24_spill] sm:$0xff] }
 0x706   :  { %1647 = vmatprep.subr.bf16.mxu0 %v6488_v46  ;;  %1688 = vmatprep.subr.bf16.mxu1 %v6494_v48  ;;  %v573_v47 = vadd.f32 %v7800_v43, %v6303_v4  ;;  %v7801_v46 = vld [vmem:[#allocation25_spill] sm:$0xff]  ;;  %v5325_v43 = vld [vmem:[%s7725_s8 + $0xa4] ss:$16 sps:$4 sm:$0xff]  }
 0x707   :  { %1677 = vmatprep.mubr.bf16.mxu0 %v7753_v35  ;;  %1718 = vmatprep.mubr.bf16.mxu1 %v7753_v35  ;;  %v646_v48 = vadd.f32 %v7801_v46, %v6306_v33  ;;  %v7804_v46 = vld [vmem:[#allocation28_spill] sm:$0xff] }
 0x709   :  { %1648 = vmatpush1.bf16.msra.mxu0 %v6502_v58  ;;  %1689 = vmatpush1.bf16.msra.mxu1 %v6508_v60  ;;  %v7802_v58 = vld [vmem:[#allocation26_spill] sm:$0xff] }
 0x70a   :  { %1649 = vmatprep.subr.bf16.mxu0 %v6514_v39  ;;  %1690 = vmatprep.subr.bf16.mxu1 %v6520_v62  ;;  %v575_v60 = vadd.f32 %v7802_v58, %v6313_v57  ;;  %v7803_v39 = vld [vmem:[#allocation27_spill] sm:$0xff]  ;;  %v7805_v58 = vld [vmem:[#allocation29_spill] sm:$0xff] }
 0x70b   :  { %v648_v62 = vadd.f32 %v7803_v39, %v6316_v51  ;;  %v7806_v39 = vld [vmem:[#allocation30_spill] sm:$0xff] }
 0x70d   :  { %1650 = vmatpush1.bf16.msra.mxu0 %v6526_v8  ;;  %1691 = vmatpush1.bf16.msra.mxu1 %v6532_v56 }
 0x70e   :  { %1651 = vmatprep.subr.bf16.mxu0 %v6538_v42  ;;  %1692 = vmatprep.subr.bf16.mxu1 %v6544_v9 }
 0x711   :  { %1652 = vmatpush1.bf16.msra.mxu0 %v6596_v54  ;;  %1693 = vmatpush1.bf16.msra.mxu1 %v6602_v12 }
 0x712   :  { %1653 = vmatprep.subr.bf16.mxu0 %v6608_v45  ;;  %1694 = vmatprep.subr.bf16.mxu1 %v6614_v23 }
 0x715   :  { %1654 = vmatpush1.bf16.msra.mxu0 %v6620_v3  ;;  %1695 = vmatpush1.bf16.msra.mxu1 %v6626_v37 }
 0x716   :  { %1655 = vmatprep.subr.bf16.mxu0 %v6632_v18  ;;  %1696 = vmatprep.subr.bf16.mxu1 %v6638_v50 }
 0x719   :  { %1656 = vmatpush1.bf16.msra.mxu0 %v6644_v19  ;;  %1697 = vmatpush1.bf16.msra.mxu1 %v6650_v20 }
 0x71a   :  { %1657 = vmatprep.subr.bf16.mxu0 %v6656_v27  ;;  %1698 = vmatprep.subr.bf16.mxu1 %v6662_v28 }
 0x71d   :  { %1658 = vmatpush1.bf16.msra.mxu0 %v6668_v34  ;;  %1699 = vmatpush1.bf16.msra.mxu1 %v6674_v30 }
 0x71e   :  { %1659 = vmatprep.subr.bf16.mxu0 %v6680_v61  ;;  %1700 = vmatprep.subr.bf16.mxu1 %v6686_v0 }
 0x721   :  { %1660 = vmatpush1.bf16.msra.mxu0 %v6692_v5  ;;  %1701 = vmatpush1.bf16.msra.mxu1 %v6698_v6 }
 0x722   :  { %5137 = vmatprep.subr.bf16.mxu0 %v5675_v29  ;;  %2078 = vmatprep.subr.bf16.mxu1 %v5295_v15  ;;  %v5334_v15 = vld [vmem:[%s7725_s8 + $0xcc] ss:$16 sps:$4 sm:$0xff]  }
 0x7d7   :  { %v1570_v8 = vpop.f32.mrb[40].mxu0  ;;  %v1611_v56 = vpop.f32.mrb[40].mxu1 }
 0x7d8   :  { %v1618_v42 = vadd.f32 %v1570_v8, %v573_v47  ;;  %v1620_v9 = vadd.f32 %v1611_v56, %v646_v48  ;;  %v1572_v10 = vpop.f32.mrb[41].mxu0  ;;  %v1613_v54 = vpop.f32.mrb[41].mxu1  ;;  %v5323_v47 = vld [vmem:[%s7725_s8 + $0xa0] ss:$16 sps:$4 sm:$0xff]   ;;  %v577_v48 = vadd.f32 %v7804_v46, %v6303_v4  ;;  %v7807_v8 = vld [vmem:[#allocation31_spill] sm:$0xff] }
 0x7d9   :  { %v1619_v12 = vadd.f32 %v1572_v10, %v575_v60  ;;  %v1621_v45 = vadd.f32 %v1613_v54, %v648_v62  ;;  %v1574_v23 = vpop.f32.mrb[42].mxu0  ;;  %v1615_v3 = vpop.f32.mrb[42].mxu1  ;;  %v650_v60 = vadd.f32 %v7805_v58, %v6306_v33  ;;  %v579_v62 = vadd.f32 %v7806_v39, %v6313_v57 }
 0x7da   :  { %v1622_v37 = vmul.f32 0.5, %v1618_v42  ;;  %v1575_v18 = vpop.f32.mrb[43].mxu0  ;;  %v1616_v50 = vpop.f32.mrb[43].mxu1  ;;  %v1624_v20 = vmul.f32 0.5, %v1620_v9  ;;  %v652_v56 = vadd.f32 %v7807_v8, %v6316_v51  ;;  %v6913_v8 = vld [vmem:[%s7726_s10 + $0x8] ss:$16 sps:$4 sm:$0xff]  }
 0x7db   :  { %v1623_v19 = vmul.f32 0.5, %v1619_v12 }
 0x7dc   :  { %5505 = vtanh.f32 %v1622_v37 }
 0x7dd   :  { %5507 = vtanh.f32 %v1623_v19 }
 0x7de   :  { %5509 = vtanh.f32 %v1621_v45 }
 0x7df   :  { %5511 = vtanh.f32 %v1624_v20 }
 0x7e6   :  { %v5506_v27 = vpop.eup %5505 }
 0x7e7   :  { %v1628_v28 = vmul.f32 0.5, %v5506_v27  ;;  %v5508_v34 = vpop.eup %5507 }
 0x7e8   :  { %v1629_v61 = vmul.f32 0.5, %v5508_v34  ;;  %v5510_v0 = vpop.eup %5509 }
 0x7e9   :  { %v1631_v30 = vadd.f32 0.5, %v1628_v28  ;;  %v5512_v25 = vpop.eup %5511 }
 0x7ea   :  { %v1632_v5 = vadd.f32 0.5, %v1629_v61  ;;  %v1630_v44 = vmul.f32 0.5, %v5512_v25 }
 0x7eb   :  { %v1636_v6 = vmul.f32 %v5510_v0, %v1631_v30 }
 0x7ec   :  { %v1635_v36 = vmul.f32 %v1632_v5, %v6712_v31  ;;  %v1633_v11 = vadd.f32 0.5, %v1630_v44  ;;  %v5299_v31 = vld [vmem:[%s7725_s8 + $0x20] ss:$16 sps:$4 sm:$0xff]  }
 0x7ee   :  { %v6756_v52 = vadd.f32 %v1636_v6, %v1635_v36 }
 0x7f0   :  { %5513 = vtanh.f32 %v6756_v52 }
 0x7fa   :  { %v5514_v59 = vpop.eup %5513 }
 0x7fb   :  { %v1639_v17 = vmul.f32 %v5514_v59, %v1633_v11 }
 0x7fd   :  { %v1644_v41 = vpack.c.bf16 %v1639_v17, %v1639_v17  ;;  %v5296_v17 = vld [vmem:[%s7725_s8 + $0x8] ss:$16 sps:$4 sm:$0xff]  }
 0x7ff   :  { %1678 = vmatmul.mubr.bf16.vlgmr.msra.gmra.mrb[44].mxu0 %v1644_v41  ;;  %1719 = vmatmul.mubr.bf16.vlgmr.msra.gmra.mrb[44].mxu1 %v1644_v41 }
 0x800   :  { %2110 = vmatprep.mubr.bf16.mxu1 %v7753_v35  ;;  %5138 = vmatpush3.bf16.msra.mxu0 %v5285_v24  ;;  %v5304_v24 = vld [vmem:[%s7725_s8 + $0x2c] ss:$16 sps:$4 sm:$0xff]  }
 0x801   :  { %5139 = vmatprep.subr.bf16.mxu0 %v5675_v29  ;;  %5153 = vmatprep.mubr.msk.bf16.mxu0 %vm5676_vm1, %v5675_v29 }
 0x802   :  { %2079 = vmatpush1.bf16.msra.mxu1 %v5293_v14  ;;  %v5331_v14 = vld [vmem:[%s7725_s8 + $0xc4] ss:$16 sps:$4 sm:$0xff]  }
 0x803   :  { %2080 = vmatprep.subr.bf16.mxu1 %v5301_v21  ;;  %v5332_v21 = vld [vmem:[%s7725_s8 + $0xc8] ss:$16 sps:$4 sm:$0xff]  }
 0x804   :  { %5140 = vmatpush3.bf16.msra.mxu0 %v5286_v49  ;;  %v5308_v49 = vld [vmem:[%s7725_s8 + $0x48] ss:$16 sps:$4 sm:$0xff]  }
 0x805   :  { %5141 = vmatprep.subr.bf16.mxu0 %v5675_v29 }
 0x806   :  { %2081 = vmatpush1.bf16.msra.mxu1 %v5299_v31  ;;  %v5337_v31 = vld [vmem:[%s7725_s8 + $0xe4] ss:$16 sps:$4 sm:$0xff]  }
 0x807   :  { %2082 = vmatprep.subr.bf16.mxu1 %v5307_v32  ;;  %v5340_v32 = vld [vmem:[%s7725_s8 + $0xec] ss:$16 sps:$4 sm:$0xff]  }
 0x808   :  { %5142 = vmatpush3.bf16.msra.mxu0 %v5287_v63  ;;  %v5316_v63 = vld [vmem:[%s7725_s8 + $0x6c] ss:$16 sps:$4 sm:$0xff]  }
 0x809   :  { %5143 = vmatprep.subr.bf16.mxu0 %v5675_v29 }
 0x80a   :  { %2083 = vmatpush1.bf16.msra.mxu1 %v5305_v22  ;;  %v5335_v22 = vld [vmem:[%s7725_s8 + $0xe0] ss:$16 sps:$4 sm:$0xff]  }
 0x80b   :  { %2084 = vmatprep.subr.bf16.mxu1 %v5313_v55  ;;  %v5338_v55 = vld [vmem:[%s7725_s8 + $0xe8] ss:$16 sps:$4 sm:$0xff]  }
 0x80c   :  { %5144 = vmatpush3.bf16.msra.mxu0 %v5288_v7  ;;  %v5314_v7 = vld [vmem:[%s7725_s8 + $0x68] ss:$16 sps:$4 sm:$0xff]  }
 0x80d   :  { %5145 = vmatprep.subr.bf16.mxu0 %v5675_v29 }
 0x80e   :  { %2085 = vmatpush1.bf16.msra.mxu1 %v5311_v13  ;;  %v6893_v13 = vld [vmem:[%s7726_s10 + $0x4] ss:$16 sps:$4 sm:$0xff]  }
 0x80f   :  { %2086 = vmatprep.subr.bf16.mxu1 %v5319_v38  ;;  %v6899_v38 = vld [vmem:[%s7726_s10 + $0xc] ss:$16 sps:$4 sm:$0xff]  }
 0x810   :  { %5146 = vmatpush3.bf16.msra.mxu0 %v5289_v2  ;;  %v5322_v2 = vld [vmem:[%s7725_s8 + $0x8c] ss:$16 sps:$4 sm:$0xff]  }
 0x811   :  { %5147 = vmatprep.subr.bf16.mxu0 %v5675_v29 }
 0x812   :  { %2087 = vmatpush1.bf16.msra.mxu1 %v5317_v40  ;;  %v4810_v40 = vld [vmem:[%s7727_s7] ss:$0 sm:$0xff] }
 0x813   :  { %2088 = vmatprep.subr.bf16.mxu1 %v5325_v43 }
 0x814   :  { %5148 = vmatpush3.bf16.msra.mxu0 %v5290_v26  ;;  %v5320_v26 = vld [vmem:[%s7725_s8 + $0x88] ss:$16 sps:$4 sm:$0xff]  }
 0x815   :  { %5149 = vmatprep.subr.bf16.mxu0 %v5675_v29 }
 0x816   :  { %2089 = vmatpush1.bf16.msra.mxu1 %v5323_v47 }
 0x817   :  { %2090 = vmatprep.subr.bf16.mxu1 %v5331_v14  ;;  %v7810_v14 = vld [vmem:[#allocation9_spill] sm:$0xff] }
 0x818   :  { %5150 = vmatpush3.bf16.msra.mxu0 %v5291_v1  ;;  %v5328_v1 = vld [vmem:[%s7725_s8 + $0xac] ss:$16 sps:$4 sm:$0xff]  }
 0x819   :  { %5151 = vmatprep.subr.bf16.mxu0 %v5675_v29  ;;  %v5310_v29 = vld [vmem:[%s7725_s8 + $0x4c] ss:$16 sps:$4 sm:$0xff]  }
 0x81c   :  { %5152 = vmatpush3.bf16.msra.mxu0 %v5292_v53  ;;  %v5326_v53 = vld [vmem:[%s7725_s8 + $0xa8] ss:$16 sps:$4 sm:$0xff]  }
 0x81d   :  { %2119 = vmatprep.subr.bf16.mxu0 %v5298_v16  ;;  %v5329_v16 = vld [vmem:[%s7725_s8 + $0xc0] ss:$16 sps:$4 sm:$0xff]  }
 0x81e   :  { %2091 = vmatpush1.bf16.msra.mxu1 %v5329_v16 }
 0x81f   :  { %2092 = vmatprep.subr.bf16.mxu1 %v5337_v31 }
 0x822   :  { %2093 = vmatpush1.bf16.msra.mxu1 %v5335_v22 }
 0x823   :  { %2352 = vmatprep.subr.bf16.mxu1 %v6893_v13 }
 0x8d2   :  { %v1679_v42 = vpop.f32.mrb[44].mxu0  ;;  %v1720_v9 = vpop.f32.mrb[44].mxu1 }
 0x8d3   :  { %v1727_v10 = vadd.f32 %v1679_v42, %v577_v48  ;;  %v1729_v54 = vadd.f32 %v1720_v9, %v650_v60  ;;  %v1681_v12 = vpop.f32.mrb[45].mxu0  ;;  %v1722_v45 = vpop.f32.mrb[45].mxu1  ;;  %v6918_v42 = vld [vmem:[%s7726_s10 + $0x24] ss:$16 sps:$4 sm:$0xff]   ;;  %v6923_v9 = vld [vmem:[%s7726_s10 + $0x2c] ss:$16 sps:$4 sm:$0xff]  }
 0x8d4   :  { %v1728_v23 = vadd.f32 %v1681_v12, %v579_v62  ;;  %v1730_v3 = vadd.f32 %v1722_v45, %v652_v56  ;;  %v1683_v37 = vpop.f32.mrb[46].mxu0  ;;  %v1724_v18 = vpop.f32.mrb[46].mxu1  ;;  %v6908_v62 = vld [vmem:[%s7726_s10] ss:$16 sps:$4 sm:$0xff]   ;;  %v6942_v12 = vld [vmem:[%s7726_s10 + $0x44] ss:$16 sps:$4 sm:$0xff]  }
 0x8d5   :  { %v1731_v4 = vmul.f32 0.5, %v1727_v10  ;;  %v1684_v50 = vpop.f32.mrb[47].mxu0  ;;  %v1725_v19 = vpop.f32.mrb[47].mxu1  ;;  %v1733_v57 = vmul.f32 0.5, %v1729_v54  ;;  %v6930_v10 = vld [vmem:[%s7726_s10 + $0x20] ss:$16 sps:$4 sm:$0xff]  }
 0x8d6   :  { %v1732_v33 = vmul.f32 0.5, %v1728_v23  ;;  %v6935_v54 = vld [vmem:[%s7726_s10 + $0x28] ss:$16 sps:$4 sm:$0xff]   ;;  %v6947_v45 = vld [vmem:[%s7726_s10 + $0x4c] ss:$16 sps:$4 sm:$0xff]  }
 0x8d7   :  { %5515 = vtanh.f32 %v1731_v4  ;;  %v6956_v23 = vld [vmem:[%s7726_s10 + $0x40] ss:$16 sps:$4 sm:$0xff]   ;;  %v6968_v37 = vld [vmem:[%s7726_s10 + $0x64] ss:$16 sps:$4 sm:$0xff]   ;;  %v6973_v18 = vld [vmem:[%s7726_s10 + $0x6c] ss:$16 sps:$4 sm:$0xff]  }
 0x8d8   :  { %5517 = vtanh.f32 %v1732_v33  ;;  %v6980_v4 = vld [vmem:[%s7726_s10 + $0x60] ss:$16 sps:$4 sm:$0xff]   ;;  %v6985_v50 = vld [vmem:[%s7726_s10 + $0x68] ss:$16 sps:$4 sm:$0xff]   ;;  %v6992_v19 = vld [vmem:[%s7726_s10 + $0x84] ss:$16 sps:$4 sm:$0xff]  }
 0x8d9   :  { %5519 = vtanh.f32 %v1730_v3  ;;  %v6961_v3 = vld [vmem:[%s7726_s10 + $0x48] ss:$16 sps:$4 sm:$0xff]   ;;  %v6997_v33 = vld [vmem:[%s7726_s10 + $0x8c] ss:$16 sps:$4 sm:$0xff]  }
 0x8da   :  { %5521 = vtanh.f32 %v1733_v57  ;;  %v7004_v57 = vld [vmem:[%s7726_s10 + $0x80] ss:$16 sps:$4 sm:$0xff]  }
 0x8e1   :  { %v5516_v20 = vpop.eup %5515 }
 0x8e2   :  { %v1737_v51 = vmul.f32 0.5, %v5516_v20  ;;  %v5518_v27 = vpop.eup %5517  ;;  %v7009_v20 = vld [vmem:[%s7726_s10 + $0x88] ss:$16 sps:$4 sm:$0xff]  }
 0x8e3   :  { %v1738_v34 = vmul.f32 0.5, %v5518_v27  ;;  %v5520_v30 = vpop.eup %5519  ;;  %v7021_v27 = vld [vmem:[%s7726_s10 + $0xac] ss:$16 sps:$4 sm:$0xff]  }
 0x8e4   :  { %v1740_v28 = vadd.f32 0.5, %v1737_v51  ;;  %v5522_v36 = vpop.eup %5521  ;;  %v7016_v51 = vld [vmem:[%s7726_s10 + $0xa4] ss:$16 sps:$4 sm:$0xff]  }
 0x8e5   :  { %v1741_v61 = vadd.f32 0.5, %v1738_v34  ;;  %v1739_v25 = vmul.f32 0.5, %v5522_v36  ;;  %v7033_v34 = vld [vmem:[%s7726_s10 + $0xa8] ss:$16 sps:$4 sm:$0xff]   ;;  %v7069_v36 = vld [vmem:[%s7726_s10 + $0xec] ss:$16 sps:$4 sm:$0xff]  }
 0x8e6   :  { %v1745_v0 = vmul.f32 %v5520_v30, %v1740_v28  ;;  %v7028_v28 = vld [vmem:[%s7726_s10 + $0xa0] ss:$16 sps:$4 sm:$0xff]   ;;  %v7040_v30 = vld [vmem:[%s7726_s10 + $0xc4] ss:$16 sps:$4 sm:$0xff]  }
 0x8e7   :  { %v1744_v5 = vmul.f32 %v1741_v61, %v6756_v52  ;;  %v1742_v44 = vadd.f32 0.5, %v1739_v25  ;;  %v5302_v52 = vld [vmem:[%s7725_s8 + $0x28] ss:$16 sps:$4 sm:$0xff]   ;;  %v7045_v61 = vld [vmem:[%s7726_s10 + $0xcc] ss:$16 sps:$4 sm:$0xff]  }
 0x8e8   :  { %v7076_v25 = vld [vmem:[%s7726_s10 + $0xe0] ss:$16 sps:$4 sm:$0xff]  }
 0x8e9   :  { %v1746_v6 = vadd.f32 %v1745_v0, %v1744_v5  ;;  %v7052_v0 = vld [vmem:[%s7726_s10 + $0xc0] ss:$16 sps:$4 sm:$0xff]   ;;  %v7057_v5 = vld [vmem:[%s7726_s10 + $0xc8] ss:$16 sps:$4 sm:$0xff]  }
 0x8eb   :  { %5523 = vtanh.f32 %v1746_v6  ;;  %v7064_v6 = vld [vmem:[%s7726_s10 + $0xe4] ss:$16 sps:$4 sm:$0xff]  }
 0x8f5   :  { %v5524_v11 = vpop.eup %5523 }
 0x8f6   :  { %v1748_v59 = vmul.f32 %v5524_v11, %v1742_v44  ;;  %v7081_v44 = vld [vmem:[%s7726_s10 + $0xe8] ss:$16 sps:$4 sm:$0xff]  }
 0x8f8   :  { %v1749_v41 = vpack.c.bf16 %v1748_v59, %v1748_v59 }
 0x8fa   :  { %5154 = vmatmul.mubr.bf16.vlgmr.msra.gmra.mrb[48].mxu0 %v1749_v41 }
 0x8fb   :  { %2120 = vmatpush1.bf16.msra.mxu0 %v5296_v17  ;;  %2151 = vmatprep.mubr.bf16.mxu0 %v7753_v35 }
 0x8fc   :  { %2121 = vmatprep.subr.bf16.mxu0 %v5304_v24 }
 0x8ff   :  { %2122 = vmatpush1.bf16.msra.mxu0 %v5302_v52 }
 0x900   :  { %2123 = vmatprep.subr.bf16.mxu0 %v5310_v29 }
 0x903   :  { %2124 = vmatpush1.bf16.msra.mxu0 %v5308_v49 }
 0x904   :  { %2125 = vmatprep.subr.bf16.mxu0 %v5316_v63  ;;  %v1896_v63 = vld [vmem:[%s7728_s9] sm:$0xf] }
 0x907   :  { %2126 = vmatpush1.bf16.msra.mxu0 %v5314_v7  ;;  %v7808_v7 = vld [vmem:[#allocation6_spill] sm:$0xff] }
 0x908   :  { %2127 = vmatprep.subr.bf16.mxu0 %v5322_v2  ;;  %v1901_v2 = vrot.slane %v1896_v63, %v7808_v7 }
 0x90b   :  { %2128 = vmatpush1.bf16.msra.mxu0 %v5320_v26  ;;  %v7809_v26 = vld [vmem:[#allocation7_spill] sm:$0xff] }
 0x90c   :  { %2129 = vmatprep.subr.bf16.mxu0 %v5328_v1  ;;  %v1905_v1 = vrot.slane %v1896_v63, %v7809_v26 }
 0x90f   :  { %2130 = vmatpush1.bf16.msra.mxu0 %v5326_v53 }
 0x910   :  { %2131 = vmatprep.subr.bf16.mxu0 %v5334_v15  ;;  %v1913_v15 = vrot.slane %v1896_v63, %v7810_v14 }
 0x913   :  { %2132 = vmatpush1.bf16.msra.mxu0 %v5332_v21 }
 0x914   :  { %2133 = vmatprep.subr.bf16.mxu0 %v5340_v32 }
 0x917   :  { %2134 = vmatpush1.bf16.msra.mxu0 %v5338_v55 }
 0x918   :  { %2393 = vmatprep.subr.bf16.mxu0 %v6899_v38 }
 0x9cd   :  { %v1855_v43 = vpop.f32.mrb[48].mxu0 }
 0x9ce   :  { %v1856_v47 = vadd.f32 %v4810_v40, %v1855_v43  ;;  %v5155_v46 = vpop.f32.mrb[49].mxu0 }
 0x9cf   :  { %v1858_v48 = vpop.f32.mrb[50].mxu0 }
 0x9d0   :  { %v1861_v58 = vmul.f32 0.1, %v1856_v47  ;;  %v5156_v60 = vpop.f32.mrb[51].mxu0 }
 0x9d2   :  { %v1862_v39 = vmax.f32 %v1856_v47, %v1861_v58 }
 0x9d4   :  { %v1863_v56 = vpack.c.bf16 %v1862_v39, %v1862_v39  ;;  %v7811_v39 = vld [vmem:[#allocation8_spill] sm:$0xff] }
 0x9d6   :  { %2111 = vmatmul.mubr.bf16.vlgmr.msra.gmra.mrb[48].mxu1 %v1863_v56  ;;  %2152 = vmatmul.mubr.bf16.vlgmr.msra.gmra.mrb[52].mxu0 %v1863_v56  ;;  %v1909_v56 = vrot.slane %v1896_v63, %v7811_v39 }
 0x9d7   :  { %2353 = vmatpush1.bf16.msra.mxu1 %v6908_v62  ;;  %2394 = vmatpush1.bf16.msra.mxu0 %v6913_v8 }
 0x9d8   :  { %2354 = vmatprep.subr.bf16.mxu1 %v6918_v42  ;;  %2395 = vmatprep.subr.bf16.mxu0 %v6923_v9 }
 0x9d9   :  { %2384 = vmatprep.mubr.bf16.mxu1 %v7753_v35  ;;  %2425 = vmatprep.mubr.bf16.mxu0 %v7753_v35 }
 0x9db   :  { %2355 = vmatpush1.bf16.msra.mxu1 %v6930_v10  ;;  %2396 = vmatpush1.bf16.msra.mxu0 %v6935_v54 }
 0x9dc   :  { %2356 = vmatprep.subr.bf16.mxu1 %v6942_v12  ;;  %2397 = vmatprep.subr.bf16.mxu0 %v6947_v45 }
 0x9df   :  { %2357 = vmatpush1.bf16.msra.mxu1 %v6956_v23  ;;  %2398 = vmatpush1.bf16.msra.mxu0 %v6961_v3 }
 0x9e0   :  { %2358 = vmatprep.subr.bf16.mxu1 %v6968_v37  ;;  %2399 = vmatprep.subr.bf16.mxu0 %v6973_v18 }
 0x9e3   :  { %2359 = vmatpush1.bf16.msra.mxu1 %v6980_v4  ;;  %2400 = vmatpush1.bf16.msra.mxu0 %v6985_v50 }
 0x9e4   :  { %2360 = vmatprep.subr.bf16.mxu1 %v6992_v19  ;;  %2401 = vmatprep.subr.bf16.mxu0 %v6997_v33 }
 0x9e7   :  { %2361 = vmatpush1.bf16.msra.mxu1 %v7004_v57  ;;  %2402 = vmatpush1.bf16.msra.mxu0 %v7009_v20 }
 0x9e8   :  { %2362 = vmatprep.subr.bf16.mxu1 %v7016_v51  ;;  %2403 = vmatprep.subr.bf16.mxu0 %v7021_v27 }
 0x9eb   :  { %2363 = vmatpush1.bf16.msra.mxu1 %v7028_v28  ;;  %2404 = vmatpush1.bf16.msra.mxu0 %v7033_v34 }
 0x9ec   :  { %2364 = vmatprep.subr.bf16.mxu1 %v7040_v30  ;;  %2405 = vmatprep.subr.bf16.mxu0 %v7045_v61 }
 0x9ef   :  { %2365 = vmatpush1.bf16.msra.mxu1 %v7052_v0  ;;  %2406 = vmatpush1.bf16.msra.mxu0 %v7057_v5 }
 0x9f0   :  { %2366 = vmatprep.subr.bf16.mxu1 %v7064_v6  ;;  %2407 = vmatprep.subr.bf16.mxu0 %v7069_v36 }
 0x9f3   :  { %2367 = vmatpush1.bf16.msra.mxu1 %v7076_v25  ;;  %2408 = vmatpush1.bf16.msra.mxu0 %v7081_v44 }
 0x9f4   :  { %2650 = vmatprep.subr.bf16.mxu1 %v6893_v13  ;;  %2691 = vmatprep.subr.bf16.mxu0 %v6899_v38 }
 0x9f6   :  { %2385 = vmatmul.mubr.bf16.vlgmr.msra.gmra.mrb[52].mxu1 %v7753_v35  ;;  %2426 = vmatmul.mubr.bf16.vlgmr.msra.gmra.mrb[56].mxu0 %v7753_v35 }
 0x9f7   :  { %2651 = vmatpush1.bf16.msra.mxu1 %v6908_v62  ;;  %2692 = vmatpush1.bf16.msra.mxu0 %v6913_v8 }
 0x9f8   :  { %2652 = vmatprep.subr.bf16.mxu1 %v6918_v42  ;;  %2693 = vmatprep.subr.bf16.mxu0 %v6923_v9 }
 0x9f9   :  { %2682 = vmatprep.mubr.bf16.mxu1 %v7753_v35  ;;  %2723 = vmatprep.mubr.bf16.mxu0 %v7753_v35 }
 0x9fb   :  { %2653 = vmatpush1.bf16.msra.mxu1 %v6930_v10  ;;  %2694 = vmatpush1.bf16.msra.mxu0 %v6935_v54 }
 0x9fc   :  { %2654 = vmatprep.subr.bf16.mxu1 %v6942_v12  ;;  %2695 = vmatprep.subr.bf16.mxu0 %v6947_v45 }
 0x9ff   :  { %2655 = vmatpush1.bf16.msra.mxu1 %v6956_v23  ;;  %2696 = vmatpush1.bf16.msra.mxu0 %v6961_v3 }
 0xa00   :  { %2656 = vmatprep.subr.bf16.mxu1 %v6968_v37  ;;  %2697 = vmatprep.subr.bf16.mxu0 %v6973_v18 }
 0xa03   :  { %2657 = vmatpush1.bf16.msra.mxu1 %v6980_v4  ;;  %2698 = vmatpush1.bf16.msra.mxu0 %v6985_v50 }
 0xa04   :  { %2658 = vmatprep.subr.bf16.mxu1 %v6992_v19  ;;  %2699 = vmatprep.subr.bf16.mxu0 %v6997_v33 }
 0xa07   :  { %2659 = vmatpush1.bf16.msra.mxu1 %v7004_v57  ;;  %2700 = vmatpush1.bf16.msra.mxu0 %v7009_v20 }
 0xa08   :  { %2660 = vmatprep.subr.bf16.mxu1 %v7016_v51  ;;  %2701 = vmatprep.subr.bf16.mxu0 %v7021_v27 }
 0xa0b   :  { %2661 = vmatpush1.bf16.msra.mxu1 %v7028_v28  ;;  %2702 = vmatpush1.bf16.msra.mxu0 %v7033_v34 }
 0xa0c   :  { %2662 = vmatprep.subr.bf16.mxu1 %v7040_v30  ;;  %2703 = vmatprep.subr.bf16.mxu0 %v7045_v61 }
 0xa0f   :  { %2663 = vmatpush1.bf16.msra.mxu1 %v7052_v0  ;;  %2704 = vmatpush1.bf16.msra.mxu0 %v7057_v5 }
 0xa10   :  { %2664 = vmatprep.subr.bf16.mxu1 %v7064_v6  ;;  %2705 = vmatprep.subr.bf16.mxu0 %v7069_v36 }
 0xa13   :  { %2665 = vmatpush1.bf16.msra.mxu1 %v7076_v25  ;;  %2706 = vmatpush1.bf16.msra.mxu0 %v7081_v44 }
 0xa14   :  { %2948 = vmatprep.subr.bf16.mxu1 %v6893_v13  ;;  %2989 = vmatprep.subr.bf16.mxu0 %v6899_v38 }
 0xaa9   :  { %v2112_v11 = vpop.f32.mrb[48].mxu1  ;;  %v2153_v59 = vpop.f32.mrb[52].mxu0 }
 0xaaa   :  { %v2114_v17 = vpop.f32.mrb[49].mxu1  ;;  %v2155_v41 = vpop.f32.mrb[53].mxu0  ;;  %v7130_v53 = vadd.f32 %v2112_v11, %v1901_v2 }
 0xaab   :  { %v2116_v24 = vpop.f32.mrb[50].mxu1  ;;  %v2157_v52 = vpop.f32.mrb[54].mxu0  ;;  %v7133_v16 = vadd.f32 %v2114_v17, %v1905_v1  ;;  %v7137_v46 = vadd.f32 %v2155_v41, %v1913_v15 }
 0xaac   :  { %v2117_v29 = vpop.f32.mrb[51].mxu1  ;;  %v2158_v49 = vpop.f32.mrb[55].mxu0  ;;  %v7141_v24 = vadd.f32 %v2153_v59, %v1909_v56 }
 0xac9   :  { %v2386_v21 = vpop.f32.mrb[52].mxu1  ;;  %v2427_v31 = vpop.f32.mrb[56].mxu0 }
 0xaca   :  { %v2434_v32 = vadd.f32 %v2386_v21, %v7130_v53  ;;  %v2388_v22 = vpop.f32.mrb[53].mxu1  ;;  %v2429_v55 = vpop.f32.mrb[57].mxu0  ;;  %v2436_v52 = vadd.f32 %v2427_v31, %v7141_v24 }
 0xacb   :  { %v2435_v40 = vadd.f32 %v2388_v22, %v7133_v16  ;;  %v2390_v43 = vpop.f32.mrb[54].mxu1  ;;  %v2431_v47 = vpop.f32.mrb[58].mxu0  ;;  %v2437_v17 = vadd.f32 %v2429_v55, %v7137_v46 }
 0xacc   :  { %v2438_v48 = vmul.f32 0.5, %v2434_v32  ;;  %v2391_v58 = vpop.f32.mrb[55].mxu1  ;;  %v2432_v60 = vpop.f32.mrb[59].mxu0  ;;  %v2440_v29 = vmul.f32 0.5, %v2436_v52 }
 0xacd   :  { %v2439_v11 = vmul.f32 0.5, %v2435_v40 }
 0xace   :  { %5525 = vtanh.f32 %v2438_v48 }
 0xacf   :  { %5527 = vtanh.f32 %v2439_v11 }
 0xad0   :  { %5529 = vtanh.f32 %v2437_v17 }
 0xad1   :  { %5531 = vtanh.f32 %v2440_v29 }
 0xad8   :  { %v5526_v49 = vpop.eup %5525 }
 0xad9   :  { %v2444_v7 = vmul.f32 0.5, %v5526_v49  ;;  %v5528_v41 = vpop.eup %5527 }
 0xada   :  { %v2445_v26 = vmul.f32 0.5, %v5528_v41  ;;  %v5530_v1 = vpop.eup %5529 }
 0xadb   :  { %v2447_v2 = vadd.f32 0.5, %v2444_v7  ;;  %v5532_v59 = vpop.eup %5531 }
 0xadc   :  { %v2448_v14 = vadd.f32 0.5, %v2445_v26  ;;  %v2446_v32 = vmul.f32 0.5, %v5532_v59 }
 0xadd   :  { %v2452_v63 = vmul.f32 %v5530_v1, %v2447_v2 }
 0xade   :  { %v2451_v15 = vmul.f32 0.0, %v2448_v14  ;;  %v2449_v22 = vadd.f32 0.5, %v2446_v32 }
 0xae0   :  { %v7144_v21 = vadd.f32 %v2452_v63, %v2451_v15 }
 0xae2   :  { %5533 = vtanh.f32 %v7144_v21 }
 0xaec   :  { %v5534_v55 = vpop.eup %5533 }
 0xaed   :  { %v7147_v31 = vmul.f32 %v5534_v55, %v2449_v22 }
 0xaef   :  { %v2457_v40 = vpack.c.bf16 %v7147_v31, %v7147_v31 }
 0xaf1   :  { %2683 = vmatmul.mubr.bf16.vlgmr.msra.gmra.mrb[56].mxu1 %v2457_v40  ;;  %2724 = vmatmul.mubr.bf16.vlgmr.msra.gmra.mrb[60].mxu0 %v2457_v40 }
 0xaf2   :  { %2949 = vmatpush1.bf16.msra.mxu1 %v6908_v62  ;;  %2990 = vmatpush1.bf16.msra.mxu0 %v6913_v8 }
 0xaf3   :  { %2950 = vmatprep.subr.bf16.mxu1 %v6918_v42  ;;  %2991 = vmatprep.subr.bf16.mxu0 %v6923_v9 }
 0xaf4   :  { %2980 = vmatprep.mubr.bf16.mxu1 %v7753_v35  ;;  %3021 = vmatprep.mubr.bf16.mxu0 %v7753_v35 }
 0xaf6   :  { %2951 = vmatpush1.bf16.msra.mxu1 %v6930_v10  ;;  %2992 = vmatpush1.bf16.msra.mxu0 %v6935_v54 }
 0xaf7   :  { %2952 = vmatprep.subr.bf16.mxu1 %v6942_v12  ;;  %2993 = vmatprep.subr.bf16.mxu0 %v6947_v45 }
 0xafa   :  { %2953 = vmatpush1.bf16.msra.mxu1 %v6956_v23  ;;  %2994 = vmatpush1.bf16.msra.mxu0 %v6961_v3 }
 0xafb   :  { %2954 = vmatprep.subr.bf16.mxu1 %v6968_v37  ;;  %2995 = vmatprep.subr.bf16.mxu0 %v6973_v18 }
 0xafe   :  { %2955 = vmatpush1.bf16.msra.mxu1 %v6980_v4  ;;  %2996 = vmatpush1.bf16.msra.mxu0 %v6985_v50 }
 0xaff   :  { %2956 = vmatprep.subr.bf16.mxu1 %v6992_v19  ;;  %2997 = vmatprep.subr.bf16.mxu0 %v6997_v33 }
 0xb02   :  { %2957 = vmatpush1.bf16.msra.mxu1 %v7004_v57  ;;  %2998 = vmatpush1.bf16.msra.mxu0 %v7009_v20 }
 0xb03   :  { %2958 = vmatprep.subr.bf16.mxu1 %v7016_v51  ;;  %2999 = vmatprep.subr.bf16.mxu0 %v7021_v27 }
 0xb06   :  { %2959 = vmatpush1.bf16.msra.mxu1 %v7028_v28  ;;  %3000 = vmatpush1.bf16.msra.mxu0 %v7033_v34 }
 0xb07   :  { %2960 = vmatprep.subr.bf16.mxu1 %v7040_v30  ;;  %3001 = vmatprep.subr.bf16.mxu0 %v7045_v61 }
 0xb0a   :  { %2961 = vmatpush1.bf16.msra.mxu1 %v7052_v0  ;;  %3002 = vmatpush1.bf16.msra.mxu0 %v7057_v5 }
 0xb0b   :  { %2962 = vmatprep.subr.bf16.mxu1 %v7064_v6  ;;  %3003 = vmatprep.subr.bf16.mxu0 %v7069_v36 }
 0xb0e   :  { %2963 = vmatpush1.bf16.msra.mxu1 %v7076_v25  ;;  %3004 = vmatpush1.bf16.msra.mxu0 %v7081_v44 }
 0xb0f   :  { %3246 = vmatprep.subr.bf16.mxu1 %v6893_v13  ;;  %3287 = vmatprep.subr.bf16.mxu0 %v6899_v38 }
 0xbc4   :  { %v2684_v43 = vpop.f32.mrb[56].mxu1  ;;  %v2725_v47 = vpop.f32.mrb[60].mxu0 }
 0xbc5   :  { %v2732_v48 = vadd.f32 %v2684_v43, %v7130_v53  ;;  %v2686_v58 = vpop.f32.mrb[57].mxu1  ;;  %v2727_v60 = vpop.f32.mrb[61].mxu0  ;;  %v2734_v13 = vadd.f32 %v2725_v47, %v7141_v24 }
 0xbc6   :  { %v2733_v39 = vadd.f32 %v2686_v58, %v7133_v16  ;;  %v2688_v56 = vpop.f32.mrb[58].mxu1  ;;  %v2729_v11 = vpop.f32.mrb[62].mxu0  ;;  %v2735_v7 = vadd.f32 %v2727_v60, %v7137_v46  ;;  %v7246_v60 = vld [vmem:[%s7726_s10 + $0x4] ss:$16 sps:$4 sm:$0xff]  }
 0xbc7   :  { %v2736_v17 = vmul.f32 0.5, %v2732_v48  ;;  %v2689_v52 = vpop.f32.mrb[59].mxu1  ;;  %v2730_v29 = vpop.f32.mrb[63].mxu0  ;;  %v2738_v38 = vmul.f32 0.5, %v2734_v13  ;;  %v7256_v56 = vld [vmem:[%s7726_s10] ss:$16 sps:$4 sm:$0xff]  }
 0xbc8   :  { %v2737_v49 = vmul.f32 0.5, %v2733_v39  ;;  %v7251_v39 = vld [vmem:[%s7726_s10 + $0xc] ss:$16 sps:$4 sm:$0xff]   ;;  %v7261_v11 = vld [vmem:[%s7726_s10 + $0x8] ss:$16 sps:$4 sm:$0xff]  }
 0xbc9   :  { %5535 = vtanh.f32 %v2736_v17  ;;  %v7270_v17 = vld [vmem:[%s7726_s10 + $0x24] ss:$16 sps:$4 sm:$0xff]   ;;  %v7275_v52 = vld [vmem:[%s7726_s10 + $0x2c] ss:$16 sps:$4 sm:$0xff]   ;;  %v7280_v29 = vld [vmem:[%s7726_s10 + $0x20] ss:$16 sps:$4 sm:$0xff]  }
 0xbca   :  { %5537 = vtanh.f32 %v2737_v49  ;;  %v7285_v49 = vld [vmem:[%s7726_s10 + $0x28] ss:$16 sps:$4 sm:$0xff]   ;;  %v7299_v13 = vld [vmem:[%s7726_s10 + $0x4c] ss:$16 sps:$4 sm:$0xff]  }
 0xbcb   :  { %5539 = vtanh.f32 %v2735_v7  ;;  %v7294_v7 = vld [vmem:[%s7726_s10 + $0x44] ss:$16 sps:$4 sm:$0xff]  }
 0xbcc   :  { %5541 = vtanh.f32 %v2738_v38  ;;  %v7304_v38 = vld [vmem:[%s7726_s10 + $0x40] ss:$16 sps:$4 sm:$0xff]  }
 0xbd3   :  { %v5536_v41 = vpop.eup %5535 }
 0xbd4   :  { %v2742_v2 = vmul.f32 0.5, %v5536_v41  ;;  %v5538_v26 = vpop.eup %5537  ;;  %v7309_v41 = vld [vmem:[%s7726_s10 + $0x48] ss:$16 sps:$4 sm:$0xff]  }
 0xbd5   :  { %v2743_v14 = vmul.f32 0.5, %v5538_v26  ;;  %v5540_v63 = vpop.eup %5539  ;;  %v7323_v26 = vld [vmem:[%s7726_s10 + $0x6c] ss:$16 sps:$4 sm:$0xff]  }
 0xbd6   :  { %v2745_v1 = vadd.f32 0.5, %v2742_v2  ;;  %v5542_v55 = vpop.eup %5541  ;;  %v7318_v2 = vld [vmem:[%s7726_s10 + $0x64] ss:$16 sps:$4 sm:$0xff]  }
 0xbd7   :  { %v2746_v15 = vadd.f32 0.5, %v2743_v14  ;;  %v2744_v40 = vmul.f32 0.5, %v5542_v55  ;;  %v7333_v14 = vld [vmem:[%s7726_s10 + $0x68] ss:$16 sps:$4 sm:$0xff]   ;;  %v7371_v55 = vld [vmem:[%s7726_s10 + $0xa4] ss:$16 sps:$4 sm:$0xff]  }
 0xbd8   :  { %v2750_v59 = vmul.f32 %v5540_v63, %v2745_v1  ;;  %v7328_v1 = vld [vmem:[%s7726_s10 + $0x60] ss:$16 sps:$4 sm:$0xff]   ;;  %v7342_v63 = vld [vmem:[%s7726_s10 + $0x84] ss:$16 sps:$4 sm:$0xff]  }
 0xbd9   :  { %v2749_v32 = vmul.f32 %v2746_v15, %v7144_v21  ;;  %v2747_v43 = vadd.f32 0.5, %v2744_v40  ;;  %v7347_v15 = vld [vmem:[%s7726_s10 + $0x8c] ss:$16 sps:$4 sm:$0xff]   ;;  %v7376_v40 = vld [vmem:[%s7726_s10 + $0xa8] ss:$16 sps:$4 sm:$0xff]  }
 0xbdb   :  { %v7190_v22 = vadd.f32 %v2750_v59, %v2749_v32  ;;  %v7352_v59 = vld [vmem:[%s7726_s10 + $0x80] ss:$16 sps:$4 sm:$0xff]   ;;  %v7357_v32 = vld [vmem:[%s7726_s10 + $0x88] ss:$16 sps:$4 sm:$0xff]  }
 0xbdd   :  { %5543 = vtanh.f32 %v7190_v22 }
 0xbe7   :  { %v5544_v47 = vpop.eup %5543 }
 0xbe8   :  { %v7193_v48 = vmul.f32 %v5544_v47, %v2747_v43  ;;  %v7381_v43 = vld [vmem:[%s7726_s10 + $0xac] ss:$16 sps:$4 sm:$0xff]   ;;  %v7386_v47 = vld [vmem:[%s7726_s10 + $0xc4] ss:$16 sps:$4 sm:$0xff]  }
 0xbea   :  { %v2755_v58 = vpack.c.bf16 %v7193_v48, %v7193_v48 }
 0xbec   :  { %2981 = vmatmul.mubr.bf16.vlgmr.msra.gmra.mrb[60].mxu1 %v2755_v58  ;;  %3022 = vmatmul.mubr.bf16.vlgmr.msra.gmra.mrb[64].mxu0 %v2755_v58  ;;  %v7392_v58 = vld [vmem:[%s7726_s10 + $0xcc] ss:$16 sps:$4 sm:$0xff]  }
 0xbed   :  { %3247 = vmatpush1.bf16.msra.mxu1 %v6908_v62  ;;  %3288 = vmatpush1.bf16.msra.mxu0 %v6913_v8 }
 0xbee   :  { %3248 = vmatprep.subr.bf16.mxu1 %v6918_v42  ;;  %3289 = vmatprep.subr.bf16.mxu0 %v6923_v9 }
 0xbef   :  { %3278 = vmatprep.mubr.bf16.mxu1 %v7753_v35  ;;  %3319 = vmatprep.mubr.bf16.mxu0 %v7753_v35 }
 0xbf1   :  { %3249 = vmatpush1.bf16.msra.mxu1 %v6930_v10  ;;  %3290 = vmatpush1.bf16.msra.mxu0 %v6935_v54 }
 0xbf2   :  { %3250 = vmatprep.subr.bf16.mxu1 %v6942_v12  ;;  %3291 = vmatprep.subr.bf16.mxu0 %v6947_v45 }
 0xbf5   :  { %3251 = vmatpush1.bf16.msra.mxu1 %v6956_v23  ;;  %3292 = vmatpush1.bf16.msra.mxu0 %v6961_v3 }
 0xbf6   :  { %3252 = vmatprep.subr.bf16.mxu1 %v6968_v37  ;;  %3293 = vmatprep.subr.bf16.mxu0 %v6973_v18 }
 0xbf9   :  { %3253 = vmatpush1.bf16.msra.mxu1 %v6980_v4  ;;  %3294 = vmatpush1.bf16.msra.mxu0 %v6985_v50 }
 0xbfa   :  { %3254 = vmatprep.subr.bf16.mxu1 %v6992_v19  ;;  %3295 = vmatprep.subr.bf16.mxu0 %v6997_v33 }
 0xbfd   :  { %3255 = vmatpush1.bf16.msra.mxu1 %v7004_v57  ;;  %3296 = vmatpush1.bf16.msra.mxu0 %v7009_v20 }
 0xbfe   :  { %3256 = vmatprep.subr.bf16.mxu1 %v7016_v51  ;;  %3297 = vmatprep.subr.bf16.mxu0 %v7021_v27 }
 0xc01   :  { %3257 = vmatpush1.bf16.msra.mxu1 %v7028_v28  ;;  %3298 = vmatpush1.bf16.msra.mxu0 %v7033_v34 }
 0xc02   :  { %3258 = vmatprep.subr.bf16.mxu1 %v7040_v30  ;;  %3299 = vmatprep.subr.bf16.mxu0 %v7045_v61 }
 0xc05   :  { %3259 = vmatpush1.bf16.msra.mxu1 %v7052_v0  ;;  %3300 = vmatpush1.bf16.msra.mxu0 %v7057_v5 }
 0xc06   :  { %3260 = vmatprep.subr.bf16.mxu1 %v7064_v6  ;;  %3301 = vmatprep.subr.bf16.mxu0 %v7069_v36 }
 0xc09   :  { %3261 = vmatpush1.bf16.msra.mxu1 %v7076_v25  ;;  %3302 = vmatpush1.bf16.msra.mxu0 %v7081_v44 }
 0xc0a   :  { %3544 = vmatprep.subr.bf16.mxu1 %v7246_v60  ;;  %3585 = vmatprep.subr.bf16.mxu0 %v7251_v39 }
 0xcbf   :  { %v2982_v62 = vpop.f32.mrb[60].mxu1  ;;  %v3023_v8 = vpop.f32.mrb[64].mxu0 }
 0xcc0   :  { %v3030_v42 = vadd.f32 %v2982_v62, %v7130_v53  ;;  %v2984_v9 = vpop.f32.mrb[61].mxu1  ;;  %v3025_v10 = vpop.f32.mrb[65].mxu0  ;;  %v3032_v50 = vadd.f32 %v3023_v8, %v7141_v24  ;;  %v7400_v62 = vld [vmem:[%s7726_s10 + $0xc0] ss:$16 sps:$4 sm:$0xff]   ;;  %v7405_v8 = vld [vmem:[%s7726_s10 + $0xc8] ss:$16 sps:$4 sm:$0xff]  }
 0xcc1   :  { %v3031_v54 = vadd.f32 %v2984_v9, %v7133_v16  ;;  %v2986_v12 = vpop.f32.mrb[62].mxu1  ;;  %v3027_v45 = vpop.f32.mrb[66].mxu0  ;;  %v3033_v4 = vadd.f32 %v3025_v10, %v7137_v46  ;;  %v7417_v9 = vld [vmem:[%s7726_s10 + $0xec] ss:$16 sps:$4 sm:$0xff]   ;;  %v7424_v10 = vld [vmem:[%s7726_s10 + $0xe0] ss:$16 sps:$4 sm:$0xff]  }
 0xcc2   :  { %v3034_v23 = vmul.f32 0.5, %v3030_v42  ;;  %v2987_v3 = vpop.f32.mrb[63].mxu1  ;;  %v3028_v37 = vpop.f32.mrb[67].mxu0  ;;  %v3036_v19 = vmul.f32 0.5, %v3032_v50  ;;  %v7412_v42 = vld [vmem:[%s7726_s10 + $0xe4] ss:$16 sps:$4 sm:$0xff]  }
 0xcc3   :  { %v3035_v18 = vmul.f32 0.5, %v3031_v54  ;;  %v7429_v54 = vld [vmem:[%s7726_s10 + $0xe8] ss:$16 sps:$4 sm:$0xff]  }
 0xcc4   :  { %5545 = vtanh.f32 %v3034_v23 }
 0xcc5   :  { %5547 = vtanh.f32 %v3035_v18 }
 0xcc6   :  { %5549 = vtanh.f32 %v3033_v4 }
 0xcc7   :  { %5551 = vtanh.f32 %v3036_v19 }
 0xcce   :  { %v5546_v33 = vpop.eup %5545 }
 0xccf   :  { %v3040_v57 = vmul.f32 0.5, %v5546_v33  ;;  %v5548_v20 = vpop.eup %5547 }
 0xcd0   :  { %v3041_v27 = vmul.f32 0.5, %v5548_v20  ;;  %v5550_v28 = vpop.eup %5549 }
 0xcd1   :  { %v3043_v51 = vadd.f32 0.5, %v3040_v57  ;;  %v5552_v5 = vpop.eup %5551 }
 0xcd2   :  { %v3044_v34 = vadd.f32 0.5, %v3041_v27  ;;  %v3042_v6 = vmul.f32 0.5, %v5552_v5 }
 0xcd3   :  { %v3048_v30 = vmul.f32 %v5550_v28, %v3043_v51 }
 0xcd4   :  { %v3047_v61 = vmul.f32 %v3044_v34, %v7190_v22  ;;  %v3045_v36 = vadd.f32 0.5, %v3042_v6  ;;  %v7366_v22 = vld [vmem:[%s7726_s10 + $0xa0] ss:$16 sps:$4 sm:$0xff]  }
 0xcd6   :  { %v7234_v0 = vadd.f32 %v3048_v30, %v3047_v61 }
 0xcd8   :  { %5553 = vtanh.f32 %v7234_v0 }
 0xce2   :  { %v5554_v25 = vpop.eup %5553 }
 0xce3   :  { %v7237_v44 = vmul.f32 %v5554_v25, %v3045_v36 }
 0xce5   :  { %v3053_v21 = vpack.c.bf16 %v7237_v44, %v7237_v44 }
 0xce7   :  { %3279 = vmatmul.mubr.bf16.vlgmr.msra.gmra.mrb[64].mxu1 %v3053_v21  ;;  %3320 = vmatmul.mubr.bf16.vlgmr.msra.gmra.mrb[68].mxu0 %v3053_v21 }
 0xce8   :  { %3576 = vmatprep.mubr.bf16.mxu1 %v7753_v35  ;;  %3617 = vmatprep.mubr.bf16.mxu0 %v7753_v35 }
 0xce9   :  { %3545 = vmatpush1.bf16.msra.mxu1 %v7256_v56  ;;  %3586 = vmatpush1.bf16.msra.mxu0 %v7261_v11 }
 0xcea   :  { %3546 = vmatprep.subr.bf16.mxu1 %v7270_v17  ;;  %3587 = vmatprep.subr.bf16.mxu0 %v7275_v52 }
 0xced   :  { %3547 = vmatpush1.bf16.msra.mxu1 %v7280_v29  ;;  %3588 = vmatpush1.bf16.msra.mxu0 %v7285_v49 }
 0xcee   :  { %3548 = vmatprep.subr.bf16.mxu1 %v7294_v7  ;;  %3589 = vmatprep.subr.bf16.mxu0 %v7299_v13 }
 0xcf1   :  { %3549 = vmatpush1.bf16.msra.mxu1 %v7304_v38  ;;  %3590 = vmatpush1.bf16.msra.mxu0 %v7309_v41 }
 0xcf2   :  { %3550 = vmatprep.subr.bf16.mxu1 %v7318_v2  ;;  %3591 = vmatprep.subr.bf16.mxu0 %v7323_v26 }
 0xcf5   :  { %3551 = vmatpush1.bf16.msra.mxu1 %v7328_v1  ;;  %3592 = vmatpush1.bf16.msra.mxu0 %v7333_v14 }
 0xcf6   :  { %3552 = vmatprep.subr.bf16.mxu1 %v7342_v63  ;;  %3593 = vmatprep.subr.bf16.mxu0 %v7347_v15 }
 0xcf9   :  { %3553 = vmatpush1.bf16.msra.mxu1 %v7352_v59  ;;  %3594 = vmatpush1.bf16.msra.mxu0 %v7357_v32 }
 0xcfa   :  { %3554 = vmatprep.subr.bf16.mxu1 %v7371_v55  ;;  %3595 = vmatprep.subr.bf16.mxu0 %v7381_v43 }
 0xcfd   :  { %3555 = vmatpush1.bf16.msra.mxu1 %v7366_v22  ;;  %3596 = vmatpush1.bf16.msra.mxu0 %v7376_v40 }
 0xcfe   :  { %3556 = vmatprep.subr.bf16.mxu1 %v7386_v47  ;;  %3597 = vmatprep.subr.bf16.mxu0 %v7392_v58 }
 0xd01   :  { %3557 = vmatpush1.bf16.msra.mxu1 %v7400_v62  ;;  %3598 = vmatpush1.bf16.msra.mxu0 %v7405_v8 }
 0xd02   :  { %3558 = vmatprep.subr.bf16.mxu1 %v7412_v42  ;;  %3599 = vmatprep.subr.bf16.mxu0 %v7417_v9 }
 0xd05   :  { %3559 = vmatpush1.bf16.msra.mxu1 %v7424_v10  ;;  %3600 = vmatpush1.bf16.msra.mxu0 %v7429_v54 }
 0xd06   :  { %3842 = vmatprep.subr.bf16.mxu1 %v7246_v60  ;;  %3883 = vmatprep.subr.bf16.mxu0 %v7251_v39 }
 0xdba   :  { %v3280_v12 = vpop.f32.mrb[64].mxu1  ;;  %v3321_v45 = vpop.f32.mrb[68].mxu0 }
 0xdbb   :  { %v3328_v23 = vadd.f32 %v3280_v12, %v7130_v53  ;;  %v3282_v3 = vpop.f32.mrb[65].mxu1  ;;  %v3323_v37 = vpop.f32.mrb[69].mxu0  ;;  %v3330_v27 = vadd.f32 %v3321_v45, %v7141_v24 }
 0xdbc   :  { %v3329_v18 = vadd.f32 %v3282_v3, %v7133_v16  ;;  %v3284_v4 = vpop.f32.mrb[66].mxu1  ;;  %v3325_v50 = vpop.f32.mrb[70].mxu0  ;;  %v3331_v51 = vadd.f32 %v3323_v37, %v7137_v46 }
 0xdbd   :  { %v3332_v19 = vmul.f32 0.5, %v3328_v23  ;;  %v3285_v33 = vpop.f32.mrb[67].mxu1  ;;  %v3326_v57 = vpop.f32.mrb[71].mxu0  ;;  %v3334_v28 = vmul.f32 0.5, %v3330_v27 }
 0xdbe   :  { %v3333_v20 = vmul.f32 0.5, %v3329_v18 }
 0xdbf   :  { %5555 = vtanh.f32 %v3332_v19 }
 0xdc0   :  { %5557 = vtanh.f32 %v3333_v20 }
 0xdc1   :  { %5559 = vtanh.f32 %v3331_v51 }
 0xdc2   :  { %5561 = vtanh.f32 %v3334_v28 }
 0xdc9   :  { %v5556_v34 = vpop.eup %5555 }
 0xdca   :  { %v3338_v30 = vmul.f32 0.5, %v5556_v34  ;;  %v5558_v61 = vpop.eup %5557 }
 0xdcb   :  { %v3339_v6 = vmul.f32 0.5, %v5558_v61  ;;  %v5560_v36 = vpop.eup %5559 }
 0xdcc   :  { %v3341_v5 = vadd.f32 0.5, %v3338_v30  ;;  %v5562_v3 = vpop.eup %5561 }
 0xdcd   :  { %v3342_v25 = vadd.f32 0.5, %v3339_v6  ;;  %v3340_v37 = vmul.f32 0.5, %v5562_v3 }
 0xdce   :  { %v3346_v21 = vmul.f32 %v5560_v36, %v3341_v5 }
 0xdcf   :  { %v3345_v12 = vmul.f32 %v3342_v25, %v7234_v0  ;;  %v3343_v18 = vadd.f32 0.5, %v3340_v37 }
 0xdd1   :  { %v7442_v23 = vadd.f32 %v3346_v21, %v3345_v12 }
 0xdd3   :  { %5563 = vtanh.f32 %v7442_v23 }
 0xddd   :  { %v5564_v45 = vpop.eup %5563 }
 0xdde   :  { %v7445_v4 = vmul.f32 %v5564_v45, %v3343_v18 }
 0xde0   :  { %v3351_v50 = vpack.c.bf16 %v7445_v4, %v7445_v4 }
 0xde2   :  { %3577 = vmatmul.mubr.bf16.vlgmr.msra.gmra.mrb[68].mxu1 %v3351_v50  ;;  %3618 = vmatmul.mubr.bf16.vlgmr.msra.gmra.mrb[72].mxu0 %v3351_v50 }
 0xde3   :  { %3843 = vmatpush1.bf16.msra.mxu1 %v7256_v56  ;;  %3884 = vmatpush1.bf16.msra.mxu0 %v7261_v11 }
 0xde4   :  { %3844 = vmatprep.subr.bf16.mxu1 %v7270_v17  ;;  %3885 = vmatprep.subr.bf16.mxu0 %v7275_v52 }
 0xde5   :  { %3874 = vmatprep.mubr.bf16.mxu1 %v7753_v35  ;;  %3915 = vmatprep.mubr.bf16.mxu0 %v7753_v35 }
 0xde7   :  { %3845 = vmatpush1.bf16.msra.mxu1 %v7280_v29  ;;  %3886 = vmatpush1.bf16.msra.mxu0 %v7285_v49 }
 0xde8   :  { %3846 = vmatprep.subr.bf16.mxu1 %v7294_v7  ;;  %3887 = vmatprep.subr.bf16.mxu0 %v7299_v13 }
 0xdeb   :  { %3847 = vmatpush1.bf16.msra.mxu1 %v7304_v38  ;;  %3888 = vmatpush1.bf16.msra.mxu0 %v7309_v41 }
 0xdec   :  { %3848 = vmatprep.subr.bf16.mxu1 %v7318_v2  ;;  %3889 = vmatprep.subr.bf16.mxu0 %v7323_v26 }
 0xdef   :  { %3849 = vmatpush1.bf16.msra.mxu1 %v7328_v1  ;;  %3890 = vmatpush1.bf16.msra.mxu0 %v7333_v14 }
 0xdf0   :  { %3850 = vmatprep.subr.bf16.mxu1 %v7342_v63  ;;  %3891 = vmatprep.subr.bf16.mxu0 %v7347_v15 }
 0xdf3   :  { %3851 = vmatpush1.bf16.msra.mxu1 %v7352_v59  ;;  %3892 = vmatpush1.bf16.msra.mxu0 %v7357_v32 }
 0xdf4   :  { %3852 = vmatprep.subr.bf16.mxu1 %v7371_v55  ;;  %3893 = vmatprep.subr.bf16.mxu0 %v7381_v43 }
 0xdf7   :  { %3853 = vmatpush1.bf16.msra.mxu1 %v7366_v22  ;;  %3894 = vmatpush1.bf16.msra.mxu0 %v7376_v40 }
 0xdf8   :  { %3854 = vmatprep.subr.bf16.mxu1 %v7386_v47  ;;  %3895 = vmatprep.subr.bf16.mxu0 %v7392_v58 }
 0xdfb   :  { %3855 = vmatpush1.bf16.msra.mxu1 %v7400_v62  ;;  %3896 = vmatpush1.bf16.msra.mxu0 %v7405_v8 }
 0xdfc   :  { %3856 = vmatprep.subr.bf16.mxu1 %v7412_v42  ;;  %3897 = vmatprep.subr.bf16.mxu0 %v7417_v9 }
 0xdff   :  { %3857 = vmatpush1.bf16.msra.mxu1 %v7424_v10  ;;  %3898 = vmatpush1.bf16.msra.mxu0 %v7429_v54 }
 0xe00   :  { %4140 = vmatprep.subr.bf16.mxu1 %v7246_v60  ;;  %4181 = vmatprep.subr.bf16.mxu0 %v7251_v39 }
 0xeb5   :  { %v3578_v0 = vpop.f32.mrb[68].mxu1  ;;  %v3619_v19 = vpop.f32.mrb[72].mxu0 }
 0xeb6   :  { %v3626_v33 = vadd.f32 %v3578_v0, %v7130_v53  ;;  %v3580_v57 = vpop.f32.mrb[69].mxu1  ;;  %v3621_v20 = vpop.f32.mrb[73].mxu0  ;;  %v3628_v36 = vadd.f32 %v3619_v19, %v7141_v24 }
 0xeb7   :  { %v3627_v51 = vadd.f32 %v3580_v57, %v7133_v16  ;;  %v3582_v27 = vpop.f32.mrb[70].mxu1  ;;  %v3623_v28 = vpop.f32.mrb[74].mxu0  ;;  %v3629_v6 = vadd.f32 %v3621_v20, %v7137_v46 }
 0xeb8   :  { %v3630_v34 = vmul.f32 0.5, %v3626_v33  ;;  %v3583_v30 = vpop.f32.mrb[71].mxu1  ;;  %v3624_v61 = vpop.f32.mrb[75].mxu0  ;;  %v3632_v25 = vmul.f32 0.5, %v3628_v36 }
 0xeb9   :  { %v3631_v5 = vmul.f32 0.5, %v3627_v51 }
 0xeba   :  { %5565 = vtanh.f32 %v3630_v34 }
 0xebb   :  { %5567 = vtanh.f32 %v3631_v5 }
 0xebc   :  { %5569 = vtanh.f32 %v3629_v6 }
 0xebd   :  { %5571 = vtanh.f32 %v3632_v25 }
 0xec4   :  { %v5566_v21 = vpop.eup %5565 }
 0xec5   :  { %v3636_v12 = vmul.f32 0.5, %v5566_v21  ;;  %v5568_v3 = vpop.eup %5567 }
 0xec6   :  { %v3637_v18 = vmul.f32 0.5, %v5568_v3  ;;  %v5570_v45 = vpop.eup %5569 }
 0xec7   :  { %v3639_v37 = vadd.f32 0.5, %v3636_v12  ;;  %v5572_v20 = vpop.eup %5571 }
 0xec8   :  { %v3640_v50 = vadd.f32 0.5, %v3637_v18  ;;  %v3638_v51 = vmul.f32 0.5, %v5572_v20 }
 0xec9   :  { %v3644_v0 = vmul.f32 %v5570_v45, %v3639_v37 }
 0xeca   :  { %v3643_v33 = vmul.f32 %v3640_v50, %v7442_v23  ;;  %v3641_v27 = vadd.f32 0.5, %v3638_v51 }
 0xecc   :  { %v7488_v57 = vadd.f32 %v3644_v0, %v3643_v33 }
 0xece   :  { %5573 = vtanh.f32 %v7488_v57 }
 0xed8   :  { %v5574_v19 = vpop.eup %5573 }
 0xed9   :  { %v7491_v28 = vmul.f32 %v5574_v19, %v3641_v27 }
 0xedb   :  { %v3649_v34 = vpack.c.bf16 %v7491_v28, %v7491_v28 }
 0xedd   :  { %3875 = vmatmul.mubr.bf16.vlgmr.msra.gmra.mrb[72].mxu1 %v3649_v34  ;;  %3916 = vmatmul.mubr.bf16.vlgmr.msra.gmra.mrb[76].mxu0 %v3649_v34 }
 0xede   :  { %4141 = vmatpush1.bf16.msra.mxu1 %v7256_v56  ;;  %4182 = vmatpush1.bf16.msra.mxu0 %v7261_v11 }
 0xedf   :  { %4142 = vmatprep.subr.bf16.mxu1 %v7270_v17  ;;  %4183 = vmatprep.subr.bf16.mxu0 %v7275_v52 }
 0xee0   :  { %4172 = vmatprep.mubr.bf16.mxu1 %v7753_v35  ;;  %4213 = vmatprep.mubr.bf16.mxu0 %v7753_v35 }
 0xee2   :  { %4143 = vmatpush1.bf16.msra.mxu1 %v7280_v29  ;;  %4184 = vmatpush1.bf16.msra.mxu0 %v7285_v49 }
 0xee3   :  { %4144 = vmatprep.subr.bf16.mxu1 %v7294_v7  ;;  %4185 = vmatprep.subr.bf16.mxu0 %v7299_v13 }
 0xee6   :  { %4145 = vmatpush1.bf16.msra.mxu1 %v7304_v38  ;;  %4186 = vmatpush1.bf16.msra.mxu0 %v7309_v41 }
 0xee7   :  { %4146 = vmatprep.subr.bf16.mxu1 %v7318_v2  ;;  %4187 = vmatprep.subr.bf16.mxu0 %v7323_v26 }
 0xeea   :  { %4147 = vmatpush1.bf16.msra.mxu1 %v7328_v1  ;;  %4188 = vmatpush1.bf16.msra.mxu0 %v7333_v14 }
 0xeeb   :  { %4148 = vmatprep.subr.bf16.mxu1 %v7342_v63  ;;  %4189 = vmatprep.subr.bf16.mxu0 %v7347_v15 }
 0xeee   :  { %4149 = vmatpush1.bf16.msra.mxu1 %v7352_v59  ;;  %4190 = vmatpush1.bf16.msra.mxu0 %v7357_v32 }
 0xeef   :  { %4150 = vmatprep.subr.bf16.mxu1 %v7371_v55  ;;  %4191 = vmatprep.subr.bf16.mxu0 %v7381_v43 }
 0xef2   :  { %4151 = vmatpush1.bf16.msra.mxu1 %v7366_v22  ;;  %4192 = vmatpush1.bf16.msra.mxu0 %v7376_v40 }
 0xef3   :  { %4152 = vmatprep.subr.bf16.mxu1 %v7386_v47  ;;  %4193 = vmatprep.subr.bf16.mxu0 %v7392_v58 }
 0xef6   :  { %4153 = vmatpush1.bf16.msra.mxu1 %v7400_v62  ;;  %4194 = vmatpush1.bf16.msra.mxu0 %v7405_v8 }
 0xef7   :  { %4154 = vmatprep.subr.bf16.mxu1 %v7412_v42  ;;  %4195 = vmatprep.subr.bf16.mxu0 %v7417_v9 }
 0xefa   :  { %4155 = vmatpush1.bf16.msra.mxu1 %v7424_v10  ;;  %4196 = vmatpush1.bf16.msra.mxu0 %v7429_v54 }
 0xefb   :  { %4438 = vmatprep.subr.bf16.mxu1 %v7246_v60  ;;  %4479 = vmatprep.subr.bf16.mxu0 %v7251_v39 }
 0xfb0   :  { %v3876_v23 = vpop.f32.mrb[72].mxu1  ;;  %v3917_v30 = vpop.f32.mrb[76].mxu0 }
 0xfb1   :  { %v3924_v61 = vadd.f32 %v3876_v23, %v7130_v53  ;;  %v3878_v5 = vpop.f32.mrb[73].mxu1  ;;  %v3919_v6 = vpop.f32.mrb[77].mxu0  ;;  %v3926_v60 = vadd.f32 %v3917_v30, %v7141_v24 }
 0xfb2   :  { %v3925_v36 = vadd.f32 %v3878_v5, %v7133_v16  ;;  %v3880_v25 = vpop.f32.mrb[74].mxu1  ;;  %v3921_v21 = vpop.f32.mrb[78].mxu0  ;;  %v3927_v45 = vadd.f32 %v3919_v6, %v7137_v46 }
 0xfb3   :  { %v3928_v12 = vmul.f32 0.5, %v3924_v61  ;;  %v3881_v3 = vpop.f32.mrb[75].mxu1  ;;  %v3922_v37 = vpop.f32.mrb[79].mxu0  ;;  %v3930_v39 = vmul.f32 0.5, %v3926_v60  ;;  %v5444_v60 = vld [vmem:[%s7729_s11 + $0x38] sm:$0xff]  }
 0xfb4   :  { %v3929_v18 = vmul.f32 0.5, %v3925_v36  ;;  %v4551_v3 = vpack.c.bf16 %v7193_v48, %v7147_v31  ;;  %v5439_v37 = vld [vmem:[%s7729_s11 + $0x10] sm:$0xff]   ;;  %v5441_v31 = vld [vmem:[%s7729_s11 + $0x20] sm:$0xff]   ;;  %v5442_v48 = vld [vmem:[%s7729_s11 + $0x28] sm:$0xff]  }
 0xfb5   :  { %5575 = vtanh.f32 %v3928_v12  ;;  %v5438_v12 = vld [vmem:[%s7729_s11 + $0x8] sm:$0xff]  }
 0xfb6   :  { %5577 = vtanh.f32 %v3929_v18  ;;  %v5440_v18 = vld [vmem:[%s7729_s11 + $0x18] sm:$0xff]  }
 0xfb7   :  { %5579 = vtanh.f32 %v3927_v45  ;;  %v5443_v45 = vld [vmem:[%s7729_s11 + $0x30] sm:$0xff]  }
 0xfb8   :  { %5581 = vtanh.f32 %v3930_v39  ;;  %v4552_v39 = vpack.c.bf16 %v7445_v4, %v7237_v44 }
 0xfbf   :  { %v5576_v50 = vpop.eup %5575 }
 0xfc0   :  { %v3934_v0 = vmul.f32 0.5, %v5576_v50  ;;  %v5578_v33 = vpop.eup %5577 }
 0xfc1   :  { %v3935_v51 = vmul.f32 0.5, %v5578_v33  ;;  %v5580_v27 = vpop.eup %5579 }
 0xfc2   :  { %v3937_v20 = vadd.f32 0.5, %v3934_v0  ;;  %v5582_v5 = vpop.eup %5581 }
 0xfc3   :  { %v3938_v19 = vadd.f32 0.5, %v3935_v51  ;;  %v3936_v6 = vmul.f32 0.5, %v5582_v5 }
 0xfc4   :  { %v3942_v34 = vmul.f32 %v5580_v27, %v3937_v20 }
 0xfc5   :  { %v3941_v23 = vmul.f32 %v3938_v19, %v7488_v57  ;;  %v3939_v36 = vadd.f32 0.5, %v3936_v6 }
 0xfc7   :  { %v7534_v61 = vadd.f32 %v3942_v34, %v3941_v23 }
 0xfc9   :  { %5583 = vtanh.f32 %v7534_v61 }
 0xfd3   :  { %v5584_v30 = vpop.eup %5583 }
 0xfd4   :  { %v7537_v25 = vmul.f32 %v5584_v30, %v3939_v36 }
 0xfd6   :  { %v3947_v21 = vpack.c.bf16 %v7537_v25, %v7537_v25  ;;  %v4553_v50 = vpack.c.bf16 %v7537_v25, %v7491_v28 }
 0xfd8   :  { %4173 = vmatmul.mubr.bf16.vlgmr.msra.gmra.mrb[76].mxu1 %v3947_v21  ;;  %4214 = vmatmul.mubr.bf16.vlgmr.msra.gmra.mrb[80].mxu0 %v3947_v21 }
 0xfd9   :  { %4439 = vmatpush1.bf16.msra.mxu1 %v7256_v56  ;;  %4480 = vmatpush1.bf16.msra.mxu0 %v7261_v11 }
 0xfda   :  { %4440 = vmatprep.subr.bf16.mxu1 %v7270_v17  ;;  %4481 = vmatprep.subr.bf16.mxu0 %v7275_v52 }
 0xfdb   :  { %4470 = vmatprep.mubr.bf16.mxu1 %v7753_v35  ;;  %4511 = vmatprep.mubr.bf16.mxu0 %v7753_v35  ;;  %v5437_v35 = vld [vmem:[%s7729_s11] sm:$0xff]  }
 0xfdd   :  { %4441 = vmatpush1.bf16.msra.mxu1 %v7280_v29  ;;  %4482 = vmatpush1.bf16.msra.mxu0 %v7285_v49 }
 0xfde   :  { %4442 = vmatprep.subr.bf16.mxu1 %v7294_v7  ;;  %4483 = vmatprep.subr.bf16.mxu0 %v7299_v13 }
 0xfe1   :  { %4443 = vmatpush1.bf16.msra.mxu1 %v7304_v38  ;;  %4484 = vmatpush1.bf16.msra.mxu0 %v7309_v41 }
 0xfe2   :  { %4444 = vmatprep.subr.bf16.mxu1 %v7318_v2  ;;  %4485 = vmatprep.subr.bf16.mxu0 %v7323_v26 }
 0xfe5   :  { %4445 = vmatpush1.bf16.msra.mxu1 %v7328_v1  ;;  %4486 = vmatpush1.bf16.msra.mxu0 %v7333_v14 }
 0xfe6   :  { %4446 = vmatprep.subr.bf16.mxu1 %v7342_v63  ;;  %4487 = vmatprep.subr.bf16.mxu0 %v7347_v15 }
 0xfe9   :  { %4447 = vmatpush1.bf16.msra.mxu1 %v7352_v59  ;;  %4488 = vmatpush1.bf16.msra.mxu0 %v7357_v32 }
 0xfea   :  { %4448 = vmatprep.subr.bf16.mxu1 %v7371_v55  ;;  %4489 = vmatprep.subr.bf16.mxu0 %v7381_v43 }
 0xfed   :  { %4449 = vmatpush1.bf16.msra.mxu1 %v7366_v22  ;;  %4490 = vmatpush1.bf16.msra.mxu0 %v7376_v40 }
 0xfee   :  { %4450 = vmatprep.subr.bf16.mxu1 %v7386_v47  ;;  %4491 = vmatprep.subr.bf16.mxu0 %v7392_v58 }
 0xff1   :  { %4451 = vmatpush1.bf16.msra.mxu1 %v7400_v62  ;;  %4492 = vmatpush1.bf16.msra.mxu0 %v7405_v8 }
 0xff2   :  { %4452 = vmatprep.subr.bf16.mxu1 %v7412_v42  ;;  %4493 = vmatprep.subr.bf16.mxu0 %v7417_v9 }
 0xff5   :  { %4453 = vmatpush1.bf16.msra.mxu1 %v7424_v10  ;;  %4494 = vmatpush1.bf16.msra.mxu0 %v7429_v54 }
 0xff6   :  { %5157 = vmatprep.subr.bf16.mxu1 %v5437_v35 }
0x10ab   :  { %v4174_v56 = vpop.f32.mrb[76].mxu1  ;;  %v4215_v11 = vpop.f32.mrb[80].mxu0 }
0x10ac   :  { %v4222_v17 = vadd.f32 %v4174_v56, %v7130_v53  ;;  %v4176_v52 = vpop.f32.mrb[77].mxu1  ;;  %v4217_v29 = vpop.f32.mrb[81].mxu0  ;;  %v4224_v14 = vadd.f32 %v4215_v11, %v7141_v24 }
0x10ad   :  { %v4223_v49 = vadd.f32 %v4176_v52, %v7133_v16  ;;  %v4178_v7 = vpop.f32.mrb[78].mxu1  ;;  %v4219_v13 = vpop.f32.mrb[82].mxu0  ;;  %v4225_v1 = vadd.f32 %v4217_v29, %v7137_v46  ;;  %v7812_v29 = vlaneseq }
0x10ae   :  { %v4226_v38 = vmul.f32 0.5, %v4222_v17  ;;  %v4179_v41 = vpop.f32.mrb[79].mxu1  ;;  %v4220_v2 = vpop.f32.mrb[83].mxu0  ;;  %v4228_v63 = vmul.f32 0.5, %v4224_v14 }
0x10af   :  { %v4227_v26 = vmul.f32 0.5, %v4223_v49  ;;  %v7621_v49 = vand.u32 127, %v7812_v29 }
0x10b0   :  { %5585 = vtanh.f32 %v4226_v38 }
0x10b1   :  { %5587 = vtanh.f32 %v4227_v26  ;;  %vm4693_vm2 = vcmp.ge.s32.totalorder %v7621_v49, 2  ;;  %vm4694_vm3 = vcmp.lt.s32.totalorder %v7621_v49, 4  ;;  %vm4720_vm5 = vcmp.lt.s32.totalorder %v7621_v49, 2 }
0x10b2   :  { %5589 = vtanh.f32 %v4225_v1  ;;  %vm7632_vm4 = vmand %vm4693_vm2, %vm4694_vm3 }
0x10b3   :  { %5591 = vtanh.f32 %v4228_v63 }
0x10ba   :  { %v5586_v15 = vpop.eup %5585 }
0x10bb   :  { %v4232_v59 = vmul.f32 0.5, %v5586_v15  ;;  %v5588_v32 = vpop.eup %5587 }
0x10bc   :  { %v4233_v55 = vmul.f32 0.5, %v5588_v32  ;;  %v5590_v40 = vpop.eup %5589 }
0x10bd   :  { %v4235_v22 = vadd.f32 0.5, %v4232_v59  ;;  %v5592_v8 = vpop.eup %5591 }
0x10be   :  { %v4236_v43 = vadd.f32 0.5, %v4233_v55  ;;  %v4234_v42 = vmul.f32 0.5, %v5592_v8 }
0x10bf   :  { %v4240_v47 = vmul.f32 %v5590_v40, %v4235_v22 }
0x10c0   :  { %v4239_v58 = vmul.f32 %v4236_v43, %v7534_v61  ;;  %v4237_v9 = vadd.f32 0.5, %v4234_v42 }
0x10c2   :  { %v7581_v62 = vadd.f32 %v4240_v47, %v4239_v58 }
0x10c4   :  { %5593 = vtanh.f32 %v7581_v62 }
0x10ce   :  { %v5594_v10 = vpop.eup %5593 }
0x10cf   :  { %v7584_v54 = vmul.f32 %v5594_v10, %v4237_v9 }
0x10d1   :  { %v4245_v57 = vpack.c.bf16 %v7584_v54, %v7584_v54 }
0x10d3   :  { %4471 = vmatmul.mubr.bf16.vlgmr.msra.gmra.mrb[80].mxu1 %v4245_v57  ;;  %4512 = vmatmul.mubr.bf16.vlgmr.msra.gmra.mrb[84].mxu0 %v4245_v57 }
0x10d4   :  { %5158 = vmatpush3.bf16.msra.mxu1 %v5437_v35  ;;  %5173 = vmatprep.mubr.bf16.mxu1 %v4551_v3 }
0x10d5   :  { %5159 = vmatprep.subr.bf16.mxu1 %v5438_v12 }
0x10d8   :  { %5160 = vmatpush3.bf16.msra.mxu1 %v5438_v12 }
0x10d9   :  { %5161 = vmatprep.subr.bf16.mxu1 %v5439_v37 }
0x10dc   :  { %5162 = vmatpush3.bf16.msra.mxu1 %v5439_v37 }
0x10dd   :  { %5163 = vmatprep.subr.bf16.mxu1 %v5440_v18 }
0x10e0   :  { %5164 = vmatpush3.bf16.msra.mxu1 %v5440_v18 }
0x10e1   :  { %5165 = vmatprep.subr.bf16.mxu1 %v5441_v31 }
0x10e4   :  { %5166 = vmatpush3.bf16.msra.mxu1 %v5441_v31 }
0x10e5   :  { %5167 = vmatprep.subr.bf16.mxu1 %v5442_v48 }
0x10e8   :  { %5168 = vmatpush3.bf16.msra.mxu1 %v5442_v48 }
0x10e9   :  { %5169 = vmatprep.subr.bf16.mxu1 %v5443_v45 }
0x10ec   :  { %5170 = vmatpush3.bf16.msra.mxu1 %v5443_v45 }
0x10ed   :  { %5171 = vmatprep.subr.bf16.mxu1 %v5444_v60 }
0x10f0   :  { %5172 = vmatpush3.bf16.msra.mxu1 %v5444_v60 }
0x10f3   :  { %5174 = vmatmul.mubr.bf16.vlgmr.msra.gmra.mrb[84].mxu1 %v4552_v39 }
0x10f4   :  { %5177 = vmatprep.mubr.bf16.mxu1 %v4553_v50 }
0x11a6   :  { %v4472_v0 = vpop.f32.mrb[80].mxu1  ;;  %v4513_v33 = vpop.f32.mrb[84].mxu0 }
0x11a7   :  { %v4520_v20 = vadd.f32 %v4472_v0, %v7130_v53  ;;  %v4474_v51 = vpop.f32.mrb[81].mxu1  ;;  %v4515_v27 = vpop.f32.mrb[85].mxu0  ;;  %v4522_v4 = vadd.f32 %v4513_v33, %v7141_v24  ;;  %v7628_v24 = vld [vmem:[%s7730_s12] ss:$0 sm:$0xff] }
0x11a8   :  { %v4521_v19 = vadd.f32 %v4474_v51, %v7133_v16  ;;  %v4476_v34 = vpop.f32.mrb[82].mxu1  ;;  %v4517_v23 = vpop.f32.mrb[86].mxu0  ;;  %v4523_v44 = vadd.f32 %v4515_v27, %v7137_v46 }
0x11a9   :  { %v4524_v61 = vmul.f32 0.5, %v4520_v20  ;;  %v4477_v5 = vpop.f32.mrb[83].mxu1  ;;  %v4518_v6 = vpop.f32.mrb[87].mxu0  ;;  %v4526_v28 = vmul.f32 0.5, %v4522_v4 }
0x11aa   :  { %v4525_v36 = vmul.f32 0.5, %v4521_v19 }
0x11ab   :  { %5595 = vtanh.f32 %v4524_v61 }
0x11ac   :  { %5597 = vtanh.f32 %v4525_v36 }
0x11ad   :  { %5599 = vtanh.f32 %v4523_v44 }
0x11ae   :  { %5601 = vtanh.f32 %v4526_v28 }
0x11b5   :  { %v5596_v30 = vpop.eup %5595 }
0x11b6   :  { %v4530_v53 = vmul.f32 0.5, %v5596_v30  ;;  %v5598_v25 = vpop.eup %5597 }
0x11b7   :  { %v4531_v16 = vmul.f32 0.5, %v5598_v25  ;;  %v5600_v35 = vpop.eup %5599 }
0x11b8   :  { %v4533_v21 = vadd.f32 0.5, %v4530_v53  ;;  %v5602_v46 = vpop.eup %5601 }
0x11b9   :  { %v4534_v56 = vadd.f32 0.5, %v4531_v16  ;;  %v4532_v7 = vmul.f32 0.5, %v5602_v46 }
0x11ba   :  { %v4538_v11 = vmul.f32 %v5600_v35, %v4533_v21 }
0x11bb   :  { %v4537_v17 = vmul.f32 %v4534_v56, %v7581_v62  ;;  %v4535_v14 = vadd.f32 0.5, %v4532_v7 }
0x11bd   :  { %v4539_v52 = vadd.f32 %v4538_v11, %v4537_v17 }
0x11bf   :  { %5603 = vtanh.f32 %v4539_v52 }
0x11c6   :  { %v5175_v13 = vpop.f32.mrb[84].mxu1 }
0x11c7   :  { %v4669_v41 = vadd.f32 %v5175_v13, %v7628_v24  ;;  %v4660_v2 = vpop.f32.mrb[85].mxu1 }
0x11c8   :  { %v4661_v26 = vadd.f32 %v7628_v24, %v4660_v2  ;;  %v5176_v1 = vpop.f32.mrb[86].mxu1 }
0x11c9   :  { %v4698_v63 = vsel %vm7632_vm4, %v4669_v41, 0.0  ;;  %5605 = vtanh.f32 %v4669_v41  ;;  %v4672_v15 = vadd.f32 %v5176_v1, %v7628_v24  ;;  %v4663_v59 = vpop.f32.mrb[87].mxu1  ;;  %v5604_v32 = vpop.eup %5603 }
0x11ca   :  { %v4708_v22 = vmul.f32 1.442695, %v4698_v63  ;;  %v4696_v55 = vsel %vm7632_vm4, %v4661_v26, 0.0  ;;  %5607 = vtanh.f32 %v4661_v26  ;;  %v4664_v40 = vadd.f32 %v7628_v24, %v4663_v59 }
0x11cb   :  { %v4704_v43 = vmul.f32 1.442695, %v4696_v55  ;;  %v4699_v47 = vsel %vm7632_vm4, %v4672_v15, 0.0  ;;  %5609 = vtanh.f32 %v4672_v15  ;;  %v4541_v58 = vmul.f32 %v5604_v32, %v4535_v14 }
0x11cc   :  { %5611 = vpow2.f32 %v4708_v22  ;;  %v4710_v62 = vmul.f32 1.442695, %v4699_v47  ;;  %v4697_v8 = vsel %vm7632_vm4, %v4664_v40, 0.0 }
0x11cd   :  { %5613 = vpow2.f32 %v4704_v43  ;;  %v4706_v42 = vmul.f32 1.442695, %v4697_v8  ;;  %v4554_v9 = vpack.c.bf16 %v4541_v58, %v7584_v54 }
0x11ce   :  { %5615 = vpow2.f32 %v4710_v62 }
0x11cf   :  { %5617 = vpow2.f32 %v4706_v42  ;;  %5178 = vmatmul.mubr.bf16.gmra.mrb[88].mxu1 %v4554_v9 }
0x11d0   :  { %5619 = vtanh.f32 %v4664_v40 }
0x11d3   :  { %v5606_v10 = vpop.eup %5605 }
0x11d4   :  { %v5608_v57 = vpop.eup %5607 }
0x11d5   :  { %v5610_v12 = vpop.eup %5609 }
0x11d6   :  { %v5612_v3 = vpop.eup %5611 }
0x11d7   :  { %v5614_v37 = vpop.eup %5613  ;;  %v4731_v18 = vsel %vm4694_vm3, %v5612_v3, %v5606_v10 }
0x11d8   :  { %v5616_v31 = vpop.eup %5615  ;;  %v4739_v48 = vsel %vm4720_vm5, %v4669_v41, %v4731_v18  ;;  %v4729_v54 = vsel %vm4694_vm3, %v5614_v37, %v5608_v57 }
0x11d9   :  { %v5618_v45 = vpop.eup %5617  ;;  %4747 = vst [vmem:[%s7731_s13 + $0x10] sm:$0xff] %v4739_v48  ;;  %v4737_v60 = vsel %vm4720_vm5, %v4661_v26, %v4729_v54  ;;  %v4732_v39 = vsel %vm4694_vm3, %v5616_v31, %v5610_v12 }
0x11da   :  { %v5620_v50 = vpop.eup %5619  ;;  %4745 = vst [vmem:[%s7731_s13] sm:$0xff] %v4737_v60  ;;  %v4740_v0 = vsel %vm4720_vm5, %v4672_v15, %v4732_v39 }
0x11db   :  { %4748 = vst [vmem:[%s7731_s13 + $0x18] sm:$0xff] %v4740_v0  ;;  %v4730_v33 = vsel %vm4694_vm3, %v5618_v45, %v5620_v50 }
0x11dc   :  { %v4738_v20 = vsel %vm4720_vm5, %v4664_v40, %v4730_v33 }
0x11dd   :  { %4746 = vst [vmem:[%s7731_s13 + $0x8] sm:$0xff] %v4738_v20 }
0x12a2   :  { %v5179_v51 = vpop.f32.mrb[88].mxu1 }
0x12a3   :  { %v4685_v27 = vadd.f32 %v5179_v51, %v7628_v24  ;;  %v4676_v19 = vpop.f32.mrb[89].mxu1 }
0x12a4   :  { %v4677_v34 = vadd.f32 %v7628_v24, %v4676_v19  ;;  %v5180_v23 = vpop.f32.mrb[90].mxu1 }
0x12a5   :  { %v4702_v61 = vsel %vm7632_vm4, %v4685_v27, 0.0  ;;  %5621 = vtanh.f32 %v4685_v27  ;;  %v4688_v5 = vadd.f32 %v5180_v23, %v7628_v24  ;;  %v4679_v6 = vpop.f32.mrb[91].mxu1 }
0x12a6   :  { %v4716_v36 = vmul.f32 1.442695, %v4702_v61  ;;  %v4700_v44 = vsel %vm7632_vm4, %v4677_v34, 0.0  ;;  %5623 = vtanh.f32 %v4677_v34  ;;  %v4680_v4 = vadd.f32 %v7628_v24, %v4679_v6 }
0x12a7   :  { %v4712_v28 = vmul.f32 1.442695, %v4700_v44  ;;  %v4703_v30 = vsel %vm7632_vm4, %v4688_v5, 0.0  ;;  %5625 = vtanh.f32 %v4688_v5 }
0x12a8   :  { %5627 = vpow2.f32 %v4716_v36  ;;  %v4718_v53 = vmul.f32 1.442695, %v4703_v30  ;;  %v4701_v25 = vsel %vm7632_vm4, %v4680_v4, 0.0 }
0x12a9   :  { %5629 = vpow2.f32 %v4712_v28  ;;  %v4714_v21 = vmul.f32 1.442695, %v4701_v25 }
0x12aa   :  { %5631 = vpow2.f32 %v4718_v53 }
0x12ab   :  { %5633 = vpow2.f32 %v4714_v21 }
0x12ac   :  { %5635 = vtanh.f32 %v4680_v4 }
0x12af   :  { %v5622_v16 = vpop.eup %5621 }
0x12b0   :  { %v5624_v35 = vpop.eup %5623 }
0x12b1   :  { %v5626_v56 = vpop.eup %5625 }
0x12b2   :  { %v5628_v11 = vpop.eup %5627 }
0x12b3   :  { %v5630_v17 = vpop.eup %5629  ;;  %v4735_v52 = vsel %vm4694_vm3, %v5628_v11, %v5622_v16 }
0x12b4   :  { %v5632_v29 = vpop.eup %5631  ;;  %v4743_v46 = vsel %vm4720_vm5, %v4685_v27, %v4735_v52  ;;  %v4733_v24 = vsel %vm4694_vm3, %v5630_v17, %v5624_v35 }
0x12b5   :  { %v5634_v7 = vpop.eup %5633  ;;  %4751 = vst [vmem:[%s7731_s13 + $0x30] sm:$0xff] %v4743_v46  ;;  %v4741_v13 = vsel %vm4720_vm5, %v4677_v34, %v4733_v24  ;;  %v4736_v38 = vsel %vm4694_vm3, %v5632_v29, %v5626_v56 }
0x12b6   :  { %v5636_v41 = vpop.eup %5635  ;;  %4749 = vst [vmem:[%s7731_s13 + $0x20] sm:$0xff] %v4741_v13  ;;  %v4744_v2 = vsel %vm4720_vm5, %v4688_v5, %v4736_v38 }
0x12b7   :  { %4752 = vst [vmem:[%s7731_s13 + $0x38] sm:$0xff] %v4744_v2  ;;  %v4734_v26 = vsel %vm4694_vm3, %v5634_v7, %v5636_v41 }
0x12b8   :  { %v4742_v1 = vsel %vm4720_vm5, %v4680_v4, %v4734_v26 }
0x12b9   :  { %4750 = vst [vmem:[%s7731_s13 + $0x28] sm:$0xff] %v4742_v1 }

</bundles_post_ra>
